<compile_context>
chip_gen: v6e
topology: v6e:2x2x1
jax: 0.10.0
libtpu: 0.0.40
codegen_flags: <defaults>
</compile_context>

<pallas_src>
import numpy as np
import jax
import jax.numpy as jnp
from jax.experimental import pallas as pl
from jax.experimental.pallas import tpu as pltpu


# ----------------------------------------------------------------------------
# Fused kernel: conv1..conv4 (+BN+tanh) + fc, everything VMEM-resident.
# ----------------------------------------------------------------------------
def _disc_kernel(xE_ref, xO_ref,
                 w1_ref, b1_ref, w2_ref, b2_ref, w3_ref, b3_ref, w4_ref, b4_ref,
                 wf_ref, bf_ref,
                 out_ref,
                 pE2, pO2, pE3, pO3, pE4, pO4):
    BC = xE_ref.shape[0]                      # batch-chunk size of this grid step

    def conv_tanh(srcE, srcO, w_ref, b_ref):
        """Conv1d(k=5,s=2,p=2) + folded BN + tanh from parity-split padded input.

        srcE/srcO: (BC, M+2, Cin) even/odd rows of the zero-padded input
                   (channels-last).  Output i uses padded row 2i+k, i.e.
                   parity k%2 at row offset i + k//2 -> contiguous slices only.
        w_ref:     (5*Cin, Cout) packed weight, row index k*Cin + ci.
        b_ref:     (1, Cout)     BN-folded bias.
        """
        _, Mp2, cin = srcE.shape
        M = Mp2 - 2                           # output length of this layer
        cout = w_ref.shape[1]

        def tap(src, off):
            # Contiguous (never strided) read; collapsing (BC, M) is layout
            # preserving since M in {128, 64, 32, 16} is a multiple of 8.
            return src[:, off:off + M, :].reshape(BC * M, cin)

        # 5 accumulating MXU matmuls, statically unrolled (taps k = 0..4).
        acc = jnp.dot(tap(srcE, 0), w_ref[0 * cin:1 * cin, :],
                      preferred_element_type=jnp.float32)
        acc = acc + jnp.dot(tap(srcO, 0), w_ref[1 * cin:2 * cin, :],
                            preferred_element_type=jnp.float32)
        acc = acc + jnp.dot(tap(srcE, 1), w_ref[2 * cin:3 * cin, :],
                            preferred_element_type=jnp.float32)
        acc = acc + jnp.dot(tap(srcO, 1), w_ref[3 * cin:4 * cin, :],
                            preferred_element_type=jnp.float32)
        acc = acc + jnp.dot(tap(srcE, 2), w_ref[4 * cin:5 * cin, :],
                            preferred_element_type=jnp.float32)
        y = jnp.tanh(acc + b_ref[...])        # bias broadcast applied once
        return y.reshape(BC, M, cout)

    def write_parity_split(y, dstE, dstO):
        """Store activation y (BC, M, C) as the next layer's padded parity bufs."""
        _, M, c = y.shape
        h = M // 2
        # Pair consecutive rows (2i, 2i+1); this is the single sublane
        # de-interleave per layer boundary that stride-2 conv requires.
        yr = y.reshape(BC, h, 2, c)
        z = jnp.zeros((BC, 1, c), jnp.float32)
        dstE[:, 0:1, :] = z
        dstE[:, 1:h + 1, :] = yr[:, :, 0, :]  # even positions
        dstE[:, h + 1:h + 2, :] = z
        dstO[:, 0:1, :] = z
        dstO[:, 1:h + 1, :] = yr[:, :, 1, :]  # odd positions
        dstO[:, h + 1:h + 2, :] = z

    y1 = conv_tanh(xE_ref, xO_ref, w1_ref, b1_ref)    # (BC, 128,  32)
    write_parity_split(y1, pE2, pO2)
    y2 = conv_tanh(pE2, pO2, w2_ref, b2_ref)          # (BC,  64,  64)
    write_parity_split(y2, pE3, pO3)
    y3 = conv_tanh(pE3, pO3, w3_ref, b3_ref)          # (BC,  32, 128)
    write_parity_split(y3, pE4, pO4)
    y4 = conv_tanh(pE4, pO4, w4_ref, b4_ref)          # (BC,  16, 256)

    # Final Linear(256*16 -> 1) on the VPU.  wf is pre-permuted to the kernel's
    # channels-last (16, 256) layout so it multiplies y4 directly.
    prod = y4 * wf_ref[...][None, :, :]               # (BC, 16, 256)
    s = jnp.sum(prod, axis=2)                         # lane reduce -> (BC, 16)
    out_ref[...] = jnp.sum(s, axis=1, keepdims=True) + bf_ref[...]


# ----------------------------------------------------------------------------
# Wrapper
# ----------------------------------------------------------------------------
def discriminator_forward(packed, x_ncl):
    """x_ncl: (B, 2, L=256) float32 in PyTorch NCL layout.  Returns (B, 1)."""
    B, cin, L = x_ncl.shape
    assert cin == 2 and L == 256, (B, cin, L)     # fc fixes L (flatten 256*16)

    # One-time layout prep on the tiny input (outside the kernel): NCL ->
    # channels-last, zero-pad by 2 each side, split even/odd positions so every
    # in-kernel tap read is a contiguous VMEM slice and no 2-lane-wide staging
    # buffer is needed inside the kernel.
    x_cl = jnp.transpose(x_ncl, (0, 2, 1))                    # (B, L, 2)
    xr = x_cl.reshape(B, L // 2, 2, cin)
    z = jnp.zeros((B, 1, cin), x_cl.dtype)
    xE = jnp.concatenate([z, xr[:, :, 0, :], z], axis=1)      # (B, L//2+2, 2)
    xO = jnp.concatenate([z, xr[:, :, 1, :], z], axis=1)      # (B, L//2+2, 2)

    # Batch-chunked grid: VMEM per step stays ~constant as B grows and the
    # "parallel" axis lets v7x shard chunks across both TensorCores.
    BC = 8 if B % 8 == 0 else B
    grid = (B // BC,)

    def chunk_spec(shape):
        return pl.BlockSpec(shape, lambda b: (b,) + (0,) * (len(shape) - 1))

    def whole_spec(arr):
        return pl.BlockSpec(arr.shape, lambda b: (0,) * arr.ndim)

    weights = (packed["w1"], packed["b1"], packed["w2"], packed["b2"],
               packed["w3"], packed["b3"], packed["w4"], packed["b4"],
               packed["wf"], packed["bf"])

    in_specs = [chunk_spec((BC, L // 2 + 2, cin)),
                chunk_spec((BC, L // 2 + 2, cin))]
    in_specs += [whole_spec(w) for w in weights]

    # Parity-split padded activation buffers (even, odd) for layers 2..4.
    scratch = []
    cur = L // 2                                   # layer-1 output length
    for c in (32, 64, 128):
        scratch.append(pltpu.VMEM((BC, cur // 2 + 2, c), jnp.float32))  # even
        scratch.append(pltpu.VMEM((BC, cur // 2 + 2, c), jnp.float32))  # odd
        cur //= 2

    return pl.pallas_call(
        _disc_kernel,
        out_shape=jax.ShapeDtypeStruct((B, 1), jnp.float32),
        grid=grid,
        in_specs=in_specs,
        out_specs=chunk_spec((BC, 1)),
        scratch_shapes=scratch,
        compiler_params=pltpu.CompilerParams(
            dimension_semantics=("parallel",)),
    )(xE, xO, *weights)


# ----------------------------------------------------------------------------
# One-time parameter preprocessing (outside the hot path)
# ----------------------------------------------------------------------------
def prepare_params(raw, eps=1e-5):
    """Fold BN (eval mode) into conv weights and pack for the kernel layout."""
    packed = {}
    for i in (1, 2, 3, 4):
        w = raw[f"w{i}"]                                  # (Cout, Cin, 5)
        cout, cin, k = w.shape
        scale = raw[f"gamma{i}"] / jnp.sqrt(raw[f"var{i}"] + eps)
        wp = jnp.transpose(w, (2, 1, 0)).reshape(k * cin, cout)   # row = k*Cin+ci
        packed[f"w{i}"] = (wp * scale[None, :]).astype(jnp.float32)
        bp = (raw[f"b{i}"] - raw[f"mean{i}"]) * scale + raw[f"beta{i}"]
        packed[f"b{i}"] = bp.reshape(1, cout).astype(jnp.float32)
    # Torch flattens the (B, 256, 16) NCL activation with index c*16 + l; the
    # kernel's layer-4 activation is channels-last (B, 16, 256), so permute the
    # fc weight once to (l, c).
    packed["wf"] = raw["fc_w"].reshape(256, 16).T.astype(jnp.float32)  # (16, 256)
    packed["bf"] = raw["fc_b"].reshape(1, 1).astype(jnp.float32)
    return packed


# ----------------------------------------------------------------------------
# Deterministic synthetic parameters (PyTorch layouts)
# ----------------------------------------------------------------------------
def init_params(key):
    cfgs = [("1", 2, 32), ("2", 32, 64), ("3", 64, 128), ("4", 128, 256)]
    params = {}
    keys = jax.random.split(key, 4 * 6 + 2)
    ki = 0
    for name, cin, cout in cfgs:
        bound = 1.0 / np.sqrt(cin * 5)
        params[f"w{name}"] = jax.random.uniform(
            keys[ki], (cout, cin, 5), jnp.float32, -bound, bound); ki += 1
        params[f"b{name}"] = jax.random.uniform(
            keys[ki], (cout,), jnp.float32, -bound, bound); ki += 1
        params[f"gamma{name}"] = jax.random.uniform(
            keys[ki], (cout,), jnp.float32, 0.5, 1.5); ki += 1
        params[f"beta{name}"] = jax.random.uniform(
            keys[ki], (cout,), jnp.float32, -0.1, 0.1); ki += 1
        params[f"mean{name}"] = jax.random.uniform(
            keys[ki], (cout,), jnp.float32, -0.1, 0.1); ki += 1
        params[f"var{name}"] = jax.random.uniform(
            keys[ki], (cout,), jnp.float32, 0.5, 1.5); ki += 1
    bound = 1.0 / np.sqrt(256 * 16)
    params["fc_w"] = jax.random.uniform(
        keys[ki], (1, 256 * 16), jnp.float32, -bound, bound); ki += 1
    params["fc_b"] = jax.random.uniform(
        keys[ki], (1,), jnp.float32, -bound, bound)
    return params


# ----------------------------------------------------------------------------
# NumPy (float64) reference: Conv1d + eval-mode BatchNorm1d + Tanh, then fc.
# ----------------------------------------------------------------------------
def _conv1d_np(x, w, b, stride, padding):
    B, cin, L = x.shape
    cout, _, K = w.shape
    Lout = (L + 2 * padding - K) // stride + 1
    xp = np.zeros((B, cin, L + 2 * padding), dtype=np.float64)
    xp[:, :, padding:padding + L] = x
    y = np.empty((B, cout, Lout), dtype=np.float64)
    for i in range(Lout):
        seg = xp[:, :, i * stride:i * stride + K]
        y[:, :, i] = np.einsum("bck,ock->bo", seg, w)
    return y + b[None, :, None]


def _bn_np(x, gamma, beta, mean, var, eps=1e-5):
    return (gamma[None, :, None] * (x - mean[None, :, None])
            / np.sqrt(var[None, :, None] + eps) + beta[None, :, None])


def ref_forward(raw, x_ncl):
    p = {k: np.asarray(v, np.float64) for k, v in raw.items()}
    h = np.asarray(x_ncl, np.float64)
    for i in (1, 2, 3, 4):
        h = _conv1d_np(h, p[f"w{i}"], p[f"b{i}"], stride=2, padding=2)
        h = _bn_np(h, p[f"gamma{i}"], p[f"beta{i}"], p[f"mean{i}"], p[f"var{i}"])
        h = np.tanh(h)
    flat = h.reshape(h.shape[0], -1)              # NCL flatten: index = c*16 + l
    return flat @ p["fc_w"].T + p["fc_b"][None, :]


if __name__ == "__main__":
    B, L = 2, 256                 # fc layer fixes L = 256 (flatten to 256*16)
    kx, kp = jax.random.split(jax.random.PRNGKey(0))
    x = jax.random.normal(kx, (B, 2, L), jnp.float32)   # (B, C=2, L) like torch
    raw = init_params(kp)
    packed = prepare_params(raw)   # one-time weight packing, not in hot path

    fwd = jax.jit(discriminator_forward)
    out = jax.block_until_ready(fwd(packed, x))

    assert out.shape == (B, 1), out.shape
    ref = ref_forward(raw, x)
    np.testing.assert_allclose(np.asarray(out), ref, rtol=2e-3, atol=1e-3)
    print("KERNEL_OK")
</pallas_src>

<mosaic_0001>
module attributes {stable_mosaic.version = 11 : i64} {
  func.func @_disc_kernel(%arg0: i32, %arg1: memref<2x130x2xf32, #tpu.memory_space<vmem>>, %arg2: memref<2x130x2xf32, #tpu.memory_space<vmem>>, %arg3: memref<10x32xf32, #tpu.memory_space<vmem>>, %arg4: memref<1x32xf32, #tpu.memory_space<vmem>>, %arg5: memref<160x64xf32, #tpu.memory_space<vmem>>, %arg6: memref<1x64xf32, #tpu.memory_space<vmem>>, %arg7: memref<320x128xf32, #tpu.memory_space<vmem>>, %arg8: memref<1x128xf32, #tpu.memory_space<vmem>>, %arg9: memref<640x256xf32, #tpu.memory_space<vmem>>, %arg10: memref<1x256xf32, #tpu.memory_space<vmem>>, %arg11: memref<16x256xf32, #tpu.memory_space<vmem>>, %arg12: memref<1x1xf32, #tpu.memory_space<vmem>>, %arg13: memref<2x1xf32, #tpu.memory_space<vmem>>, %arg14: memref<2x66x32xf32, #tpu.memory_space<vmem>>, %arg15: memref<2x66x32xf32, #tpu.memory_space<vmem>>, %arg16: memref<2x34x64xf32, #tpu.memory_space<vmem>>, %arg17: memref<2x34x64xf32, #tpu.memory_space<vmem>>, %arg18: memref<2x18x128xf32, #tpu.memory_space<vmem>>, %arg19: memref<2x18x128xf32, #tpu.memory_space<vmem>>) attributes {dimension_semantics = [#tpu.dimension_semantics<parallel>], iteration_bounds = array<i64: 1>, scalar_prefetch = 0 : i64, scratch_operands = 6 : i64, tpu.core_type = #tpu.core_type<tc>, window_params = [{transform_indices = @transform_0, window_bounds = array<i64: 2, 130, 2>}, {transform_indices = @transform_1, window_bounds = array<i64: 2, 130, 2>}, {pipeline_mode = #tpu.pipeline_mode<synchronous>, transform_indices = @transform_2, window_bounds = array<i64: 10, 32>}, {pipeline_mode = #tpu.pipeline_mode<synchronous>, transform_indices = @transform_3, window_bounds = array<i64: 1, 32>}, {pipeline_mode = #tpu.pipeline_mode<synchronous>, transform_indices = @transform_4, window_bounds = array<i64: 160, 64>}, {pipeline_mode = #tpu.pipeline_mode<synchronous>, transform_indices = @transform_5, window_bounds = array<i64: 1, 64>}, {pipeline_mode = #tpu.pipeline_mode<synchronous>, transform_indices = @transform_6, window_bounds = array<i64: 320, 128>}, {pipeline_mode = #tpu.pipeline_mode<synchronous>, transform_indices = @transform_7, window_bounds = array<i64: 1, 128>}, {pipeline_mode = #tpu.pipeline_mode<synchronous>, transform_indices = @transform_8, window_bounds = array<i64: 640, 256>}, {pipeline_mode = #tpu.pipeline_mode<synchronous>, transform_indices = @transform_9, window_bounds = array<i64: 1, 256>}, {pipeline_mode = #tpu.pipeline_mode<synchronous>, transform_indices = @transform_10, window_bounds = array<i64: 16, 256>}, {pipeline_mode = #tpu.pipeline_mode<synchronous>, transform_indices = @transform_11, window_bounds = array<i64: 1, 1>}, {transform_indices = @transform_12, window_bounds = array<i64: 2, 1>}]} {
    %c0 = arith.constant 0 : index
    %c0_0 = arith.constant 0 : index
    %c0_1 = arith.constant 0 : index
    %0 = vector.load %arg1[%c0, %c0_0, %c0_1] : memref<2x130x2xf32, #tpu.memory_space<vmem>>, vector<2x128x2xf32>
    %1 = vector.shape_cast %0 : vector<2x128x2xf32> to vector<256x2xf32>
    %c0_2 = arith.constant 0 : index
    %c0_3 = arith.constant 0 : index
    %2 = vector.load %arg3[%c0_2, %c0_3] : memref<10x32xf32, #tpu.memory_space<vmem>>, vector<2x32xf32>
    %cst = arith.constant dense<0.000000e+00> : vector<256x32xf32>
    %3 = tpu.matmul %1, %2, %cst {dimension_numbers = #tpu.dot_dimension_numbers<[1], [0], [0], [1], [0, 0, 1, 1], [], []>} : vector<256x2xf32>, vector<2x32xf32>, vector<256x32xf32> -> vector<256x32xf32>
    %c0_4 = arith.constant 0 : index
    %c0_5 = arith.constant 0 : index
    %c0_6 = arith.constant 0 : index
    %4 = vector.load %arg2[%c0_4, %c0_5, %c0_6] : memref<2x130x2xf32, #tpu.memory_space<vmem>>, vector<2x128x2xf32>
    %5 = vector.shape_cast %4 : vector<2x128x2xf32> to vector<256x2xf32>
    %c2 = arith.constant 2 : index
    %c0_7 = arith.constant 0 : index
    %6 = vector.load %arg3[%c2, %c0_7] : memref<10x32xf32, #tpu.memory_space<vmem>>, vector<2x32xf32>
    %cst_8 = arith.constant dense<0.000000e+00> : vector<256x32xf32>
    %7 = tpu.matmul %5, %6, %cst_8 {dimension_numbers = #tpu.dot_dimension_numbers<[1], [0], [0], [1], [0, 0, 1, 1], [], []>} : vector<256x2xf32>, vector<2x32xf32>, vector<256x32xf32> -> vector<256x32xf32>
    %8 = arith.addf %3, %7 : vector<256x32xf32>
    %c0_9 = arith.constant 0 : index
    %c1 = arith.constant 1 : index
    %c0_10 = arith.constant 0 : index
    %9 = vector.load %arg1[%c0_9, %c1, %c0_10] : memref<2x130x2xf32, #tpu.memory_space<vmem>>, vector<2x128x2xf32>
    %10 = vector.shape_cast %9 : vector<2x128x2xf32> to vector<256x2xf32>
    %c4 = arith.constant 4 : index
    %c0_11 = arith.constant 0 : index
    %11 = vector.load %arg3[%c4, %c0_11] : memref<10x32xf32, #tpu.memory_space<vmem>>, vector<2x32xf32>
    %cst_12 = arith.constant dense<0.000000e+00> : vector<256x32xf32>
    %12 = tpu.matmul %10, %11, %cst_12 {dimension_numbers = #tpu.dot_dimension_numbers<[1], [0], [0], [1], [0, 0, 1, 1], [], []>} : vector<256x2xf32>, vector<2x32xf32>, vector<256x32xf32> -> vector<256x32xf32>
    %13 = arith.addf %8, %12 : vector<256x32xf32>
    %c0_13 = arith.constant 0 : index
    %c1_14 = arith.constant 1 : index
    %c0_15 = arith.constant 0 : index
    %14 = vector.load %arg2[%c0_13, %c1_14, %c0_15] : memref<2x130x2xf32, #tpu.memory_space<vmem>>, vector<2x128x2xf32>
    %15 = vector.shape_cast %14 : vector<2x128x2xf32> to vector<256x2xf32>
    %c6 = arith.constant 6 : index
    %c0_16 = arith.constant 0 : index
    %16 = vector.load %arg3[%c6, %c0_16] : memref<10x32xf32, #tpu.memory_space<vmem>>, vector<2x32xf32>
    %cst_17 = arith.constant dense<0.000000e+00> : vector<256x32xf32>
    %17 = tpu.matmul %15, %16, %cst_17 {dimension_numbers = #tpu.dot_dimension_numbers<[1], [0], [0], [1], [0, 0, 1, 1], [], []>} : vector<256x2xf32>, vector<2x32xf32>, vector<256x32xf32> -> vector<256x32xf32>
    %18 = arith.addf %13, %17 : vector<256x32xf32>
    %c0_18 = arith.constant 0 : index
    %c2_19 = arith.constant 2 : index
    %c0_20 = arith.constant 0 : index
    %19 = vector.load %arg1[%c0_18, %c2_19, %c0_20] : memref<2x130x2xf32, #tpu.memory_space<vmem>>, vector<2x128x2xf32>
    %20 = vector.shape_cast %19 : vector<2x128x2xf32> to vector<256x2xf32>
    %c8 = arith.constant 8 : index
    %c0_21 = arith.constant 0 : index
    %21 = vector.load %arg3[%c8, %c0_21] : memref<10x32xf32, #tpu.memory_space<vmem>>, vector<2x32xf32>
    %cst_22 = arith.constant dense<0.000000e+00> : vector<256x32xf32>
    %22 = tpu.matmul %20, %21, %cst_22 {dimension_numbers = #tpu.dot_dimension_numbers<[1], [0], [0], [1], [0, 0, 1, 1], [], []>} : vector<256x2xf32>, vector<2x32xf32>, vector<256x32xf32> -> vector<256x32xf32>
    %23 = arith.addf %18, %22 : vector<256x32xf32>
    %c0_23 = arith.constant 0 : index
    %c0_24 = arith.constant 0 : index
    %24 = vector.load %arg4[%c0_23, %c0_24] : memref<1x32xf32, #tpu.memory_space<vmem>>, vector<1x32xf32>
    %25 = vector.broadcast %24 : vector<1x32xf32> to vector<256x32xf32>
    %26 = arith.addf %23, %25 : vector<256x32xf32>
    %27 = math.tanh %26 : vector<256x32xf32>
    %28 = vector.shape_cast %27 : vector<256x32xf32> to vector<2x128x32xf32>
    %29 = vector.shape_cast %28 : vector<2x128x32xf32> to vector<2x64x2x32xf32>
    %cst_25 = arith.constant 0.000000e+00 : f32
    %30 = vector.broadcast %cst_25 : f32 to vector<2x1x32xf32>
    %c0_26 = arith.constant 0 : index
    %c0_27 = arith.constant 0 : index
    %c0_28 = arith.constant 0 : index
    %31 = vector.load %arg14[%c0_26, %c0_27, %c0_28] : memref<2x66x32xf32, #tpu.memory_space<vmem>>, vector<2x1x32xf32>
    tpu.vector_store %arg14[%c0_26, %c0_27, %c0_28], %30 {strides = array<i32>} : memref<2x66x32xf32, #tpu.memory_space<vmem>>, vector<2x1x32xf32>,
    %32 = vector.extract_strided_slice %29 {offsets = [0, 0, 0, 0], sizes = [2, 64, 1, 32], strides = [1, 1, 1, 1]} : vector<2x64x2x32xf32> to vector<2x64x1x32xf32>
    %33 = vector.shape_cast %32 : vector<2x64x1x32xf32> to vector<2x64x32xf32>
    %c0_29 = arith.constant 0 : index
    %c1_30 = arith.constant 1 : index
    %c0_31 = arith.constant 0 : index
    %34 = vector.load %arg14[%c0_29, %c1_30, %c0_31] : memref<2x66x32xf32, #tpu.memory_space<vmem>>, vector<2x64x32xf32>
    tpu.vector_store %arg14[%c0_29, %c1_30, %c0_31], %33 {strides = array<i32>} : memref<2x66x32xf32, #tpu.memory_space<vmem>>, vector<2x64x32xf32>,
    %c0_32 = arith.constant 0 : index
    %c65 = arith.constant 65 : index
    %c0_33 = arith.constant 0 : index
    %35 = vector.load %arg14[%c0_32, %c65, %c0_33] : memref<2x66x32xf32, #tpu.memory_space<vmem>>, vector<2x1x32xf32>
    tpu.vector_store %arg14[%c0_32, %c65, %c0_33], %30 {strides = array<i32>} : memref<2x66x32xf32, #tpu.memory_space<vmem>>, vector<2x1x32xf32>,
    %c0_34 = arith.constant 0 : index
    %c0_35 = arith.constant 0 : index
    %c0_36 = arith.constant 0 : index
    %36 = vector.load %arg15[%c0_34, %c0_35, %c0_36] : memref<2x66x32xf32, #tpu.memory_space<vmem>>, vector<2x1x32xf32>
    tpu.vector_store %arg15[%c0_34, %c0_35, %c0_36], %30 {strides = array<i32>} : memref<2x66x32xf32, #tpu.memory_space<vmem>>, vector<2x1x32xf32>,
    %37 = vector.extract_strided_slice %29 {offsets = [0, 0, 1, 0], sizes = [2, 64, 1, 32], strides = [1, 1, 1, 1]} : vector<2x64x2x32xf32> to vector<2x64x1x32xf32>
    %38 = vector.shape_cast %37 : vector<2x64x1x32xf32> to vector<2x64x32xf32>
    %c0_37 = arith.constant 0 : index
    %c1_38 = arith.constant 1 : index
    %c0_39 = arith.constant 0 : index
    %39 = vector.load %arg15[%c0_37, %c1_38, %c0_39] : memref<2x66x32xf32, #tpu.memory_space<vmem>>, vector<2x64x32xf32>
    tpu.vector_store %arg15[%c0_37, %c1_38, %c0_39], %38 {strides = array<i32>} : memref<2x66x32xf32, #tpu.memory_space<vmem>>, vector<2x64x32xf32>,
    %c0_40 = arith.constant 0 : index
    %c65_41 = arith.constant 65 : index
    %c0_42 = arith.constant 0 : index
    %40 = vector.load %arg15[%c0_40, %c65_41, %c0_42] : memref<2x66x32xf32, #tpu.memory_space<vmem>>, vector<2x1x32xf32>
    tpu.vector_store %arg15[%c0_40, %c65_41, %c0_42], %30 {strides = array<i32>} : memref<2x66x32xf32, #tpu.memory_space<vmem>>, vector<2x1x32xf32>,
    %c0_43 = arith.constant 0 : index
    %c0_44 = arith.constant 0 : index
    %c0_45 = arith.constant 0 : index
    %41 = vector.load %arg14[%c0_43, %c0_44, %c0_45] : memref<2x66x32xf32, #tpu.memory_space<vmem>>, vector<2x64x32xf32>
    %42 = vector.shape_cast %41 : vector<2x64x32xf32> to vector<128x32xf32>
    %c0_46 = arith.constant 0 : index
    %c0_47 = arith.constant 0 : index
    %43 = vector.load %arg5[%c0_46, %c0_47] : memref<160x64xf32, #tpu.memory_space<vmem>>, vector<32x64xf32>
    %cst_48 = arith.constant dense<0.000000e+00> : vector<128x64xf32>
    %44 = tpu.matmul %42, %43, %cst_48 {dimension_numbers = #tpu.dot_dimension_numbers<[1], [0], [0], [1], [0, 0, 1, 1], [], []>} : vector<128x32xf32>, vector<32x64xf32>, vector<128x64xf32> -> vector<128x64xf32>
    %c0_49 = arith.constant 0 : index
    %c0_50 = arith.constant 0 : index
    %c0_51 = arith.constant 0 : index
    %45 = vector.load %arg15[%c0_49, %c0_50, %c0_51] : memref<2x66x32xf32, #tpu.memory_space<vmem>>, vector<2x64x32xf32>
    %46 = vector.shape_cast %45 : vector<2x64x32xf32> to vector<128x32xf32>
    %c32 = arith.constant 32 : index
    %c0_52 = arith.constant 0 : index
    %47 = vector.load %arg5[%c32, %c0_52] : memref<160x64xf32, #tpu.memory_space<vmem>>, vector<32x64xf32>
    %cst_53 = arith.constant dense<0.000000e+00> : vector<128x64xf32>
    %48 = tpu.matmul %46, %47, %cst_53 {dimension_numbers = #tpu.dot_dimension_numbers<[1], [0], [0], [1], [0, 0, 1, 1], [], []>} : vector<128x32xf32>, vector<32x64xf32>, vector<128x64xf32> -> vector<128x64xf32>
    %49 = arith.addf %44, %48 : vector<128x64xf32>
    %c0_54 = arith.constant 0 : index
    %c1_55 = arith.constant 1 : index
    %c0_56 = arith.constant 0 : index
    %50 = vector.load %arg14[%c0_54, %c1_55, %c0_56] : memref<2x66x32xf32, #tpu.memory_space<vmem>>, vector<2x64x32xf32>
    %51 = vector.shape_cast %50 : vector<2x64x32xf32> to vector<128x32xf32>
    %c64 = arith.constant 64 : index
    %c0_57 = arith.constant 0 : index
    %52 = vector.load %arg5[%c64, %c0_57] : memref<160x64xf32, #tpu.memory_space<vmem>>, vector<32x64xf32>
    %cst_58 = arith.constant dense<0.000000e+00> : vector<128x64xf32>
    %53 = tpu.matmul %51, %52, %cst_58 {dimension_numbers = #tpu.dot_dimension_numbers<[1], [0], [0], [1], [0, 0, 1, 1], [], []>} : vector<128x32xf32>, vector<32x64xf32>, vector<128x64xf32> -> vector<128x64xf32>
    %54 = arith.addf %49, %53 : vector<128x64xf32>
    %c0_59 = arith.constant 0 : index
    %c1_60 = arith.constant 1 : index
    %c0_61 = arith.constant 0 : index
    %55 = vector.load %arg15[%c0_59, %c1_60, %c0_61] : memref<2x66x32xf32, #tpu.memory_space<vmem>>, vector<2x64x32xf32>
    %56 = vector.shape_cast %55 : vector<2x64x32xf32> to vector<128x32xf32>
    %c96 = arith.constant 96 : index
    %c0_62 = arith.constant 0 : index
    %57 = vector.load %arg5[%c96, %c0_62] : memref<160x64xf32, #tpu.memory_space<vmem>>, vector<32x64xf32>
    %cst_63 = arith.constant dense<0.000000e+00> : vector<128x64xf32>
    %58 = tpu.matmul %56, %57, %cst_63 {dimension_numbers = #tpu.dot_dimension_numbers<[1], [0], [0], [1], [0, 0, 1, 1], [], []>} : vector<128x32xf32>, vector<32x64xf32>, vector<128x64xf32> -> vector<128x64xf32>
    %59 = arith.addf %54, %58 : vector<128x64xf32>
    %c0_64 = arith.constant 0 : index
    %c2_65 = arith.constant 2 : index
    %c0_66 = arith.constant 0 : index
    %60 = vector.load %arg14[%c0_64, %c2_65, %c0_66] : memref<2x66x32xf32, #tpu.memory_space<vmem>>, vector<2x64x32xf32>
    %61 = vector.shape_cast %60 : vector<2x64x32xf32> to vector<128x32xf32>
    %c128 = arith.constant 128 : index
    %c0_67 = arith.constant 0 : index
    %62 = vector.load %arg5[%c128, %c0_67] : memref<160x64xf32, #tpu.memory_space<vmem>>, vector<32x64xf32>
    %cst_68 = arith.constant dense<0.000000e+00> : vector<128x64xf32>
    %63 = tpu.matmul %61, %62, %cst_68 {dimension_numbers = #tpu.dot_dimension_numbers<[1], [0], [0], [1], [0, 0, 1, 1], [], []>} : vector<128x32xf32>, vector<32x64xf32>, vector<128x64xf32> -> vector<128x64xf32>
    %64 = arith.addf %59, %63 : vector<128x64xf32>
    %c0_69 = arith.constant 0 : index
    %c0_70 = arith.constant 0 : index
    %65 = vector.load %arg6[%c0_69, %c0_70] : memref<1x64xf32, #tpu.memory_space<vmem>>, vector<1x64xf32>
    %66 = vector.broadcast %65 : vector<1x64xf32> to vector<128x64xf32>
    %67 = arith.addf %64, %66 : vector<128x64xf32>
    %68 = math.tanh %67 : vector<128x64xf32>
    %69 = vector.shape_cast %68 : vector<128x64xf32> to vector<2x64x64xf32>
    %70 = vector.shape_cast %69 : vector<2x64x64xf32> to vector<2x32x2x64xf32>
    %cst_71 = arith.constant 0.000000e+00 : f32
    %71 = vector.broadcast %cst_71 : f32 to vector<2x1x64xf32>
    %c0_72 = arith.constant 0 : index
    %c0_73 = arith.constant 0 : index
    %c0_74 = arith.constant 0 : index
    %72 = vector.load %arg16[%c0_72, %c0_73, %c0_74] : memref<2x34x64xf32, #tpu.memory_space<vmem>>, vector<2x1x64xf32>
    tpu.vector_store %arg16[%c0_72, %c0_73, %c0_74], %71 {strides = array<i32>} : memref<2x34x64xf32, #tpu.memory_space<vmem>>, vector<2x1x64xf32>,
    %73 = vector.extract_strided_slice %70 {offsets = [0, 0, 0, 0], sizes = [2, 32, 1, 64], strides = [1, 1, 1, 1]} : vector<2x32x2x64xf32> to vector<2x32x1x64xf32>
    %74 = vector.shape_cast %73 : vector<2x32x1x64xf32> to vector<2x32x64xf32>
    %c0_75 = arith.constant 0 : index
    %c1_76 = arith.constant 1 : index
    %c0_77 = arith.constant 0 : index
    %75 = vector.load %arg16[%c0_75, %c1_76, %c0_77] : memref<2x34x64xf32, #tpu.memory_space<vmem>>, vector<2x32x64xf32>
    tpu.vector_store %arg16[%c0_75, %c1_76, %c0_77], %74 {strides = array<i32>} : memref<2x34x64xf32, #tpu.memory_space<vmem>>, vector<2x32x64xf32>,
    %c0_78 = arith.constant 0 : index
    %c33 = arith.constant 33 : index
    %c0_79 = arith.constant 0 : index
    %76 = vector.load %arg16[%c0_78, %c33, %c0_79] : memref<2x34x64xf32, #tpu.memory_space<vmem>>, vector<2x1x64xf32>
    tpu.vector_store %arg16[%c0_78, %c33, %c0_79], %71 {strides = array<i32>} : memref<2x34x64xf32, #tpu.memory_space<vmem>>, vector<2x1x64xf32>,
    %c0_80 = arith.constant 0 : index
    %c0_81 = arith.constant 0 : index
    %c0_82 = arith.constant 0 : index
    %77 = vector.load %arg17[%c0_80, %c0_81, %c0_82] : memref<2x34x64xf32, #tpu.memory_space<vmem>>, vector<2x1x64xf32>
    tpu.vector_store %arg17[%c0_80, %c0_81, %c0_82], %71 {strides = array<i32>} : memref<2x34x64xf32, #tpu.memory_space<vmem>>, vector<2x1x64xf32>,
    %78 = vector.extract_strided_slice %70 {offsets = [0, 0, 1, 0], sizes = [2, 32, 1, 64], strides = [1, 1, 1, 1]} : vector<2x32x2x64xf32> to vector<2x32x1x64xf32>
    %79 = vector.shape_cast %78 : vector<2x32x1x64xf32> to vector<2x32x64xf32>
    %c0_83 = arith.constant 0 : index
    %c1_84 = arith.constant 1 : index
    %c0_85 = arith.constant 0 : index
    %80 = vector.load %arg17[%c0_83, %c1_84, %c0_85] : memref<2x34x64xf32, #tpu.memory_space<vmem>>, vector<2x32x64xf32>
    tpu.vector_store %arg17[%c0_83, %c1_84, %c0_85], %79 {strides = array<i32>} : memref<2x34x64xf32, #tpu.memory_space<vmem>>, vector<2x32x64xf32>,
    %c0_86 = arith.constant 0 : index
    %c33_87 = arith.constant 33 : index
    %c0_88 = arith.constant 0 : index
    %81 = vector.load %arg17[%c0_86, %c33_87, %c0_88] : memref<2x34x64xf32, #tpu.memory_space<vmem>>, vector<2x1x64xf32>
    tpu.vector_store %arg17[%c0_86, %c33_87, %c0_88], %71 {strides = array<i32>} : memref<2x34x64xf32, #tpu.memory_space<vmem>>, vector<2x1x64xf32>,
    %c0_89 = arith.constant 0 : index
    %c0_90 = arith.constant 0 : index
    %c0_91 = arith.constant 0 : index
    %82 = vector.load %arg16[%c0_89, %c0_90, %c0_91] : memref<2x34x64xf32, #tpu.memory_space<vmem>>, vector<2x32x64xf32>
    %83 = vector.shape_cast %82 : vector<2x32x64xf32> to vector<64x64xf32>
    %c0_92 = arith.constant 0 : index
    %c0_93 = arith.constant 0 : index
    %84 = vector.load %arg7[%c0_92, %c0_93] : memref<320x128xf32, #tpu.memory_space<vmem>>, vector<64x128xf32>
    %cst_94 = arith.constant dense<0.000000e+00> : vector<64x128xf32>
    %85 = tpu.matmul %83, %84, %cst_94 {dimension_numbers = #tpu.dot_dimension_numbers<[1], [0], [0], [1], [0, 0, 1, 1], [], []>} : vector<64x64xf32>, vector<64x128xf32>, vector<64x128xf32> -> vector<64x128xf32>
    %c0_95 = arith.constant 0 : index
    %c0_96 = arith.constant 0 : index
    %c0_97 = arith.constant 0 : index
    %86 = vector.load %arg17[%c0_95, %c0_96, %c0_97] : memref<2x34x64xf32, #tpu.memory_space<vmem>>, vector<2x32x64xf32>
    %87 = vector.shape_cast %86 : vector<2x32x64xf32> to vector<64x64xf32>
    %c64_98 = arith.constant 64 : index
    %c0_99 = arith.constant 0 : index
    %88 = vector.load %arg7[%c64_98, %c0_99] : memref<320x128xf32, #tpu.memory_space<vmem>>, vector<64x128xf32>
    %cst_100 = arith.constant dense<0.000000e+00> : vector<64x128xf32>
    %89 = tpu.matmul %87, %88, %cst_100 {dimension_numbers = #tpu.dot_dimension_numbers<[1], [0], [0], [1], [0, 0, 1, 1], [], []>} : vector<64x64xf32>, vector<64x128xf32>, vector<64x128xf32> -> vector<64x128xf32>
    %90 = arith.addf %85, %89 : vector<64x128xf32>
    %c0_101 = arith.constant 0 : index
    %c1_102 = arith.constant 1 : index
    %c0_103 = arith.constant 0 : index
    %91 = vector.load %arg16[%c0_101, %c1_102, %c0_103] : memref<2x34x64xf32, #tpu.memory_space<vmem>>, vector<2x32x64xf32>
    %92 = vector.shape_cast %91 : vector<2x32x64xf32> to vector<64x64xf32>
    %c128_104 = arith.constant 128 : index
    %c0_105 = arith.constant 0 : index
    %93 = vector.load %arg7[%c128_104, %c0_105] : memref<320x128xf32, #tpu.memory_space<vmem>>, vector<64x128xf32>
    %cst_106 = arith.constant dense<0.000000e+00> : vector<64x128xf32>
    %94 = tpu.matmul %92, %93, %cst_106 {dimension_numbers = #tpu.dot_dimension_numbers<[1], [0], [0], [1], [0, 0, 1, 1], [], []>} : vector<64x64xf32>, vector<64x128xf32>, vector<64x128xf32> -> vector<64x128xf32>
    %95 = arith.addf %90, %94 : vector<64x128xf32>
    %c0_107 = arith.constant 0 : index
    %c1_108 = arith.constant 1 : index
    %c0_109 = arith.constant 0 : index
    %96 = vector.load %arg17[%c0_107, %c1_108, %c0_109] : memref<2x34x64xf32, #tpu.memory_space<vmem>>, vector<2x32x64xf32>
    %97 = vector.shape_cast %96 : vector<2x32x64xf32> to vector<64x64xf32>
    %c192 = arith.constant 192 : index
    %c0_110 = arith.constant 0 : index
    %98 = vector.load %arg7[%c192, %c0_110] : memref<320x128xf32, #tpu.memory_space<vmem>>, vector<64x128xf32>
    %cst_111 = arith.constant dense<0.000000e+00> : vector<64x128xf32>
    %99 = tpu.matmul %97, %98, %cst_111 {dimension_numbers = #tpu.dot_dimension_numbers<[1], [0], [0], [1], [0, 0, 1, 1], [], []>} : vector<64x64xf32>, vector<64x128xf32>, vector<64x128xf32> -> vector<64x128xf32>
    %100 = arith.addf %95, %99 : vector<64x128xf32>
    %c0_112 = arith.constant 0 : index
    %c2_113 = arith.constant 2 : index
    %c0_114 = arith.constant 0 : index
    %101 = vector.load %arg16[%c0_112, %c2_113, %c0_114] : memref<2x34x64xf32, #tpu.memory_space<vmem>>, vector<2x32x64xf32>
    %102 = vector.shape_cast %101 : vector<2x32x64xf32> to vector<64x64xf32>
    %c256 = arith.constant 256 : index
    %c0_115 = arith.constant 0 : index
    %103 = vector.load %arg7[%c256, %c0_115] : memref<320x128xf32, #tpu.memory_space<vmem>>, vector<64x128xf32>
    %cst_116 = arith.constant dense<0.000000e+00> : vector<64x128xf32>
    %104 = tpu.matmul %102, %103, %cst_116 {dimension_numbers = #tpu.dot_dimension_numbers<[1], [0], [0], [1], [0, 0, 1, 1], [], []>} : vector<64x64xf32>, vector<64x128xf32>, vector<64x128xf32> -> vector<64x128xf32>
    %105 = arith.addf %100, %104 : vector<64x128xf32>
    %c0_117 = arith.constant 0 : index
    %c0_118 = arith.constant 0 : index
    %106 = vector.load %arg8[%c0_117, %c0_118] : memref<1x128xf32, #tpu.memory_space<vmem>>, vector<1x128xf32>
    %107 = vector.broadcast %106 : vector<1x128xf32> to vector<64x128xf32>
    %108 = arith.addf %105, %107 : vector<64x128xf32>
    %109 = math.tanh %108 : vector<64x128xf32>
    %110 = vector.shape_cast %109 : vector<64x128xf32> to vector<2x32x128xf32>
    %111 = vector.shape_cast %110 : vector<2x32x128xf32> to vector<2x16x2x128xf32>
    %cst_119 = arith.constant 0.000000e+00 : f32
    %112 = vector.broadcast %cst_119 : f32 to vector<2x1x128xf32>
    %c0_120 = arith.constant 0 : index
    %c0_121 = arith.constant 0 : index
    %c0_122 = arith.constant 0 : index
    %113 = vector.load %arg18[%c0_120, %c0_121, %c0_122] : memref<2x18x128xf32, #tpu.memory_space<vmem>>, vector<2x1x128xf32>
    tpu.vector_store %arg18[%c0_120, %c0_121, %c0_122], %112 {strides = array<i32>} : memref<2x18x128xf32, #tpu.memory_space<vmem>>, vector<2x1x128xf32>,
    %114 = vector.extract_strided_slice %111 {offsets = [0, 0, 0, 0], sizes = [2, 16, 1, 128], strides = [1, 1, 1, 1]} : vector<2x16x2x128xf32> to vector<2x16x1x128xf32>
    %115 = vector.shape_cast %114 : vector<2x16x1x128xf32> to vector<2x16x128xf32>
    %c0_123 = arith.constant 0 : index
    %c1_124 = arith.constant 1 : index
    %c0_125 = arith.constant 0 : index
    %116 = vector.load %arg18[%c0_123, %c1_124, %c0_125] : memref<2x18x128xf32, #tpu.memory_space<vmem>>, vector<2x16x128xf32>
    tpu.vector_store %arg18[%c0_123, %c1_124, %c0_125], %115 {strides = array<i32>} : memref<2x18x128xf32, #tpu.memory_space<vmem>>, vector<2x16x128xf32>,
    %c0_126 = arith.constant 0 : index
    %c17 = arith.constant 17 : index
    %c0_127 = arith.constant 0 : index
    %117 = vector.load %arg18[%c0_126, %c17, %c0_127] : memref<2x18x128xf32, #tpu.memory_space<vmem>>, vector<2x1x128xf32>
    tpu.vector_store %arg18[%c0_126, %c17, %c0_127], %112 {strides = array<i32>} : memref<2x18x128xf32, #tpu.memory_space<vmem>>, vector<2x1x128xf32>,
    %c0_128 = arith.constant 0 : index
    %c0_129 = arith.constant 0 : index
    %c0_130 = arith.constant 0 : index
    %118 = vector.load %arg19[%c0_128, %c0_129, %c0_130] : memref<2x18x128xf32, #tpu.memory_space<vmem>>, vector<2x1x128xf32>
    tpu.vector_store %arg19[%c0_128, %c0_129, %c0_130], %112 {strides = array<i32>} : memref<2x18x128xf32, #tpu.memory_space<vmem>>, vector<2x1x128xf32>,
    %119 = vector.extract_strided_slice %111 {offsets = [0, 0, 1, 0], sizes = [2, 16, 1, 128], strides = [1, 1, 1, 1]} : vector<2x16x2x128xf32> to vector<2x16x1x128xf32>
    %120 = vector.shape_cast %119 : vector<2x16x1x128xf32> to vector<2x16x128xf32>
    %c0_131 = arith.constant 0 : index
    %c1_132 = arith.constant 1 : index
    %c0_133 = arith.constant 0 : index
    %121 = vector.load %arg19[%c0_131, %c1_132, %c0_133] : memref<2x18x128xf32, #tpu.memory_space<vmem>>, vector<2x16x128xf32>
    tpu.vector_store %arg19[%c0_131, %c1_132, %c0_133], %120 {strides = array<i32>} : memref<2x18x128xf32, #tpu.memory_space<vmem>>, vector<2x16x128xf32>,
    %c0_134 = arith.constant 0 : index
    %c17_135 = arith.constant 17 : index
    %c0_136 = arith.constant 0 : index
    %122 = vector.load %arg19[%c0_134, %c17_135, %c0_136] : memref<2x18x128xf32, #tpu.memory_space<vmem>>, vector<2x1x128xf32>
    tpu.vector_store %arg19[%c0_134, %c17_135, %c0_136], %112 {strides = array<i32>} : memref<2x18x128xf32, #tpu.memory_space<vmem>>, vector<2x1x128xf32>,
    %c0_137 = arith.constant 0 : index
    %c0_138 = arith.constant 0 : index
    %c0_139 = arith.constant 0 : index
    %123 = vector.load %arg18[%c0_137, %c0_138, %c0_139] : memref<2x18x128xf32, #tpu.memory_space<vmem>>, vector<2x16x128xf32>
    %124 = vector.shape_cast %123 : vector<2x16x128xf32> to vector<32x128xf32>
    %c0_140 = arith.constant 0 : index
    %c0_141 = arith.constant 0 : index
    %125 = vector.load %arg9[%c0_140, %c0_141] : memref<640x256xf32, #tpu.memory_space<vmem>>, vector<128x256xf32>
    %cst_142 = arith.constant dense<0.000000e+00> : vector<32x256xf32>
    %126 = tpu.matmul %124, %125, %cst_142 {dimension_numbers = #tpu.dot_dimension_numbers<[1], [0], [0], [1], [0, 0, 1, 1], [], []>} : vector<32x128xf32>, vector<128x256xf32>, vector<32x256xf32> -> vector<32x256xf32>
    %c0_143 = arith.constant 0 : index
    %c0_144 = arith.constant 0 : index
    %c0_145 = arith.constant 0 : index
    %127 = vector.load %arg19[%c0_143, %c0_144, %c0_145] : memref<2x18x128xf32, #tpu.memory_space<vmem>>, vector<2x16x128xf32>
    %128 = vector.shape_cast %127 : vector<2x16x128xf32> to vector<32x128xf32>
    %c128_146 = arith.constant 128 : index
    %c0_147 = arith.constant 0 : index
    %129 = vector.load %arg9[%c128_146, %c0_147] : memref<640x256xf32, #tpu.memory_space<vmem>>, vector<128x256xf32>
    %cst_148 = arith.constant dense<0.000000e+00> : vector<32x256xf32>
    %130 = tpu.matmul %128, %129, %cst_148 {dimension_numbers = #tpu.dot_dimension_numbers<[1], [0], [0], [1], [0, 0, 1, 1], [], []>} : vector<32x128xf32>, vector<128x256xf32>, vector<32x256xf32> -> vector<32x256xf32>
    %131 = arith.addf %126, %130 : vector<32x256xf32>
    %c0_149 = arith.constant 0 : index
    %c1_150 = arith.constant 1 : index
    %c0_151 = arith.constant 0 : index
    %132 = vector.load %arg18[%c0_149, %c1_150, %c0_151] : memref<2x18x128xf32, #tpu.memory_space<vmem>>, vector<2x16x128xf32>
    %133 = vector.shape_cast %132 : vector<2x16x128xf32> to vector<32x128xf32>
    %c256_152 = arith.constant 256 : index
    %c0_153 = arith.constant 0 : index
    %134 = vector.load %arg9[%c256_152, %c0_153] : memref<640x256xf32, #tpu.memory_space<vmem>>, vector<128x256xf32>
    %cst_154 = arith.constant dense<0.000000e+00> : vector<32x256xf32>
    %135 = tpu.matmul %133, %134, %cst_154 {dimension_numbers = #tpu.dot_dimension_numbers<[1], [0], [0], [1], [0, 0, 1, 1], [], []>} : vector<32x128xf32>, vector<128x256xf32>, vector<32x256xf32> -> vector<32x256xf32>
    %136 = arith.addf %131, %135 : vector<32x256xf32>
    %c0_155 = arith.constant 0 : index
    %c1_156 = arith.constant 1 : index
    %c0_157 = arith.constant 0 : index
    %137 = vector.load %arg19[%c0_155, %c1_156, %c0_157] : memref<2x18x128xf32, #tpu.memory_space<vmem>>, vector<2x16x128xf32>
    %138 = vector.shape_cast %137 : vector<2x16x128xf32> to vector<32x128xf32>
    %c384 = arith.constant 384 : index
    %c0_158 = arith.constant 0 : index
    %139 = vector.load %arg9[%c384, %c0_158] : memref<640x256xf32, #tpu.memory_space<vmem>>, vector<128x256xf32>
    %cst_159 = arith.constant dense<0.000000e+00> : vector<32x256xf32>
    %140 = tpu.matmul %138, %139, %cst_159 {dimension_numbers = #tpu.dot_dimension_numbers<[1], [0], [0], [1], [0, 0, 1, 1], [], []>} : vector<32x128xf32>, vector<128x256xf32>, vector<32x256xf32> -> vector<32x256xf32>
    %141 = arith.addf %136, %140 : vector<32x256xf32>
    %c0_160 = arith.constant 0 : index
    %c2_161 = arith.constant 2 : index
    %c0_162 = arith.constant 0 : index
    %142 = vector.load %arg18[%c0_160, %c2_161, %c0_162] : memref<2x18x128xf32, #tpu.memory_space<vmem>>, vector<2x16x128xf32>
    %143 = vector.shape_cast %142 : vector<2x16x128xf32> to vector<32x128xf32>
    %c512 = arith.constant 512 : index
    %c0_163 = arith.constant 0 : index
    %144 = vector.load %arg9[%c512, %c0_163] : memref<640x256xf32, #tpu.memory_space<vmem>>, vector<128x256xf32>
    %cst_164 = arith.constant dense<0.000000e+00> : vector<32x256xf32>
    %145 = tpu.matmul %143, %144, %cst_164 {dimension_numbers = #tpu.dot_dimension_numbers<[1], [0], [0], [1], [0, 0, 1, 1], [], []>} : vector<32x128xf32>, vector<128x256xf32>, vector<32x256xf32> -> vector<32x256xf32>
    %146 = arith.addf %141, %145 : vector<32x256xf32>
    %c0_165 = arith.constant 0 : index
    %c0_166 = arith.constant 0 : index
    %147 = vector.load %arg10[%c0_165, %c0_166] : memref<1x256xf32, #tpu.memory_space<vmem>>, vector<1x256xf32>
    %148 = vector.broadcast %147 : vector<1x256xf32> to vector<32x256xf32>
    %149 = arith.addf %146, %148 : vector<32x256xf32>
    %150 = math.tanh %149 : vector<32x256xf32>
    %151 = vector.shape_cast %150 : vector<32x256xf32> to vector<2x16x256xf32>
    %c0_167 = arith.constant 0 : index
    %c0_168 = arith.constant 0 : index
    %152 = vector.load %arg11[%c0_167, %c0_168] : memref<16x256xf32, #tpu.memory_space<vmem>>, vector<16x256xf32>
    %153 = vector.shape_cast %152 : vector<16x256xf32> to vector<1x16x256xf32>
    %154 = vector.broadcast %153 : vector<1x16x256xf32> to vector<2x16x256xf32>
    %155 = arith.mulf %151, %154 : vector<2x16x256xf32>
    %cst_169 = arith.constant dense<0.000000e+00> : vector<2x16xf32>
    %156 = vector.multi_reduction <add>, %155, %cst_169 [2] : vector<2x16x256xf32> to vector<2x16xf32>
    %cst_170 = arith.constant dense<0.000000e+00> : vector<2xf32>
    %157 = vector.multi_reduction <add>, %156, %cst_170 [1] : vector<2x16xf32> to vector<2xf32>
    %158 = vector.shape_cast %157 : vector<2xf32> to vector<2x1xf32>
    %c0_171 = arith.constant 0 : index
    %c0_172 = arith.constant 0 : index
    %159 = vector.load %arg12[%c0_171, %c0_172] : memref<1x1xf32, #tpu.memory_space<vmem>>, vector<1x1xf32>
    %160 = vector.broadcast %159 : vector<1x1xf32> to vector<2x1xf32>
    %161 = arith.addf %158, %160 : vector<2x1xf32>
    %c0_173 = arith.constant 0 : index
    %c0_174 = arith.constant 0 : index
    %162 = vector.load %arg13[%c0_173, %c0_174] : memref<2x1xf32, #tpu.memory_space<vmem>>, vector<2x1xf32>
    tpu.vector_store %arg13[%c0_173, %c0_174], %161 {strides = array<i32>} : memref<2x1xf32, #tpu.memory_space<vmem>>, vector<2x1xf32>,
    return
  }
  func.func @transform_0(%arg0: i32) -> (i32, i32, i32) {
    %c0_i32 = arith.constant 0 : i32
    %c0_i32_0 = arith.constant 0 : i32
    %c0_i32_1 = arith.constant 0 : i32
    return %arg0, %c0_i32, %c0_i32_0 : i32, i32, i32
  }
  func.func @transform_1(%arg0: i32) -> (i32, i32, i32) {
    %c0_i32 = arith.constant 0 : i32
    %c0_i32_0 = arith.constant 0 : i32
    %c0_i32_1 = arith.constant 0 : i32
    return %arg0, %c0_i32, %c0_i32_0 : i32, i32, i32
  }
  func.func @transform_2(%arg0: i32) -> (i32, i32) {
    %c0_i32 = arith.constant 0 : i32
    %c0_i32_0 = arith.constant 0 : i32
    %c0_i32_1 = arith.constant 0 : i32
    return %c0_i32, %c0_i32_0 : i32, i32
  }
  func.func @transform_3(%arg0: i32) -> (i32, i32) {
    %c0_i32 = arith.constant 0 : i32
    %c0_i32_0 = arith.constant 0 : i32
    %c0_i32_1 = arith.constant 0 : i32
    return %c0_i32, %c0_i32_0 : i32, i32
  }
  func.func @transform_4(%arg0: i32) -> (i32, i32) {
    %c0_i32 = arith.constant 0 : i32
    %c0_i32_0 = arith.constant 0 : i32
    %c0_i32_1 = arith.constant 0 : i32
    return %c0_i32, %c0_i32_0 : i32, i32
  }
  func.func @transform_5(%arg0: i32) -> (i32, i32) {
    %c0_i32 = arith.constant 0 : i32
    %c0_i32_0 = arith.constant 0 : i32
    %c0_i32_1 = arith.constant 0 : i32
    return %c0_i32, %c0_i32_0 : i32, i32
  }
  func.func @transform_6(%arg0: i32) -> (i32, i32) {
    %c0_i32 = arith.constant 0 : i32
    %c0_i32_0 = arith.constant 0 : i32
    %c0_i32_1 = arith.constant 0 : i32
    return %c0_i32, %c0_i32_0 : i32, i32
  }
  func.func @transform_7(%arg0: i32) -> (i32, i32) {
    %c0_i32 = arith.constant 0 : i32
    %c0_i32_0 = arith.constant 0 : i32
    %c0_i32_1 = arith.constant 0 : i32
    return %c0_i32, %c0_i32_0 : i32, i32
  }
  func.func @transform_8(%arg0: i32) -> (i32, i32) {
    %c0_i32 = arith.constant 0 : i32
    %c0_i32_0 = arith.constant 0 : i32
    %c0_i32_1 = arith.constant 0 : i32
    return %c0_i32, %c0_i32_0 : i32, i32
  }
  func.func @transform_9(%arg0: i32) -> (i32, i32) {
    %c0_i32 = arith.constant 0 : i32
    %c0_i32_0 = arith.constant 0 : i32
    %c0_i32_1 = arith.constant 0 : i32
    return %c0_i32, %c0_i32_0 : i32, i32
  }
  func.func @transform_10(%arg0: i32) -> (i32, i32) {
    %c0_i32 = arith.constant 0 : i32
    %c0_i32_0 = arith.constant 0 : i32
    %c0_i32_1 = arith.constant 0 : i32
    return %c0_i32, %c0_i32_0 : i32, i32
  }
  func.func @transform_11(%arg0: i32) -> (i32, i32) {
    %c0_i32 = arith.constant 0 : i32
    %c0_i32_0 = arith.constant 0 : i32
    %c0_i32_1 = arith.constant 0 : i32
    return %c0_i32, %c0_i32_0 : i32, i32
  }
  func.func @transform_12(%arg0: i32) -> (i32, i32) {
    %c0_i32 = arith.constant 0 : i32
    %c0_i32_0 = arith.constant 0 : i32
    return %arg0, %c0_i32 : i32, i32
  }
}

</mosaic_0001>

<bundles_post_ra>
// kernel: discriminator_forward.1
= control target key start
LH: loop header
LB: loop body
LE: loop exit
PB: predicated region body
PF: predicated region fallthrough
CT: control target
= control target key end

     0   :  { %vm206_vm0 = vcmask 1041408   ;;  %vm109_vm1 = vcmask 15360   ;;  %vm2573_vm2 = vcmask 253952   ;;  %vm3088_vm3 = vcmask 1041409   ;;  %s13383_s2 = inlined_call_operand.vmem [shape: f32[10,32], index: 2, kind: input, shape index: {}]   ;;  %s13384_s1 = inlined_call_operand.vmem [shape: f32[2,130,2], index: 1, kind: input, shape index: {}]   ;;  %s13385_s0 = inlined_call_operand.vmem [shape: f32[2,130,2], index: 0, kind: input, shape index: {}]   ;;  %s13386_s4 = inlined_call_operand.vmem [shape: f32[160,64], index: 4, kind: input, shape index: {}]   ;;  %s13387_s3 = inlined_call_operand.vmem [shape: f32[1,32], index: 3, kind: input, shape index: {}]   ;;  %s13388_s6 = inlined_call_operand.vmem [shape: f32[320,128], index: 6, kind: input, shape index: {}]   ;;  %s13389_s5 = inlined_call_operand.vmem [shape: f32[1,64], index: 5, kind: input, shape index: {}]   ;;  %s13390_s8 = inlined_call_operand.vmem [shape: f32[640,256], index: 8, kind: input, shape index: {}]   ;;  %s13391_s7 = inlined_call_operand.vmem [shape: f32[1,128], index: 7, kind: input, shape index: {}]   ;;  %s13392_s9 = inlined_call_operand.vmem [shape: f32[1,256], index: 9, kind: input, shape index: {}]   ;;  %s13393_s10 = inlined_call_operand.vmem [shape: f32[16,256], index: 10, kind: input, shape index: {}]   ;;  %s13394_s11 = inlined_call_operand.<no memory space> [shape: f32[1,1], index: 11, kind: input, shape index: {}]   ;;  %s13395_s12 = inlined_call_operand.vmem [shape: f32[2,1], index: 12, kind: output, shape index: {}]  }
   0x1   :  { %v108_v0 = vld [vmem:[%s13383_s2 + $0x2] sm:$0x3]  ;;  %v77_v2 = vld [vmem:[%s13384_s1 + $0x8] sm:$0xff]  ;;  %v75_v3 = vld [vmem:[%s13383_s2] sm:$0x3]  ;;  %vm3090_vm4 = vcmask 1042434  }
   0x2   :  { %v76_v1 = vld [vmem:[%s13384_s1] sm:$0xff]  ;;  %8649 = vmatprep.subr.msk.mxu0 %vm206_vm0, %v108_v0  ;;  %v78_v4 = vld [vmem:[%s13384_s1 + $0x10] sm:$0xff]  ;;  %9199 = vmatprep.subr.msk.mxu1 %vm206_vm0, %v75_v3  ;;  %v48_v6 = vld [vmem:[%s13385_s0 + $0x28] sm:$0xff]  ;;  %vm3092_vm5 = vcmask 1043459   ;;  %vm3094_vm6 = vcmask 1044484   ;;  %vm3096_vm7 = vcmask 1045509  }
   0x3   :  { %8651 = vmatprep.mubr.msk.f32.mxu0 %vm109_vm1, %v76_v1  ;;  %8650 = vmatpush3.msk.msra.mxu0 %vm206_vm0, %v108_v0  ;;  %v47_v5 = vld [vmem:[%s13385_s0 + $0x20] sm:$0xff]  ;;  %v79_v7 = vld [vmem:[%s13384_s1 + $0x18] sm:$0xff]  ;;  %v49_v8 = vld [vmem:[%s13385_s0 + $0x30] sm:$0xff]  ;;  %vm3098_vm8 = vcmask 1046534   ;;  %vm3100_vm9 = vcmask 1047559   ;;  %vm3223_vm10 = vcmask 261120  }
   0x4   :  { %8652 = vmatmul.mubr.msk.f32.vlgmr.msra.gmra.mxu0 %vm109_vm1, %v77_v2  ;;  %8699 = vmatprep.subr.msk.mxu0 %vm206_vm0, %v75_v3  ;;  %v80_v9 = vld [vmem:[%s13384_s1 + $0x20] sm:$0xff]  ;;  %v50_v10 = vld [vmem:[%s13385_s0 + $0x38] sm:$0xff]  ;;  %v81_v11 = vld [vmem:[%s13384_s1 + $0x28] sm:$0xff]  ;;  %vm3884_vm11 = vcmask 261121   ;;  %vm5345_vm12 = vcmask 516096   ;;  %vm5668_vm13 = vcmask 523264  }
   0x5   :  { %8700 = vmatpush3.msk.msra.mxu0 %vm206_vm0, %v75_v3  ;;  %8654 = vmatprep.mubr.msk.f32.mxu0 %vm109_vm1, %v78_v4  ;;  %v51_v12 = vld [vmem:[%s13385_s0 + $0x40] sm:$0xff]  ;;  %v82_v13 = vld [vmem:[%s13384_s1 + $0x30] sm:$0xff]  ;;  %v52_v14 = vld [vmem:[%s13385_s0 + $0x48] sm:$0xff]  ;;  %vm6001_vm14 = vcmask 523265   ;;  %vm7984_vm15 = vcmask 130112  }
   0x6   :  { %9200 = vmatpush3.msk.msra.mxu1 %vm206_vm0, %v75_v3  ;;  %8707 = vmatprep.mubr.msk.f32.mxu1 %vm109_vm1, %v47_v5  ;;  %v83_v15 = vld [vmem:[%s13384_s1 + $0x38] sm:$0xff]  ;;  %v53_v16 = vld [vmem:[%s13385_s0 + $0x50] sm:$0xff]  ;;  %v84_v17 = vld [vmem:[%s13384_s1 + $0x40] sm:$0xff] }
   0x7   :  { %8708 = vmatmul.mubr.msk.f32.vlgmr.msra.gmra.mxu1 %vm109_vm1, %v48_v6  ;;  %v54_v18 = vld [vmem:[%s13385_s0 + $0x58] sm:$0xff]  ;;  %v85_v19 = vld [vmem:[%s13384_s1 + $0x48] sm:$0xff]  ;;  %v55_v20 = vld [vmem:[%s13385_s0 + $0x60] sm:$0xff] }
   0x8   :  { %8655 = vmatmul.mubr.msk.f32.gmra.mxu0 %vm109_vm1, %v79_v7  ;;  %8710 = vmatprep.mubr.msk.f32.mxu1 %vm109_vm1, %v49_v8  ;;  %v86_v21 = vld [vmem:[%s13384_s1 + $0x50] sm:$0xff]  ;;  %v56_v22 = vld [vmem:[%s13385_s0 + $0x68] sm:$0xff]  ;;  %v87_v23 = vld [vmem:[%s13384_s1 + $0x58] sm:$0xff] }
   0x9   :  { %8657 = vmatprep.mubr.msk.f32.mxu0 %vm109_vm1, %v80_v9  ;;  %v57_v24 = vld [vmem:[%s13385_s0 + $0x70] sm:$0xff]  ;;  %v88_v25 = vld [vmem:[%s13384_s1 + $0x60] sm:$0xff]  ;;  %v58_v27 = vld [vmem:[%s13385_s0 + $0x78] sm:$0xff] }
   0xa   :  { %v9507_v26 = vld [vmem:[%s13383_s2 + $0x4] sm:$0x3]  ;;  %v1180_v28 = vld [vmem:[%s13383_s2 + $0x6] sm:$0x3]  ;;  %v89_v29 = vld [vmem:[%s13384_s1 + $0x68] sm:$0xff] }
   0xb   :  { %8711 = vmatmul.mubr.msk.f32.gmra.mxu1 %vm109_vm1, %v50_v10  ;;  %8749 = vmatprep.subr.msk.mxu0 %vm206_vm0, %v9507_v26  ;;  %v59_v30 = vld [vmem:[%s13385_s0 + $0x88] sm:$0xff]  ;;  %v90_v31 = vld [vmem:[%s13384_s1 + $0x70] sm:$0xff]  ;;  %v91_v33 = vld [vmem:[%s13384_s1 + $0x78] sm:$0xff] }
   0xc   :  { %8658 = vmatmul.mubr.msk.f32.gmra.mxu0 %vm109_vm1, %v81_v11  ;;  %8713 = vmatprep.mubr.msk.f32.mxu1 %vm109_vm1, %v51_v12  ;;  %v60_v32 = vld [vmem:[%s13385_s0 + $0x90] sm:$0xff]  ;;  %v61_v34 = vld [vmem:[%s13385_s0 + $0x98] sm:$0xff]  ;;  %v92_v35 = vld [vmem:[%s13384_s1 + $0x88] sm:$0xff] }
   0xd   :  { %8660 = vmatprep.mubr.msk.f32.mxu0 %vm109_vm1, %v82_v13  ;;  %8799 = vmatprep.subr.msk.mxu1 %vm206_vm0, %v1180_v28  ;;  %v62_v36 = vld [vmem:[%s13385_s0 + $0xa0] sm:$0xff]  ;;  %v93_v37 = vld [vmem:[%s13384_s1 + $0x90] sm:$0xff]  ;;  %v63_v38 = vld [vmem:[%s13385_s0 + $0xa8] sm:$0xff] }
   0xe   :  { %8800 = vmatpush3.msk.msra.mxu1 %vm206_vm0, %v1180_v28  ;;  %v94_v39 = vld [vmem:[%s13384_s1 + $0x98] sm:$0xff]  ;;  %v64_v40 = vld [vmem:[%s13385_s0 + $0xb0] sm:$0xff]  ;;  %v95_v41 = vld [vmem:[%s13384_s1 + $0xa0] sm:$0xff] }
   0xf   :  { %8714 = vmatmul.mubr.msk.f32.gmra.mxu1 %vm109_vm1, %v52_v14  ;;  %v65_v42 = vld [vmem:[%s13385_s0 + $0xb8] sm:$0xff]  ;;  %v96_v43 = vld [vmem:[%s13384_s1 + $0xa8] sm:$0xff]  ;;  %v66_v44 = vld [vmem:[%s13385_s0 + $0xc0] sm:$0xff] }
  0x10   :  { %8661 = vmatmul.mubr.msk.f32.gmra.mxu0 %vm109_vm1, %v83_v15  ;;  %8716 = vmatprep.mubr.msk.f32.mxu1 %vm109_vm1, %v53_v16  ;;  %v97_v45 = vld [vmem:[%s13384_s1 + $0xb0] sm:$0xff]  ;;  %v67_v46 = vld [vmem:[%s13385_s0 + $0xc8] sm:$0xff]  ;;  %v98_v47 = vld [vmem:[%s13384_s1 + $0xb8] sm:$0xff] }
  0x11   :  { %8663 = vmatprep.mubr.msk.f32.mxu0 %vm109_vm1, %v84_v17  ;;  %v68_v48 = vld [vmem:[%s13385_s0 + $0xd0] sm:$0xff]  ;;  %v99_v49 = vld [vmem:[%s13384_s1 + $0xc0] sm:$0xff]  ;;  %v69_v50 = vld [vmem:[%s13385_s0 + $0xd8] sm:$0xff] }
  0x12   :  { %v100_v51 = vld [vmem:[%s13384_s1 + $0xc8] sm:$0xff]  ;;  %v70_v52 = vld [vmem:[%s13385_s0 + $0xe0] sm:$0xff]  ;;  %v101_v53 = vld [vmem:[%s13384_s1 + $0xd0] sm:$0xff] }
  0x13   :  { %8717 = vmatmul.mubr.msk.f32.gmra.mxu1 %vm109_vm1, %v54_v18  ;;  %v71_v54 = vld [vmem:[%s13385_s0 + $0xe8] sm:$0xff]  ;;  %v102_v55 = vld [vmem:[%s13384_s1 + $0xd8] sm:$0xff]  ;;  %v72_v56 = vld [vmem:[%s13385_s0 + $0xf0] sm:$0xff] }
  0x14   :  { %8664 = vmatmul.mubr.msk.f32.gmra.mxu0 %vm109_vm1, %v85_v19  ;;  %8719 = vmatprep.mubr.msk.f32.mxu1 %vm109_vm1, %v55_v20  ;;  %v103_v57 = vld [vmem:[%s13384_s1 + $0xe0] sm:$0xff]  ;;  %v73_v58 = vld [vmem:[%s13385_s0 + $0xf8] sm:$0xff]  ;;  %v104_v59 = vld [vmem:[%s13384_s1 + $0xe8] sm:$0xff] }
  0x15   :  { %8666 = vmatprep.mubr.msk.f32.mxu0 %vm109_vm1, %v86_v21  ;;  %v74_v60 = vld [vmem:[%s13385_s0 + $0x100] sm:$0xff]  ;;  %v105_v61 = vld [vmem:[%s13384_s1 + $0xf0] sm:$0xff]  ;;  %v106_v63 = vld [vmem:[%s13384_s1 + $0xf8] sm:$0xff] }
  0x16   :  { %v1148_v62 = vld [vmem:[%s13384_s1 + $0x1] sm:$0xff]  ;;  %v1149_v0 = vld [vmem:[%s13384_s1 + $0x9] sm:$0xff]  ;;  %v1150_v2 = vld [vmem:[%s13384_s1 + $0x11] sm:$0xff] }
  0x17   :  { %8720 = vmatmul.mubr.msk.f32.gmra.mxu1 %vm109_vm1, %v56_v22  ;;  %v107_v1 = vld [vmem:[%s13384_s1 + $0x100] sm:$0xff]  ;;  %v44_v5 = vld [vmem:[%s13385_s0 + $0x8] sm:$0xff]  ;;  %v45_v7 = vld [vmem:[%s13385_s0 + $0x10] sm:$0xff] }
  0x18   :  { %8667 = vmatmul.mubr.msk.f32.gmra.mxu0 %vm109_vm1, %v87_v23  ;;  %8722 = vmatprep.mubr.msk.f32.mxu1 %vm109_vm1, %v57_v24  ;;  %v43_v3 = vld [vmem:[%s13385_s0] sm:$0xff]  ;;  %v1569_v8 = vld [vmem:[%s13383_s2 + $0x8] sm:$0x3]  ;;  %v46_v10 = vld [vmem:[%s13385_s0 + $0x18] sm:$0xff] }
  0x19   :  { %8669 = vmatprep.mubr.msk.f32.mxu0 %vm109_vm1, %v88_v25  ;;  %v1151_v4 = vld [vmem:[%s13384_s1 + $0x19] sm:$0xff]  ;;  %v1152_v6 = vld [vmem:[%s13384_s1 + $0x21] sm:$0xff]  ;;  %v1153_v9 = vld [vmem:[%s13384_s1 + $0x29] sm:$0xff] }
  0x1a   :  { %v1154_v11 = vld [vmem:[%s13384_s1 + $0x31] sm:$0xff]  ;;  %v759_v12 = vld [vmem:[%s13385_s0 + $0x1] sm:$0xff]  ;;  %v1155_v13 = vld [vmem:[%s13384_s1 + $0x39] sm:$0xff] }
  0x1b   :  { %8723 = vmatmul.mubr.msk.f32.gmra.mxu1 %vm109_vm1, %v58_v27  ;;  %v760_v14 = vld [vmem:[%s13385_s0 + $0x9] sm:$0xff]  ;;  %v1156_v15 = vld [vmem:[%s13384_s1 + $0x41] sm:$0xff]  ;;  %v761_v16 = vld [vmem:[%s13385_s0 + $0x11] sm:$0xff] }
  0x1c   :  { %8670 = vmatmul.mubr.msk.f32.gmra.mxu0 %vm109_vm1, %v89_v29  ;;  %8725 = vmatprep.mubr.msk.f32.mxu1 %vm109_vm1, %v59_v30  ;;  %v1157_v17 = vld [vmem:[%s13384_s1 + $0x49] sm:$0xff]  ;;  %v762_v18 = vld [vmem:[%s13385_s0 + $0x19] sm:$0xff]  ;;  %v1158_v19 = vld [vmem:[%s13384_s1 + $0x51] sm:$0xff] }
  0x1d   :  { %8672 = vmatprep.mubr.msk.f32.mxu0 %vm109_vm1, %v90_v31  ;;  %v763_v20 = vld [vmem:[%s13385_s0 + $0x21] sm:$0xff]  ;;  %v1159_v21 = vld [vmem:[%s13384_s1 + $0x59] sm:$0xff]  ;;  %v764_v22 = vld [vmem:[%s13385_s0 + $0x29] sm:$0xff] }
  0x1e   :  { %v1160_v23 = vld [vmem:[%s13384_s1 + $0x61] sm:$0xff]  ;;  %v765_v24 = vld [vmem:[%s13385_s0 + $0x31] sm:$0xff]  ;;  %v1161_v25 = vld [vmem:[%s13384_s1 + $0x69] sm:$0xff] }
  0x1f   :  { %8726 = vmatmul.mubr.msk.f32.gmra.mxu1 %vm109_vm1, %v60_v32  ;;  %v1162_v27 = vld [vmem:[%s13384_s1 + $0x71] sm:$0xff]  ;;  %v767_v28 = vld [vmem:[%s13385_s0 + $0x41] sm:$0xff]  ;;  %v1163_v29 = vld [vmem:[%s13384_s1 + $0x79] sm:$0xff] }
  0x20   :  { %8673 = vmatmul.mubr.msk.f32.gmra.mxu0 %vm109_vm1, %v91_v33  ;;  %8728 = vmatprep.mubr.msk.f32.mxu1 %vm109_vm1, %v61_v34  ;;  %v768_v30 = vld [vmem:[%s13385_s0 + $0x49] sm:$0xff]  ;;  %v769_v32 = vld [vmem:[%s13385_s0 + $0x51] sm:$0xff]  ;;  %v770_v34 = vld [vmem:[%s13385_s0 + $0x59] sm:$0xff] }
  0x21   :  { %8675 = vmatprep.mubr.msk.f32.mxu0 %vm109_vm1, %v92_v35  ;;  %v1164_v31 = vld [vmem:[%s13384_s1 + $0x89] sm:$0xff]  ;;  %v1165_v33 = vld [vmem:[%s13384_s1 + $0x91] sm:$0xff]  ;;  %v1166_v35 = vld [vmem:[%s13384_s1 + $0x99] sm:$0xff] }
  0x23   :  { %8729 = vmatmul.mubr.msk.f32.gmra.mxu1 %vm109_vm1, %v62_v36  ;;  %v771_v36 = vld [vmem:[%s13385_s0 + $0x61] sm:$0xff] }
  0x24   :  { %8676 = vmatmul.mubr.msk.f32.gmra.mxu0 %vm109_vm1, %v93_v37  ;;  %8731 = vmatprep.mubr.msk.f32.mxu1 %vm109_vm1, %v63_v38  ;;  %v1167_v37 = vld [vmem:[%s13384_s1 + $0xa1] sm:$0xff]  ;;  %v772_v38 = vld [vmem:[%s13385_s0 + $0x69] sm:$0xff] }
  0x25   :  { %8678 = vmatprep.mubr.msk.f32.mxu0 %vm109_vm1, %v94_v39  ;;  %v1168_v39 = vld [vmem:[%s13384_s1 + $0xa9] sm:$0xff] }
  0x27   :  { %8732 = vmatmul.mubr.msk.f32.gmra.mxu1 %vm109_vm1, %v64_v40  ;;  %v773_v40 = vld [vmem:[%s13385_s0 + $0x71] sm:$0xff] }
  0x28   :  { %8679 = vmatmul.mubr.msk.f32.gmra.mxu0 %vm109_vm1, %v95_v41  ;;  %8734 = vmatprep.mubr.msk.f32.mxu1 %vm109_vm1, %v65_v42  ;;  %v1169_v41 = vld [vmem:[%s13384_s1 + $0xb1] sm:$0xff]  ;;  %v774_v42 = vld [vmem:[%s13385_s0 + $0x79] sm:$0xff] }
  0x29   :  { %8681 = vmatprep.mubr.msk.f32.mxu0 %vm109_vm1, %v96_v43  ;;  %v1170_v43 = vld [vmem:[%s13384_s1 + $0xb9] sm:$0xff] }
  0x2b   :  { %8735 = vmatmul.mubr.msk.f32.gmra.mxu1 %vm109_vm1, %v66_v44  ;;  %v775_v44 = vld [vmem:[%s13385_s0 + $0x89] sm:$0xff] }
  0x2c   :  { %8682 = vmatmul.mubr.msk.f32.gmra.mxu0 %vm109_vm1, %v97_v45  ;;  %8737 = vmatprep.mubr.msk.f32.mxu1 %vm109_vm1, %v67_v46  ;;  %v1171_v45 = vld [vmem:[%s13384_s1 + $0xc1] sm:$0xff]  ;;  %v776_v46 = vld [vmem:[%s13385_s0 + $0x91] sm:$0xff] }
  0x2d   :  { %8684 = vmatprep.mubr.msk.f32.mxu0 %vm109_vm1, %v98_v47  ;;  %v1172_v47 = vld [vmem:[%s13384_s1 + $0xc9] sm:$0xff] }
  0x2f   :  { %8738 = vmatmul.mubr.msk.f32.gmra.mxu1 %vm109_vm1, %v68_v48  ;;  %v777_v48 = vld [vmem:[%s13385_s0 + $0x99] sm:$0xff] }
  0x30   :  { %8685 = vmatmul.mubr.msk.f32.gmra.mxu0 %vm109_vm1, %v99_v49  ;;  %8740 = vmatprep.mubr.msk.f32.mxu1 %vm109_vm1, %v69_v50  ;;  %v1173_v49 = vld [vmem:[%s13384_s1 + $0xd1] sm:$0xff]  ;;  %v778_v50 = vld [vmem:[%s13385_s0 + $0xa1] sm:$0xff] }
  0x31   :  { %8687 = vmatprep.mubr.msk.f32.mxu0 %vm109_vm1, %v100_v51  ;;  %v1174_v51 = vld [vmem:[%s13384_s1 + $0xd9] sm:$0xff] }
  0x33   :  { %8741 = vmatmul.mubr.msk.f32.gmra.mxu1 %vm109_vm1, %v70_v52  ;;  %v779_v52 = vld [vmem:[%s13385_s0 + $0xa9] sm:$0xff] }
  0x34   :  { %8688 = vmatmul.mubr.msk.f32.gmra.mxu0 %vm109_vm1, %v101_v53  ;;  %8743 = vmatprep.mubr.msk.f32.mxu1 %vm109_vm1, %v71_v54  ;;  %v1175_v53 = vld [vmem:[%s13384_s1 + $0xe1] sm:$0xff]  ;;  %v780_v54 = vld [vmem:[%s13385_s0 + $0xb1] sm:$0xff] }
  0x35   :  { %8690 = vmatprep.mubr.msk.f32.mxu0 %vm109_vm1, %v102_v55  ;;  %v1176_v55 = vld [vmem:[%s13384_s1 + $0xe9] sm:$0xff] }
  0x37   :  { %8744 = vmatmul.mubr.msk.f32.gmra.mxu1 %vm109_vm1, %v72_v56  ;;  %v781_v56 = vld [vmem:[%s13385_s0 + $0xb9] sm:$0xff] }
  0x38   :  { %8691 = vmatmul.mubr.msk.f32.gmra.mxu0 %vm109_vm1, %v103_v57  ;;  %8746 = vmatprep.mubr.msk.f32.mxu1 %vm109_vm1, %v73_v58  ;;  %v1177_v57 = vld [vmem:[%s13384_s1 + $0xf1] sm:$0xff]  ;;  %v782_v58 = vld [vmem:[%s13385_s0 + $0xc1] sm:$0xff] }
  0x39   :  { %8693 = vmatprep.mubr.msk.f32.mxu0 %vm109_vm1, %v104_v59  ;;  %v1178_v59 = vld [vmem:[%s13384_s1 + $0xf9] sm:$0xff] }
  0x3b   :  { %8747 = vmatmul.mubr.msk.f32.gmra.mxu1 %vm109_vm1, %v74_v60  ;;  %v783_v60 = vld [vmem:[%s13385_s0 + $0xc9] sm:$0xff] }
  0x3c   :  { %8694 = vmatmul.mubr.msk.f32.gmra.mxu0 %vm109_vm1, %v105_v61  ;;  %8801 = vmatprep.mubr.msk.f32.mxu1 %vm109_vm1, %v1148_v62  ;;  %v1179_v61 = vld [vmem:[%s13384_s1 + $0x101] sm:$0xff]  ;;  %v784_v62 = vld [vmem:[%s13385_s0 + $0xd1] sm:$0xff] }
  0x3d   :  { %8696 = vmatprep.mubr.msk.f32.mxu0 %vm109_vm1, %v106_v63  ;;  %v785_v63 = vld [vmem:[%s13385_s0 + $0xd9] sm:$0xff] }
  0x3f   :  { %8802 = vmatmul.mubr.msk.f32.vlgmr.msra.gmra.mxu1 %vm109_vm1, %v1149_v0  ;;  %v786_v0 = vld [vmem:[%s13385_s0 + $0xe1] sm:$0xff] }
  0x40   :  { %8697 = vmatmul.mubr.msk.f32.gmra.mxu0 %vm109_vm1, %v107_v1  ;;  %8804 = vmatprep.mubr.msk.f32.mxu1 %vm109_vm1, %v1150_v2  ;;  %v787_v1 = vld [vmem:[%s13385_s0 + $0xe9] sm:$0xff]  ;;  %v788_v2 = vld [vmem:[%s13385_s0 + $0xf1] sm:$0xff] }
  0x41   :  { %8701 = vmatprep.mubr.msk.f32.mxu0 %vm109_vm1, %v43_v3  ;;  %v789_v3 = vld [vmem:[%s13385_s0 + $0xf9] sm:$0xff] }
  0x43   :  { %8805 = vmatmul.mubr.msk.f32.gmra.mxu1 %vm109_vm1, %v1151_v4  ;;  %v790_v4 = vld [vmem:[%s13385_s0 + $0x101] sm:$0xff] }
  0x44   :  { %8702 = vmatmul.mubr.msk.f32.vlgmr.msra.gmra.mxu0 %vm109_vm1, %v44_v5  ;;  %8807 = vmatprep.mubr.msk.f32.mxu1 %vm109_vm1, %v1152_v6  ;;  %v1537_v5 = vld [vmem:[%s13385_s0 + $0x2] sm:$0xff]  ;;  %v1538_v6 = vld [vmem:[%s13385_s0 + $0xa] sm:$0xff] }
  0x45   :  { %8750 = vmatpush3.msk.msra.mxu0 %vm206_vm0, %v9507_v26  ;;  %8704 = vmatprep.mubr.msk.f32.mxu0 %vm109_vm1, %v45_v7  ;;  %v766_v26 = vld [vmem:[%s13385_s0 + $0x39] sm:$0xff] }
  0x46   :  { %8849 = vmatprep.subr.msk.mxu0 %vm206_vm0, %v1569_v8  ;;  %v1539_v7 = vld [vmem:[%s13385_s0 + $0x12] sm:$0xff] }
  0x47   :  { %8808 = vmatmul.mubr.msk.f32.gmra.mxu1 %vm109_vm1, %v1153_v9  ;;  %v1541_v9 = vld [vmem:[%s13385_s0 + $0x22] sm:$0xff] }
  0x48   :  { %8705 = vmatmul.mubr.msk.f32.gmra.mxu0 %vm109_vm1, %v46_v10  ;;  %8810 = vmatprep.mubr.msk.f32.mxu1 %vm109_vm1, %v1154_v11  ;;  %v1542_v10 = vld [vmem:[%s13385_s0 + $0x2a] sm:$0xff]  ;;  %v1543_v11 = vld [vmem:[%s13385_s0 + $0x32] sm:$0xff] }
  0x49   :  { %8751 = vmatprep.mubr.msk.f32.mxu0 %vm109_vm1, %v759_v12  ;;  %v1544_v12 = vld [vmem:[%s13385_s0 + $0x3a] sm:$0xff] }
  0x4b   :  { %8811 = vmatmul.mubr.msk.f32.gmra.mxu1 %vm109_vm1, %v1155_v13  ;;  %v1545_v13 = vld [vmem:[%s13385_s0 + $0x42] sm:$0xff] }
  0x4c   :  { %8752 = vmatmul.mubr.msk.f32.vlgmr.msra.gmra.mxu0 %vm109_vm1, %v760_v14  ;;  %8813 = vmatprep.mubr.msk.f32.mxu1 %vm109_vm1, %v1156_v15  ;;  %v1546_v14 = vld [vmem:[%s13385_s0 + $0x4a] sm:$0xff]  ;;  %v1547_v15 = vld [vmem:[%s13385_s0 + $0x52] sm:$0xff] }
  0x4d   :  { %8850 = vmatpush3.msk.msra.mxu0 %vm206_vm0, %v1569_v8  ;;  %8754 = vmatprep.mubr.msk.f32.mxu0 %vm109_vm1, %v761_v16  ;;  %v1540_v8 = vld [vmem:[%s13385_s0 + $0x1a] sm:$0xff]  ;;  %vm7997_vm0 = vcmask 123904  }
  0x4e   :  { %v1548_v16 = vld [vmem:[%s13385_s0 + $0x5a] sm:$0xff] }
  0x4f   :  { %8814 = vmatmul.mubr.msk.f32.gmra.mxu1 %vm109_vm1, %v1157_v17  ;;  %v1549_v17 = vld [vmem:[%s13385_s0 + $0x62] sm:$0xff] }
  0x50   :  { %8755 = vmatmul.mubr.msk.f32.gmra.mxu0 %vm109_vm1, %v762_v18  ;;  %8816 = vmatprep.mubr.msk.f32.mxu1 %vm109_vm1, %v1158_v19  ;;  %v1550_v18 = vld [vmem:[%s13385_s0 + $0x6a] sm:$0xff]  ;;  %v1551_v19 = vld [vmem:[%s13385_s0 + $0x72] sm:$0xff] }
  0x51   :  { %8757 = vmatprep.mubr.msk.f32.mxu0 %vm109_vm1, %v763_v20  ;;  %v1552_v20 = vld [vmem:[%s13385_s0 + $0x7a] sm:$0xff] }
  0x53   :  { %8817 = vmatmul.mubr.msk.f32.gmra.mxu1 %vm109_vm1, %v1159_v21  ;;  %v1553_v21 = vld [vmem:[%s13385_s0 + $0x8a] sm:$0xff] }
  0x54   :  { %8758 = vmatmul.mubr.msk.f32.gmra.mxu0 %vm109_vm1, %v764_v22  ;;  %8819 = vmatprep.mubr.msk.f32.mxu1 %vm109_vm1, %v1160_v23  ;;  %v1554_v22 = vld [vmem:[%s13385_s0 + $0x92] sm:$0xff]  ;;  %v1555_v23 = vld [vmem:[%s13385_s0 + $0x9a] sm:$0xff] }
  0x55   :  { %8760 = vmatprep.mubr.msk.f32.mxu0 %vm109_vm1, %v765_v24  ;;  %v1556_v24 = vld [vmem:[%s13385_s0 + $0xa2] sm:$0xff] }
  0x57   :  { %8820 = vmatmul.mubr.msk.f32.gmra.mxu1 %vm109_vm1, %v1161_v25  ;;  %v1557_v25 = vld [vmem:[%s13385_s0 + $0xaa] sm:$0xff] }
  0x58   :  { %8761 = vmatmul.mubr.msk.f32.gmra.mxu0 %vm109_vm1, %v766_v26  ;;  %8822 = vmatprep.mubr.msk.f32.mxu1 %vm109_vm1, %v1162_v27  ;;  %v1558_v26 = vld [vmem:[%s13385_s0 + $0xb2] sm:$0xff]  ;;  %v1559_v27 = vld [vmem:[%s13385_s0 + $0xba] sm:$0xff] }
  0x59   :  { %8763 = vmatprep.mubr.msk.f32.mxu0 %vm109_vm1, %v767_v28  ;;  %v1560_v28 = vld [vmem:[%s13385_s0 + $0xc2] sm:$0xff] }
  0x5b   :  { %8823 = vmatmul.mubr.msk.f32.gmra.mxu1 %vm109_vm1, %v1163_v29  ;;  %v1561_v29 = vld [vmem:[%s13385_s0 + $0xca] sm:$0xff] }
  0x5c   :  { %8764 = vmatmul.mubr.msk.f32.gmra.mxu0 %vm109_vm1, %v768_v30  ;;  %8825 = vmatprep.mubr.msk.f32.mxu1 %vm109_vm1, %v1164_v31  ;;  %v1562_v30 = vld [vmem:[%s13385_s0 + $0xd2] sm:$0xff]  ;;  %v1563_v31 = vld [vmem:[%s13385_s0 + $0xda] sm:$0xff] }
  0x5d   :  { %8766 = vmatprep.mubr.msk.f32.mxu0 %vm109_vm1, %v769_v32  ;;  %v1564_v32 = vld [vmem:[%s13385_s0 + $0xe2] sm:$0xff] }
  0x5f   :  { %8826 = vmatmul.mubr.msk.f32.gmra.mxu1 %vm109_vm1, %v1165_v33  ;;  %v1565_v33 = vld [vmem:[%s13385_s0 + $0xea] sm:$0xff] }
  0x60   :  { %8767 = vmatmul.mubr.msk.f32.gmra.mxu0 %vm109_vm1, %v770_v34  ;;  %8828 = vmatprep.mubr.msk.f32.mxu1 %vm109_vm1, %v1166_v35  ;;  %v1566_v34 = vld [vmem:[%s13385_s0 + $0xf2] sm:$0xff]  ;;  %v1567_v35 = vld [vmem:[%s13385_s0 + $0xfa] sm:$0xff] }
  0x61   :  { %8769 = vmatprep.mubr.msk.f32.mxu0 %vm109_vm1, %v771_v36 }
  0x63   :  { %8829 = vmatmul.mubr.msk.f32.gmra.mxu1 %vm109_vm1, %v1167_v37  ;;  %v1568_v37 = vld [vmem:[%s13385_s0 + $0x102] sm:$0xff] }
  0x64   :  { %8770 = vmatmul.mubr.msk.f32.gmra.mxu0 %vm109_vm1, %v772_v38  ;;  %8831 = vmatprep.mubr.msk.f32.mxu1 %vm109_vm1, %v1168_v39 }
  0x65   :  { %8772 = vmatprep.mubr.msk.f32.mxu0 %vm109_vm1, %v773_v40 }
  0x67   :  { %8832 = vmatmul.mubr.msk.f32.gmra.mxu1 %vm109_vm1, %v1169_v41 }
  0x68   :  { %8773 = vmatmul.mubr.msk.f32.gmra.mxu0 %vm109_vm1, %v774_v42  ;;  %8834 = vmatprep.mubr.msk.f32.mxu1 %vm109_vm1, %v1170_v43 }
  0x69   :  { %8775 = vmatprep.mubr.msk.f32.mxu0 %vm109_vm1, %v775_v44 }
  0x6b   :  { %8835 = vmatmul.mubr.msk.f32.gmra.mxu1 %vm109_vm1, %v1171_v45 }
  0x6c   :  { %8776 = vmatmul.mubr.msk.f32.gmra.mxu0 %vm109_vm1, %v776_v46  ;;  %8837 = vmatprep.mubr.msk.f32.mxu1 %vm109_vm1, %v1172_v47 }
  0x6d   :  { %8778 = vmatprep.mubr.msk.f32.mxu0 %vm109_vm1, %v777_v48 }
  0x6f   :  { %8838 = vmatmul.mubr.msk.f32.gmra.mxu1 %vm109_vm1, %v1173_v49 }
  0x70   :  { %8779 = vmatmul.mubr.msk.f32.gmra.mxu0 %vm109_vm1, %v778_v50  ;;  %8840 = vmatprep.mubr.msk.f32.mxu1 %vm109_vm1, %v1174_v51 }
  0x71   :  { %8781 = vmatprep.mubr.msk.f32.mxu0 %vm109_vm1, %v779_v52 }
  0x73   :  { %8841 = vmatmul.mubr.msk.f32.gmra.mxu1 %vm109_vm1, %v1175_v53 }
  0x74   :  { %8782 = vmatmul.mubr.msk.f32.gmra.mxu0 %vm109_vm1, %v780_v54  ;;  %8843 = vmatprep.mubr.msk.f32.mxu1 %vm109_vm1, %v1176_v55 }
  0x75   :  { %8784 = vmatprep.mubr.msk.f32.mxu0 %vm109_vm1, %v781_v56 }
  0x77   :  { %8844 = vmatmul.mubr.msk.f32.gmra.mxu1 %vm109_vm1, %v1177_v57 }
  0x78   :  { %8785 = vmatmul.mubr.msk.f32.gmra.mxu0 %vm109_vm1, %v782_v58  ;;  %8846 = vmatprep.mubr.msk.f32.mxu1 %vm109_vm1, %v1178_v59 }
  0x79   :  { %8787 = vmatprep.mubr.msk.f32.mxu0 %vm109_vm1, %v783_v60 }
  0x7b   :  { %8847 = vmatmul.mubr.msk.f32.gmra.mxu1 %vm109_vm1, %v1179_v61 }
  0x7c   :  { %8788 = vmatmul.mubr.msk.f32.gmra.mxu0 %vm109_vm1, %v784_v62 }
  0x7d   :  { %8790 = vmatprep.mubr.msk.f32.mxu0 %vm109_vm1, %v785_v63 }
  0x80   :  { %8791 = vmatmul.mubr.msk.f32.gmra.mxu0 %vm109_vm1, %v786_v0 }
  0x81   :  { %8793 = vmatprep.mubr.msk.f32.mxu0 %vm109_vm1, %v787_v1 }
  0x84   :  { %8794 = vmatmul.mubr.msk.f32.gmra.mxu0 %vm109_vm1, %v788_v2 }
  0x85   :  { %8796 = vmatprep.mubr.msk.f32.mxu0 %vm109_vm1, %v789_v3 }
  0x88   :  { %8797 = vmatmul.mubr.msk.f32.gmra.mxu0 %vm109_vm1, %v790_v4 }
  0x89   :  { %8851 = vmatprep.mubr.msk.f32.mxu0 %vm109_vm1, %v1537_v5 }
  0x8c   :  { %8852 = vmatmul.mubr.msk.f32.vlgmr.msra.gmra.mxu0 %vm109_vm1, %v1538_v6 }
  0x8d   :  { %8854 = vmatprep.mubr.msk.f32.mxu0 %vm109_vm1, %v1539_v7 }
  0x90   :  { %8855 = vmatmul.mubr.msk.f32.gmra.mxu0 %vm109_vm1, %v1540_v8 }
  0x91   :  { %8857 = vmatprep.mubr.msk.f32.mxu0 %vm109_vm1, %v1541_v9 }
  0x94   :  { %8858 = vmatmul.mubr.msk.f32.gmra.mxu0 %vm109_vm1, %v1542_v10 }
  0x95   :  { %8860 = vmatprep.mubr.msk.f32.mxu0 %vm109_vm1, %v1543_v11 }
  0x98   :  { %8861 = vmatmul.mubr.msk.f32.gmra.mxu0 %vm109_vm1, %v1544_v12 }
  0x99   :  { %8863 = vmatprep.mubr.msk.f32.mxu0 %vm109_vm1, %v1545_v13 }
  0x9c   :  { %8864 = vmatmul.mubr.msk.f32.gmra.mxu0 %vm109_vm1, %v1546_v14 }
  0x9d   :  { %8866 = vmatprep.mubr.msk.f32.mxu0 %vm109_vm1, %v1547_v15 }
  0xa0   :  { %8867 = vmatmul.mubr.msk.f32.gmra.mxu0 %vm109_vm1, %v1548_v16 }
  0xa1   :  { %8869 = vmatprep.mubr.msk.f32.mxu0 %vm109_vm1, %v1549_v17 }
  0xa4   :  { %8870 = vmatmul.mubr.msk.f32.gmra.mxu0 %vm109_vm1, %v1550_v18 }
  0xa5   :  { %8872 = vmatprep.mubr.msk.f32.mxu0 %vm109_vm1, %v1551_v19 }
  0xa8   :  { %8873 = vmatmul.mubr.msk.f32.gmra.mxu0 %vm109_vm1, %v1552_v20 }
  0xa9   :  { %8875 = vmatprep.mubr.msk.f32.mxu0 %vm109_vm1, %v1553_v21 }
  0xac   :  { %8876 = vmatmul.mubr.msk.f32.gmra.mxu0 %vm109_vm1, %v1554_v22 }
  0xad   :  { %8878 = vmatprep.mubr.msk.f32.mxu0 %vm109_vm1, %v1555_v23 }
  0xb0   :  { %8879 = vmatmul.mubr.msk.f32.gmra.mxu0 %vm109_vm1, %v1556_v24 }
  0xb1   :  { %8881 = vmatprep.mubr.msk.f32.mxu0 %vm109_vm1, %v1557_v25 }
  0xb4   :  { %8882 = vmatmul.mubr.msk.f32.gmra.mxu0 %vm109_vm1, %v1558_v26 }
  0xb5   :  { %8884 = vmatprep.mubr.msk.f32.mxu0 %vm109_vm1, %v1559_v27 }
  0xb8   :  { %8885 = vmatmul.mubr.msk.f32.gmra.mxu0 %vm109_vm1, %v1560_v28 }
  0xb9   :  { %8887 = vmatprep.mubr.msk.f32.mxu0 %vm109_vm1, %v1561_v29 }
  0xbc   :  { %8888 = vmatmul.mubr.msk.f32.gmra.mxu0 %vm109_vm1, %v1562_v30 }
  0xbd   :  { %8890 = vmatprep.mubr.msk.f32.mxu0 %vm109_vm1, %v1563_v31 }
  0xc0   :  { %8891 = vmatmul.mubr.msk.f32.gmra.mxu0 %vm109_vm1, %v1564_v32 }
  0xc1   :  { %8893 = vmatprep.mubr.msk.f32.mxu0 %vm109_vm1, %v1565_v33 }
  0xc4   :  { %v10065_v36 = vpop.f32.mrf.mxu0  ;;  %8894 = vmatmul.mubr.msk.f32.gmra.mxu0 %vm109_vm1, %v1566_v34 }
  0xc5   :  { %8896 = vmatprep.mubr.msk.f32.mxu0 %vm109_vm1, %v1567_v35 }
  0xc6   :  { %v10072_v38 = vpop.f32.mrf.mxu0 }
  0xc7   :  { %v8709_v39 = vpop.f32.mrf.mxu1 }
  0xc8   :  { %v10074_v40 = vpop.f32.mrf.mxu0  ;;  %8897 = vmatmul.mubr.msk.f32.gmra.mxu0 %vm109_vm1, %v1568_v37  ;;  %vm8009_vm1 = vcmask 1024  }
  0xc9   :  { %v10077_v41 = vpop.f32.mrf.mxu1 }
  0xca   :  { %v10079_v42 = vpop.f32.mrf.mxu0 }
  0xcb   :  { %v8712_v43 = vpop.f32.mrf.mxu1 }
  0xcc   :  { %v8659_v44 = vpop.f32.mrf.mxu0 }
  0xcd   :  { %v10081_v45 = vadd.f32 %v8709_v39, %v8659_v44  ;;  %v10083_v46 = vpop.f32.mrf.mxu1 }
  0xce   :  { %v10085_v47 = vpop.f32.mrf.mxu0 }
  0xcf   :  { %v8715_v48 = vpop.f32.mrf.mxu1 }
  0xd0   :  { %v8662_v49 = vpop.f32.mrf.mxu0 }
  0xd1   :  { %v10087_v50 = vadd.f32 %v8712_v43, %v8662_v49  ;;  %v10089_v51 = vpop.f32.mrf.mxu1 }
  0xd2   :  { %v10091_v52 = vpop.f32.mrf.mxu0 }
  0xd3   :  { %v8718_v53 = vpop.f32.mrf.mxu1 }
  0xd4   :  { %v8665_v54 = vpop.f32.mrf.mxu0 }
  0xd5   :  { %v10093_v55 = vadd.f32 %v8715_v48, %v8665_v54  ;;  %v10095_v56 = vpop.f32.mrf.mxu1  ;;  %v3944_v48 = vld [vmem:[%s13386_s4 + $0x38] sm:$0xff] }
  0xd6   :  { %v10097_v57 = vpop.f32.mrf.mxu0  ;;  %8899 = vmatprep.subr.mxu1 %v3944_v48 }
  0xd7   :  { %v8721_v58 = vpop.f32.mrf.mxu1  ;;  %8900 = vmatpush3.msra.mxu1 %v3944_v48 }
  0xd8   :  { %v8668_v59 = vpop.f32.mrf.mxu0 }
  0xd9   :  { %v10099_v60 = vadd.f32 %v8718_v53, %v8668_v59  ;;  %v10101_v61 = vpop.f32.mrf.mxu1 }
  0xda   :  { %v10103_v62 = vpop.f32.mrf.mxu0 }
  0xdb   :  { %v8724_v63 = vpop.f32.mrf.mxu1 }
  0xdc   :  { %v8671_v0 = vpop.f32.mrf.mxu0 }
  0xdd   :  { %v10105_v1 = vadd.f32 %v8721_v58, %v8671_v0  ;;  %v10107_v2 = vpop.f32.mrf.mxu1 }
  0xde   :  { %v10109_v3 = vpop.f32.mrf.mxu0 }
  0xdf   :  { %v8727_v4 = vpop.f32.mrf.mxu1 }
  0xe0   :  { %v8674_v5 = vpop.f32.mrf.mxu0 }
  0xe1   :  { %v10111_v6 = vadd.f32 %v8724_v63, %v8674_v5  ;;  %v10113_v7 = vpop.f32.mrf.mxu1 }
  0xe2   :  { %v10115_v8 = vpop.f32.mrf.mxu0 }
  0xe3   :  { %v8730_v9 = vpop.f32.mrf.mxu1 }
  0xe4   :  { %v8677_v10 = vpop.f32.mrf.mxu0 }
  0xe5   :  { %v10117_v11 = vadd.f32 %v8727_v4, %v8677_v10  ;;  %v10119_v12 = vpop.f32.mrf.mxu1 }
  0xe6   :  { %v10121_v13 = vpop.f32.mrf.mxu0 }
  0xe7   :  { %v8733_v14 = vpop.f32.mrf.mxu1 }
  0xe8   :  { %v8680_v15 = vpop.f32.mrf.mxu0 }
  0xe9   :  { %v10123_v16 = vadd.f32 %v8730_v9, %v8680_v15  ;;  %v10125_v17 = vpop.f32.mrf.mxu1 }
  0xea   :  { %v10127_v18 = vpop.f32.mrf.mxu0 }
  0xeb   :  { %v8736_v19 = vpop.f32.mrf.mxu1 }
  0xec   :  { %v8683_v20 = vpop.f32.mrf.mxu0 }
  0xed   :  { %v10129_v21 = vadd.f32 %v8733_v14, %v8683_v20  ;;  %v10131_v22 = vpop.f32.mrf.mxu1 }
  0xee   :  { %v10133_v23 = vpop.f32.mrf.mxu0 }
  0xef   :  { %v8739_v24 = vpop.f32.mrf.mxu1 }
  0xf0   :  { %v8686_v25 = vpop.f32.mrf.mxu0 }
  0xf1   :  { %v10135_v26 = vadd.f32 %v8736_v19, %v8686_v25  ;;  %v10137_v27 = vpop.f32.mrf.mxu1 }
  0xf2   :  { %v10139_v28 = vpop.f32.mrf.mxu0 }
  0xf3   :  { %v8742_v29 = vpop.f32.mrf.mxu1 }
  0xf4   :  { %v8689_v30 = vpop.f32.mrf.mxu0 }
  0xf5   :  { %v10141_v31 = vadd.f32 %v8739_v24, %v8689_v30  ;;  %v10143_v32 = vpop.f32.mrf.mxu1 }
  0xf6   :  { %v10145_v33 = vpop.f32.mrf.mxu0 }
  0xf7   :  { %v8745_v34 = vpop.f32.mrf.mxu1 }
  0xf8   :  { %v8692_v35 = vpop.f32.mrf.mxu0 }
  0xf9   :  { %v10147_v37 = vadd.f32 %v8742_v29, %v8692_v35  ;;  %v10149_v39 = vpop.f32.mrf.mxu1 }
  0xfa   :  { %13401 = vst [vmem:[#allocation9_spill] sm:$0xff] %v10149_v39  ;;  %v10151_v43 = vpop.f32.mrf.mxu0 }
  0xfb   :  { %v8748_v44 = vpop.f32.mrf.mxu1 }
  0xfc   :  { %v8695_v49 = vpop.f32.mrf.mxu0 }
  0xfd   :  { %v10156_v53 = vadd.f32 %v8745_v34, %v8695_v49  ;;  %v10158_v54 = vpop.f32.mrf.mxu1 }
  0xfe   :  { %13402 = vst [vmem:[#allocation10_spill] sm:$0xff] %v10158_v54  ;;  %v10160_v58 = vpop.f32.mrf.mxu0 }
  0xff   :  { %13403 = vst [vmem:[#allocation11_spill] sm:$0xff] %v10160_v58  ;;  %v10162_v59 = vpop.f32.mrf.mxu1 }
 0x100   :  { %v8698_v63 = vpop.f32.mrf.mxu0 }
 0x101   :  { %v10164_v0 = vadd.f32 %v8748_v44, %v8698_v63  ;;  %v10166_v4 = vpop.f32.mrf.mxu1 }
 0x102   :  { %v10168_v5 = vpop.f32.mrf.mxu0 }
 0x103   :  { %13404 = vst [vmem:[#allocation12_spill] sm:$0xff] %v10168_v5  ;;  %v10170_v9 = vpop.f32.mrf.mxu1 }
 0x104   :  { %v8703_v10 = vpop.f32.mrf.mxu0 }
 0x105   :  { %v10173_v14 = vadd.f32 %v8703_v10, %v10065_v36  ;;  %v10175_v15 = vpop.f32.mrf.mxu1 }
 0x106   :  { %v10177_v19 = vpop.f32.mrf.mxu0 }
 0x107   :  { %v10179_v20 = vpop.f32.mrf.mxu1 }
 0x108   :  { %13405 = vst [vmem:[#allocation13_spill] sm:$0xff] %v10179_v20  ;;  %v8706_v24 = vpop.f32.mrf.mxu0 }
 0x109   :  { %v616_v25 = vadd.f32 %v8706_v24, %v10074_v40  ;;  %v10182_v29 = vpop.f32.mrf.mxu1 }
 0x10a   :  { %v10184_v30 = vpop.f32.mrf.mxu0 }
 0x10b   :  { %v10188_v35 = vpop.f32.mrf.mxu1 }
 0x10c   :  { %v10186_v34 = vpop.f32.mrf.mxu0  ;;  %13406 = vst [vmem:[#allocation14_spill] sm:$0xff] %v10188_v35 }
 0x10d   :  { %v10192_v48 = vpop.f32.mrf.mxu1 }
 0x10e   :  { %v10190_v44 = vpop.f32.mrf.mxu0  ;;  %13407 = vst [vmem:[#allocation15_spill] sm:$0xff] %v10192_v48 }
 0x10f   :  { %v10198_v54 = vpop.f32.mrf.mxu1 }
 0x110   :  { %v8756_v36 = vpop.f32.mrf.mxu0  ;;  %13408 = vst [vmem:[#allocation16_spill] sm:$0xff] %v10198_v54 }
 0x111   :  { %v10194_v49 = vadd.f32 %v8756_v36, %v616_v25  ;;  %v10205_v39 = vpop.f32.mrf.mxu1 }
 0x112   :  { %v10196_v63 = vpop.f32.mrf.mxu0  ;;  %13410 = vst [vmem:[#allocation18_spill] sm:$0xff] %v10205_v39  ;;  %v13396_v39 = vmov 0.0  }
 0x113   :  { %v10212_v36 = vpop.f32.mrf.mxu1  ;;  %2574 = vst.msk [vmem:[#allocation2] sm:$0x1] %vm2573_vm2, %v13396_v39  ;;  %2575 = vst.msk [vmem:[#allocation2 + $0x48] sm:$0x1] %vm2573_vm2, %v13396_v39 }
 0x114   :  { %v8759_v10 = vpop.f32.mrf.mxu0  ;;  %13412 = vst [vmem:[#allocation20_spill] sm:$0xff] %v10212_v36  ;;  %3240 = vst.msk [vmem:[#allocation2 + $0x41] sm:$0x1] %vm2573_vm2, %v13396_v39 }
 0x115   :  { %v10201_v40 = vadd.f32 %v8759_v10, %v10081_v45  ;;  %v10219_v10 = vpop.f32.mrf.mxu1  ;;  %3241 = vst.msk [vmem:[#allocation2 + $0x89] sm:$0x1] %vm2573_vm2, %v13396_v39  ;;  %3242 = vst.msk [vmem:[#allocation3] sm:$0x1] %vm2573_vm2, %v13396_v39 }
 0x116   :  { %v10203_v24 = vpop.f32.mrf.mxu0  ;;  %13414 = vst [vmem:[#allocation22_spill] sm:$0xff] %v10219_v10  ;;  %3243 = vst.msk [vmem:[#allocation3 + $0x48] sm:$0x1] %vm2573_vm2, %v13396_v39 }
 0x117   :  { %13409 = vst [vmem:[#allocation17_spill] sm:$0xff] %v10201_v40  ;;  %6930 = vst [vmem:[#allocation6] sm:$0x1] %v13396_v39 }
 0x118   :  { %v8762_v5 = vpop.f32.mrf.mxu0  ;;  %6931 = vst [vmem:[#allocation6 + $0x18] sm:$0x1] %v13396_v39  ;;  %7096 = vst [vmem:[#allocation6 + $0x11] sm:$0x1] %v13396_v39 }
 0x119   :  { %v10208_v35 = vadd.f32 %v8762_v5, %v10087_v50  ;;  %7097 = vst [vmem:[#allocation6 + $0x29] sm:$0x1] %v13396_v39  ;;  %7098 = vst [vmem:[#allocation7] sm:$0x1] %v13396_v39  ;;  %v10247_v5 = vpop.f32.mrf.mxu1 }
 0x11a   :  { %v10210_v58 = vpop.f32.mrf.mxu0  ;;  %7099 = vst [vmem:[#allocation7 + $0x18] sm:$0x1] %v13396_v39  ;;  %13416 = vst [vmem:[#allocation24_spill] sm:$0xff] %v10247_v5 }
 0x11b   :  { %13411 = vst [vmem:[#allocation19_spill] sm:$0xff] %v10208_v35  ;;  %v10254_v36 = vpop.f32.mrf.mxu1 }
 0x11c   :  { %v8765_v25 = vpop.f32.mrf.mxu0  ;;  %13417 = vst [vmem:[#allocation25_spill] sm:$0xff] %v10254_v36 }
 0x11d   :  { %v10215_v48 = vadd.f32 %v8765_v25, %v10093_v55  ;;  %v3943_v55 = vld [vmem:[%s13386_s4 + $0x30] sm:$0xff] }
 0x11e   :  { %v10217_v54 = vpop.f32.mrf.mxu0  ;;  %8901 = vmatprep.subr.mxu1 %v3943_v55 }
 0x11f   :  { %13413 = vst [vmem:[#allocation21_spill] sm:$0xff] %v10215_v48  ;;  %8902 = vmatpush3.msra.mxu1 %v3943_v55  ;;  %v10261_v48 = vpop.f32.mrf.mxu1 }
 0x120   :  { %v8768_v45 = vpop.f32.mrf.mxu0  ;;  %13419 = vst [vmem:[#allocation27_spill] sm:$0xff] %v10261_v48 }
 0x121   :  { %v10222_v20 = vadd.f32 %v8768_v45, %v10099_v60 }
 0x122   :  { %v10242_v50 = vpop.f32.mrf.mxu0 }
 0x123   :  { %13415 = vst [vmem:[#allocation23_spill] sm:$0xff] %v10222_v20 }
 0x124   :  { %v8771_v60 = vpop.f32.mrf.mxu0 }
 0x125   :  { %v10250_v25 = vadd.f32 %v8771_v60, %v10105_v1  ;;  %v10268_v1 = vpop.f32.mrf.mxu1 }
 0x126   :  { %v10252_v45 = vpop.f32.mrf.mxu0 }
 0x128   :  { %v8774_v10 = vpop.f32.mrf.mxu0 }
 0x129   :  { %v10257_v39 = vadd.f32 %v8774_v10, %v10111_v6  ;;  %v10275_v6 = vpop.f32.mrf.mxu1 }
 0x12a   :  { %v10259_v20 = vpop.f32.mrf.mxu0 }
 0x12b   :  { %13418 = vst [vmem:[#allocation26_spill] sm:$0xff] %v10257_v39 }
 0x12c   :  { %v8777_v35 = vpop.f32.mrf.mxu0 }
 0x12d   :  { %v10264_v5 = vadd.f32 %v8777_v35, %v10117_v11  ;;  %v4350_v11 = vld [vmem:[%s13386_s4 + $0x58] sm:$0xff]  ;;  %v10285_v35 = vpop.f32.mrf.mxu1 }
 0x12e   :  { %v10266_v40 = vpop.f32.mrf.mxu0  ;;  %13423 = vst [vmem:[#allocation31_spill] sm:$0xff] %v10285_v35  ;;  %8963 = vmatprep.subr.mxu0 %v4350_v11 }
 0x12f   :  { %13420 = vst [vmem:[#allocation28_spill] sm:$0xff] %v10264_v5  ;;  %8964 = vmatpush3.msra.mxu0 %v4350_v11  ;;  %v4348_v11 = vld [vmem:[%s13386_s4 + $0x48] sm:$0xff] }
 0x130   :  { %v8780_v55 = vpop.f32.mrf.mxu0 }
 0x131   :  { %v10271_v60 = vadd.f32 %v8780_v55, %v10123_v16 }
 0x132   :  { %v10273_v36 = vpop.f32.mrf.mxu0 }
 0x133   :  { %13421 = vst [vmem:[#allocation29_spill] sm:$0xff] %v10271_v60 }
 0x134   :  { %v8783_v10 = vpop.f32.mrf.mxu0 }
 0x135   :  { %v10278_v39 = vadd.f32 %v8783_v10, %v10129_v21  ;;  %v4349_v21 = vld [vmem:[%s13386_s4 + $0x50] sm:$0xff]  ;;  %v3942_v10 = vld [vmem:[%s13386_s4 + $0x28] sm:$0xff] }
 0x136   :  { %v10280_v48 = vpop.f32.mrf.mxu0  ;;  %8965 = vmatprep.subr.mxu0 %v4349_v21  ;;  %8903 = vmatprep.subr.mxu1 %v3942_v10 }
 0x137   :  { %13422 = vst [vmem:[#allocation30_spill] sm:$0xff] %v10278_v39  ;;  %v10298_v39 = vpop.f32.mrf.mxu1  ;;  %8966 = vmatpush3.msra.mxu0 %v4349_v21  ;;  %8904 = vmatpush3.msra.mxu1 %v3942_v10 }
 0x138   :  { %v8786_v5 = vpop.f32.mrf.mxu0  ;;  %13425 = vst [vmem:[#allocation33_spill] sm:$0xff] %v10298_v39  ;;  %8967 = vmatprep.subr.mxu0 %v4348_v11 }
 0x139   :  { %v10288_v16 = vadd.f32 %v8786_v5, %v10135_v26  ;;  %v10311_v35 = vpop.f32.mrf.mxu1  ;;  %8968 = vmatpush3.msra.mxu0 %v4348_v11 }
 0x13a   :  { %v10290_v55 = vpop.f32.mrf.mxu0  ;;  %13428 = vst [vmem:[#allocation36_spill] sm:$0xff] %v10311_v35 }
 0x13b   :  { %13424 = vst [vmem:[#allocation32_spill] sm:$0xff] %v10288_v16  ;;  %v3941_v16 = vld [vmem:[%s13386_s4 + $0x20] sm:$0xff]  ;;  %v10318_v21 = vpop.f32.mrf.mxu1 }
 0x13c   :  { %v8789_v60 = vpop.f32.mrf.mxu0  ;;  %8905 = vmatprep.subr.mxu1 %v3941_v16  ;;  %13430 = vst [vmem:[#allocation38_spill] sm:$0xff] %v10318_v21 }
 0x13d   :  { %v10301_v26 = vadd.f32 %v8789_v60, %v10141_v31  ;;  %8906 = vmatpush3.msra.mxu1 %v3941_v16  ;;  %v10332_v16 = vpop.f32.mrf.mxu1 }
 0x13e   :  { %v10303_v5 = vpop.f32.mrf.mxu0 }
 0x13f   :  { %13426 = vst [vmem:[#allocation34_spill] sm:$0xff] %v10301_v26  ;;  %13427 = vst [vmem:[#allocation35_spill] sm:$0xff] %v10303_v5  ;;  %v4347_v26 = vld [vmem:[%s13386_s4 + $0x40] sm:$0xff] }
 0x140   :  { %v8792_v39 = vpop.f32.mrf.mxu0  ;;  %8969 = vmatprep.subr.mxu0 %v4347_v26 }
 0x141   :  { %v10314_v31 = vadd.f32 %v8792_v39, %v10147_v37  ;;  %8970 = vmatpush3.msra.mxu0 %v4347_v26  ;;  %v601_v37 = vadd.f32 %v10177_v19, %v10072_v38  ;;  %v1117_v39 = vadd.f32 %v10186_v34, %v10173_v14  ;;  %v10348_v14 = vld [vmem:[%s13387_s3] ss:$0 sm:$0xff]  ;;  %v9334_v19 = vmov 1983009808  }
 0x142   :  { %v10316_v60 = vpop.f32.mrf.mxu0  ;;  %v2031_v34 = vunpack.c.l.s4 %v9334_v19 }
 0x143   :  { %13429 = vst [vmem:[#allocation37_spill] sm:$0xff] %v10314_v31  ;;  %v1116_v31 = vadd.f32 %v10190_v44, %v601_v37  ;;  %v1506_v26 = vadd.f32 %v10162_v59, %v1117_v39  ;;  %v13398_v44 = vlaneseq }
 0x144   :  { %v8795_v10 = vpop.f32.mrf.mxu0 }
 0x145   :  { %v10324_v5 = vadd.f32 %v8795_v10, %v10156_v53  ;;  %v611_v10 = vadd.f32 %v10184_v30, %v10079_v42  ;;  %v1508_v42 = vadd.f32 %v10170_v9, %v10194_v49 }
 0x146   :  { %v10326_v35 = vpop.f32.mrf.mxu0 }
 0x147   :  { %13431 = vst [vmem:[#allocation39_spill] sm:$0xff] %v10324_v5  ;;  %13432 = vst [vmem:[#allocation40_spill] sm:$0xff] %v10326_v35  ;;  %v10343_v5 = vpop.f32.mrf.mxu1  ;;  %v1118_v37 = vadd.f32 %v10196_v63, %v611_v10  ;;  %v10358_v35 = vshrl.u32 %v13398_v44, 7 }
 0x148   :  { %v8798_v11 = vpop.f32.mrf.mxu0  ;;  %13435 = vst [vmem:[#allocation43_spill] sm:$0xff] %v10343_v5 }
 0x149   :  { %v10336_v21 = vadd.f32 %v8798_v11, %v10164_v0  ;;  %v1505_v0 = vadd.f32 %v10166_v4, %v1116_v31  ;;  %v10355_v39 = vpop.f32.mrf.mxu1  ;;  %13436 = vst [vmem:[#allocation44_spill] sm:$0xff] %v10358_v35  ;;  %v1507_v5 = vadd.f32 %v10175_v15, %v1118_v37  ;;  %v621_v31 = vadd.f32 %v10077_v41, %v10085_v47 }
 0x14a   :  { %v10338_v53 = vpop.f32.mrf.mxu0  ;;  %v631_v15 = vadd.f32 %v10083_v46, %v10091_v52  ;;  %v661_v47 = vadd.f32 %v10101_v61, %v10109_v3  ;;  %v701_v61 = vadd.f32 %v10125_v17, %v10133_v23  ;;  %v13437_v17 = vld [vmem:[#allocation17_spill] sm:$0xff] }
 0x14b   :  { %13433 = vst [vmem:[#allocation41_spill] sm:$0xff] %v10336_v21  ;;  %13434 = vst [vmem:[#allocation42_spill] sm:$0xff] %v10338_v53  ;;  %v2032_v53 = vunpack.c.0.s8 %v2031_v34  ;;  %v1120_v10 = vadd.f32 %v10203_v24, %v621_v31  ;;  %v641_v34 = vadd.f32 %v10089_v51, %v10097_v57  ;;  %v10380_v24 = vsub.s32 0, %v10358_v35 }
 0x14c   :  { %v8853_v38 = vpop.f32.mrf.mxu0  ;;  %v671_v51 = vadd.f32 %v10107_v2, %v10115_v8  ;;  %v691_v57 = vadd.f32 %v10119_v12, %v10127_v18  ;;  %v731_v8 = vadd.f32 %v10143_v32, %v10151_v43  ;;  %v13438_v18 = vld [vmem:[#allocation13_spill] sm:$0xff]  ;;  %v1128_v23 = vadd.f32 %v10252_v45, %v661_v47  ;;  %v13443_v32 = vld [vmem:[#allocation19_spill] sm:$0xff]  ;;  %v13444_v43 = vld [vmem:[#allocation14_spill] sm:$0xff] }
 0x14d   :  { %v1895_v11 = vadd.f32 %v8853_v38, %v1506_v26  ;;  %v10366_v26 = vpop.f32.mrf.mxu1  ;;  %v10375_v41 = vsub.s32 %v2032_v53, %v10358_v35  ;;  %v1509_v3 = vadd.f32 %v10182_v29, %v1120_v10  ;;  %v1122_v53 = vadd.f32 %v10210_v58, %v631_v15  ;;  %v13439_v29 = vld [vmem:[#allocation11_spill] sm:$0xff]  ;;  %v13448_v10 = vld [vmem:[#allocation18_spill] sm:$0xff] }
 0x14e   :  { %v1735_v21 = vpop.f32.mrf.mxu0  ;;  %v1124_v12 = vadd.f32 %v10217_v54, %v641_v34  ;;  %v1512_v54 = vadd.f32 %v13444_v43, %v13443_v32  ;;  %v13449_v34 = vld [vmem:[#allocation23_spill] sm:$0xff]  ;;  %v13459_v32 = vld [vmem:[#allocation33_spill] sm:$0xff] }
 0x14f   :  { %v1934_v59 = vadd.f32 %v10348_v14, %v1895_v11  ;;  %v1894_v30 = vadd.f32 %v1735_v21, %v1505_v0  ;;  %v651_v0 = vadd.f32 %v10095_v56, %v10103_v62  ;;  %v681_v56 = vadd.f32 %v10113_v7, %v10121_v13  ;;  %v10398_v37 = vpop.f32.mrf.mxu1  ;;  %v13440_v11 = vld [vmem:[#allocation9_spill] sm:$0xff] }
 0x150   :  { %v8856_v19 = vpop.f32.mrf.mxu0  ;;  %v711_v62 = vadd.f32 %v10131_v22, %v10139_v28  ;;  %v721_v7 = vadd.f32 %v10137_v27, %v10145_v33  ;;  %v1510_v22 = vadd.f32 %v13438_v18, %v13437_v17  ;;  %v13442_v27 = vld [vmem:[#allocation10_spill] sm:$0xff]  ;;  %v1513_v15 = vadd.f32 %v13448_v10, %v1124_v12  ;;  %v13455_v17 = vld [vmem:[#allocation27_spill] sm:$0xff] }
 0x151   :  { %9203 = vtanh.f32 %v1934_v59  ;;  %v1933_v4 = vadd.f32 %v10348_v14, %v1894_v30  ;;  %v1897_v63 = vadd.f32 %v8856_v19, %v1508_v42  ;;  %v1126_v13 = vadd.f32 %v10242_v50, %v651_v0  ;;  %v13441_v59 = vld [vmem:[#allocation12_spill] sm:$0xff]  ;;  %v13445_v30 = vld [vmem:[#allocation15_spill] sm:$0xff] }
 0x152   :  { %v1745_v9 = vpop.f32.mrf.mxu0  ;;  %v741_v42 = vadd.f32 %v13440_v11, %v13439_v29  ;;  %v10413_v33 = vadd.f32 %v13442_v27, %v13441_v59  ;;  %v1130_v50 = vadd.f32 %v10259_v20, %v671_v51  ;;  %v1511_v19 = vadd.f32 %v13445_v30, %v1122_v53  ;;  %v13450_v0 = vld [vmem:[#allocation20_spill] sm:$0xff]  ;;  %v13457_v11 = vld [vmem:[#allocation31_spill] sm:$0xff]  ;;  %v13458_v27 = vld [vmem:[#allocation29_spill] sm:$0xff] }
 0x153   :  { %9205 = vtanh.f32 %v1933_v4  ;;  %v1936_v49 = vadd.f32 %v10348_v14, %v1897_v63  ;;  %v1896_v21 = vadd.f32 %v1745_v9, %v1507_v5  ;;  %v10383_v5 = vsub.s32 1, %v10358_v35  ;;  %v13446_v4 = vld [vmem:[#allocation21_spill] sm:$0xff]  ;;  %v13447_v63 = vld [vmem:[#allocation16_spill] sm:$0xff]  ;;  %v8842_v9 = vpop.f32.mrf.mxu1 }
 0x154   :  { %v8859_v38 = vpop.f32.mrf.mxu0  ;;  %v1514_v45 = vadd.f32 %v13447_v63, %v13446_v4  ;;  %v1132_v31 = vadd.f32 %v10266_v40, %v681_v56  ;;  %v10425_v47 = vadd.f32 %v13450_v0, %v13449_v34  ;;  %v1134_v20 = vadd.f32 %v10273_v36, %v691_v57  ;;  %v13453_v40 = vld [vmem:[#allocation25_spill] sm:$0xff]  ;;  %v13456_v29 = vld [vmem:[#allocation28_spill] sm:$0xff]  ;;  %v13462_v0 = vld [vmem:[#allocation30_spill] sm:$0xff] }
 0x155   :  { %v1935_v46 = vadd.f32 %v10348_v14, %v1896_v21  ;;  %9207 = vtanh.f32 %v1936_v49  ;;  %v1899_v49 = vadd.f32 %v8859_v38, %v1510_v22  ;;  %v10436_v56 = vadd.f32 %v13453_v40, %v1128_v23  ;;  %v13454_v38 = vld [vmem:[#allocation26_spill] sm:$0xff] }
 0x156   :  { %v1755_v52 = vpop.f32.mrf.mxu0  ;;  %v10440_v12 = vadd.f32 %v13455_v17, %v13454_v38  ;;  %v10448_v36 = vadd.f32 %v10275_v6, %v13456_v29  ;;  %v1138_v57 = vadd.f32 %v10290_v55, %v711_v62  ;;  %v10453_v59 = vadd.f32 %v13457_v11, %v1132_v31  ;;  %v13460_v6 = vld [vmem:[#allocation36_spill] sm:$0xff]  ;;  %v13468_v38 = vld [vmem:[#allocation34_spill] sm:$0xff] }
 0x157   :  { %9209 = vtanh.f32 %v1935_v46  ;;  %v1898_v28 = vadd.f32 %v1755_v52, %v1509_v3  ;;  %v13451_v46 = vld [vmem:[#allocation22_spill] sm:$0xff]  ;;  %v13452_v3 = vld [vmem:[#allocation24_spill] sm:$0xff]  ;;  %v10457_v43 = vadd.f32 %v13459_v32, %v13458_v27  ;;  %v10463_v4 = vadd.f32 %v13460_v6, %v1134_v20  ;;  %v13465_v20 = vld [vmem:[#allocation43_spill] sm:$0xff] }
 0x158   :  { %v8862_v2 = vpop.f32.mrf.mxu0  ;;  %v10428_v52 = vadd.f32 %v13451_v46, %v1126_v13  ;;  %v10433_v53 = vadd.f32 %v13452_v3, %v10250_v25  ;;  %v10444_v13 = vadd.f32 %v10268_v1, %v1130_v50  ;;  %v1136_v25 = vadd.f32 %v10280_v48, %v701_v61  ;;  %v13461_v48 = vld [vmem:[#allocation35_spill] sm:$0xff]  ;;  %v13464_v46 = vld [vmem:[#allocation32_spill] sm:$0xff] }
 0x159   :  { %v1937_v18 = vadd.f32 %v10348_v14, %v1898_v28  ;;  %v1476_v28 = vpop.f32.mrf.mxu1  ;;  %v1938_v1 = vadd.f32 %v10348_v14, %v1899_v49  ;;  %v1901_v50 = vadd.f32 %v8862_v2, %v1512_v54  ;;  %v1140_v55 = vadd.f32 %v13461_v48, %v721_v7  ;;  %v13463_v49 = vld [vmem:[#allocation38_spill] sm:$0xff]  ;;  %v13476_v27 = vld [vmem:[#allocation39_spill] sm:$0xff] }
 0x15a   :  { %v1765_v58 = vpop.f32.mrf.mxu0  ;;  %v1142_v63 = vadd.f32 %v10316_v60, %v731_v8  ;;  %v10472_v2 = vadd.f32 %v13463_v49, %v13462_v0  ;;  %v10475_v54 = vadd.f32 %v10332_v16, %v1136_v25  ;;  %v10479_v7 = vadd.f32 %v13465_v20, %v13464_v46  ;;  %v13471_v25 = vld [vmem:[#allocation37_spill] sm:$0xff] }
 0x15b   :  { %v1900_v62 = vadd.f32 %v1765_v58, %v1511_v19  ;;  %9211 = vtanh.f32 %v1937_v18  ;;  %v10482_v58 = vadd.f32 %v10355_v39, %v1138_v57  ;;  %v8845_v8 = vpop.f32.mrf.mxu1  ;;  %v1940_v3 = vadd.f32 %v10348_v14, %v1901_v50 }
 0x15c   :  { %v8865_v21 = vpop.f32.mrf.mxu0  ;;  %13466 = vst [vmem:[#allocation17_spill] sm:$0xff] %v10479_v7  ;;  %9213 = vtanh.f32 %v1938_v1  ;;  %v10487_v17 = vadd.f32 %v10366_v26, %v13468_v38  ;;  %v10497_v29 = vadd.f32 %v10398_v37, %v1140_v55  ;;  %v10500_v57 = vadd.f32 %v8842_v9, %v13471_v25  ;;  %v13478_v9 = vld [vmem:[#allocation42_spill] sm:$0xff] }
 0x15d   :  { %13467 = vst [vmem:[#allocation13_spill] sm:$0xff] %v10482_v58  ;;  %v1903_v40 = vadd.f32 %v8865_v21, %v1514_v45  ;;  %v1939_v39 = vadd.f32 %v10348_v14, %v1900_v62  ;;  %v10513_v32 = vadd.f32 %v8845_v8, %v13476_v27  ;;  %v10518_v50 = vadd.f32 %v13478_v9, %v10413_v33 }
 0x15e   :  { %v9204_v51 = vpop.eup %9203  ;;  %v1775_v22 = vpop.f32.mrf.mxu0  ;;  %13469 = vst [vmem:[#allocation11_spill] sm:$0xff] %v10487_v17  ;;  %13470 = vst [vmem:[#allocation9_spill] sm:$0xff] %v10497_v29  ;;  %9215 = vtanh.f32 %v1940_v3 }
 0x15f   :  { %v2046_v61 = vcombine.high %v9204_v51, %v9204_v51  ;;  %v10490_v16 = vrot.slane %v9204_v51, %v10375_v41  ;;  %13472 = vst [vmem:[#allocation12_spill] sm:$0xff] %v10500_v57  ;;  %v13474_v51 = vld [vmem:[#allocation40_spill] sm:$0xff]  ;;  %13477 = vst [vmem:[#allocation14_spill] sm:$0xff] %v10513_v32  ;;  %v1902_v6 = vadd.f32 %v1775_v22, %v1513_v15  ;;  %9217 = vtanh.f32 %v1939_v39 }
 0x160   :  { %v9206_v23 = vpop.eup %9205  ;;  %v10460_v30 = vpop.f32.mrf.mxu0  ;;  %v10510_v11 = vadd.f32 %v13474_v51, %v741_v42  ;;  %13479 = vst [vmem:[#allocation15_spill] sm:$0xff] %v10518_v50 }
 0x161   :  { %v2029_v31 = vcombine.high %v9206_v23, %v9206_v23  ;;  %v2036_v10 = vrot.slane %v9206_v23, %v10375_v41  ;;  %v10493_v18 = vrot.slane %v2046_v61, %v10375_v41  ;;  %v10502_v23 = vadd.f32 %v1476_v28, %v1142_v63 }
 0x162   :  { %v10468_v34 = vpop.f32.mrf.mxu0  ;;  %v9208_v60 = vpop.eup %9207  ;;  %13475 = vst [vmem:[#allocation19_spill] sm:$0xff] %v10510_v11  ;;  %v1942_v28 = vadd.f32 %v10348_v14, %v1903_v40  ;;  %v10523_v48 = vcombine.high %v10490_v16, %v10490_v16  ;;  %v10550_v8 = vadd.f32 %v10348_v14, %v1902_v6 }
 0x163   :  { %v2044_v19 = vcombine.high %v2036_v10, %v2036_v10  ;;  %13473 = vst [vmem:[#allocation10_spill] sm:$0xff] %v10502_v23  ;;  %v10505_v45 = vrot.slane %v2029_v31, %v10375_v41  ;;  %v2080_v1 = vcombine.high %v9208_v60, %v9208_v60  ;;  %v10527_v42 = vcombine.high %v10493_v18, %v10493_v18 }
 0x164   :  { %v10507_v26 = vpop.f32.mrf.mxu0  ;;  %v9210_v21 = vpop.eup %9209  ;;  %v2579_v55 = vrot.slane %v2036_v10, %v10380_v24  ;;  %v2087_v0 = vrot.slane %v9208_v60, %v10375_v41  ;;  %v3247_v20 = vrot.slane %v2036_v10, %v10383_v5  ;;  %9219 = vtanh.f32 %v1942_v28 }
 0x165   :  { %v2583_v37 = vrot.slane %v2044_v19, %v10380_v24  ;;  %v10532_v61 = vcombine.high %v10505_v45, %v10505_v45  ;;  %v2587_v33 = vrot.slane %v10505_v45, %v10380_v24  ;;  %v3251_v15 = vrot.slane %v2044_v19, %v10383_v5 }
 0x166   :  { %v2063_v22 = vcombine.high %v9210_v21, %v9210_v21  ;;  %v10537_v62 = vpop.f32.mrf.mxu0  ;;  %v10544_v49 = vrot.slane %v2080_v1, %v10375_v41  ;;  %v3275_v3 = vrot.slane %v10527_v42, %v10383_v5  ;;  %v2070_v40 = vrot.slane %v9210_v21, %v10375_v41 }
 0x167   :  { %v3089_v31 = vsel %vm3088_vm3, %v2583_v37, %v2579_v55  ;;  %v10565_v39 = vsel %vm3090_vm4, %v3251_v15, %v3247_v20  ;;  %v2095_v37 = vcombine.high %v2087_v0, %v2087_v0  ;;  %v2627_v28 = vrot.slane %v2087_v0, %v10380_v24 }
 0x168   :  { %v10562_v10 = vsel %vm3090_vm4, %v2587_v33, %v3089_v31  ;;  %v2077_v25 = vrot.slane %v2063_v22, %v10375_v41  ;;  %v10568_v51 = vpop.f32.mrf.mxu0  ;;  %v9212_v27 = vpop.eup %9211  ;;  %v10572_v1 = vcombine.high %v10544_v49, %v10544_v49  ;;  %v2078_v21 = vcombine.high %v2070_v40, %v2070_v40 }
 0x169   :  { %v3279_v9 = vrot.slane %v2070_v40, %v10383_v5  ;;  %v9214_v15 = vpop.eup %9213  ;;  %v2611_v22 = vrot.slane %v2070_v40, %v10380_v24  ;;  %v2635_v19 = vrot.slane %v10544_v49, %v10380_v24  ;;  %v2097_v60 = vcombine.high %v9212_v27, %v9212_v27 }
 0x16a   :  { %v2079_v6 = vcombine.high %v2077_v25, %v2077_v25  ;;  %v2619_v55 = vrot.slane %v2077_v25, %v10380_v24  ;;  %v3287_v33 = vrot.slane %v2077_v25, %v10383_v5  ;;  %v2615_v31 = vrot.slane %v2078_v21, %v10380_v24  ;;  %v10586_v38 = vpop.f32.mrf.mxu0 }
 0x16b   :  { %v3283_v20 = vrot.slane %v2078_v21, %v10383_v5  ;;  %v3762_v44 = vsel %vm3088_vm3, %v3279_v9, %v3275_v3  ;;  %v2631_v25 = vrot.slane %v2095_v37, %v10380_v24  ;;  %v2104_v21 = vrot.slane %v9212_v27, %v10375_v41  ;;  %v10595_v11 = vpop.eup %9215 }
 0x16c   :  { %v2623_v46 = vrot.slane %v2079_v6, %v10380_v24  ;;  %v3291_v63 = vrot.slane %v2079_v6, %v10383_v5  ;;  %v3102_v40 = vsel %vm3088_vm3, %v2615_v31, %v2611_v22  ;;  %v3295_v3 = vrot.slane %v2087_v0, %v10383_v5  ;;  %v9218_v31 = vpop.eup %9217 }
 0x16d   :  { %v3763_v35 = vsel %vm3090_vm4, %v3283_v20, %v3762_v44  ;;  %v3103_v9 = vsel %vm3090_vm4, %v2619_v55, %v3102_v40  ;;  %v2114_v32 = vcombine.high %v9214_v15, %v9214_v15  ;;  %v3299_v6 = vrot.slane %v2095_v37, %v10383_v5 }
 0x16e   :  { %v3764_v50 = vsel %vm3092_vm5, %v3287_v33, %v3763_v35  ;;  %v3303_v23 = vrot.slane %v10544_v49, %v10383_v5  ;;  %v3104_v22 = vsel %vm3092_vm5, %v2623_v46, %v3103_v9  ;;  %v10605_v55 = vrot.slane %v9214_v15, %v10375_v41  ;;  %v10608_v33 = vpop.f32.mrf.mxu0 }
 0x16f   :  { %v3765_v44 = vsel %vm3094_vm6, %v3291_v63, %v3764_v50  ;;  %v3105_v27 = vsel %vm3094_vm6, %v2627_v28, %v3104_v22  ;;  %v2111_v35 = vrot.slane %v2097_v60, %v10375_v41  ;;  %v2639_v37 = vrot.slane %v10572_v1, %v10380_v24 }
 0x170   :  { %v3766_v0 = vsel %vm3096_vm7, %v3295_v3, %v3765_v44  ;;  %v3106_v49 = vsel %vm3096_vm7, %v2631_v25, %v3105_v27  ;;  %v2112_v50 = vcombine.high %v2104_v21, %v2104_v21  ;;  %v10617_v20 = vrot.slane %v2114_v32, %v10375_v41 }
 0x171   :  { %v3767_v46 = vsel %vm3098_vm8, %v3299_v6, %v3766_v0  ;;  %v3107_v63 = vsel %vm3098_vm8, %v2635_v19, %v3106_v49  ;;  %v2113_v15 = vcombine.high %v2111_v35, %v2111_v35  ;;  %v10619_v40 = vpop.eup %9219  ;;  %v3307_v60 = vrot.slane %v10572_v1, %v10383_v5  ;;  %v10635_v6 = vpop.f32.mrf.mxu0 }
 0x172   :  { %v3768_v28 = vsel %vm3100_vm9, %v3303_v23, %v3767_v46  ;;  %v3108_v3 = vsel %vm3100_vm9, %v2639_v37, %v3107_v63  ;;  %v3311_v25 = vrot.slane %v2104_v21, %v10383_v5  ;;  %v3315_v9 = vrot.slane %v2112_v50, %v10383_v5 }
 0x173   :  { %3886 = vst.msk [vmem:[#allocation3 + $0x8] sm:$0xff] %vm3223_vm10, %v3768_v28  ;;  %3225 = vst.msk [vmem:[#allocation2 + $0x9] sm:$0xff] %vm3223_vm10, %v3108_v3  ;;  %v10630_v23 = vcombine.high %v10605_v55, %v10605_v55  ;;  %v2647_v32 = vrot.slane %v2112_v50, %v10380_v24  ;;  %v3319_v19 = vrot.slane %v2111_v35, %v10383_v5  ;;  %9221 = vtanh.f32 %v10550_v8 }
 0x174   :  { %v3323_v1 = vrot.slane %v2113_v15, %v10383_v5  ;;  %v13480_v22 = vrot.slane %v10532_v61, %v10380_v24  ;;  %v3259_v27 = vrot.slane %v10532_v61, %v10383_v5  ;;  %v13481_v0 = vrot.slane %v10505_v45, %v10383_v5 }
 0x175   :  { %v3769_v49 = vsel %vm3088_vm3, %v3311_v25, %v3307_v60  ;;  %v10652_v46 = vcombine.high %v10617_v20, %v10617_v20  ;;  %v3327_v50 = vrot.slane %v10605_v55, %v10383_v5  ;;  %v2651_v61 = vrot.slane %v2111_v35, %v10380_v24 }
 0x176   :  { %v3093_v44 = vsel %vm3092_vm5, %v13480_v22, %v10562_v10  ;;  %v3757_v37 = vsel %vm3092_vm5, %v13481_v0, %v10565_v39  ;;  %v2643_v10 = vrot.slane %v2104_v21, %v10380_v24  ;;  %v3770_v63 = vsel %vm3090_vm4, %v3315_v9, %v3769_v49  ;;  %v10667_v21 = vpop.f32.mrf.mxu0 }
 0x177   :  { %v3771_v28 = vsel %vm3092_vm5, %v3319_v19, %v3770_v63  ;;  %v2131_v45 = vcombine.high %v9218_v31, %v9218_v31  ;;  %v2138_v39 = vrot.slane %v9218_v31, %v10375_v41  ;;  %v3331_v60 = vrot.slane %v10630_v23, %v10383_v5 }
 0x178   :  { %v3109_v3 = vsel %vm3088_vm3, %v2647_v32, %v2643_v10  ;;  %v3772_v25 = vsel %vm3094_vm6, %v3323_v1, %v3771_v28  ;;  %v2155_v22 = vrot.slane %v10595_v11, %v10375_v41  ;;  %v2603_v35 = vrot.slane %v10493_v18, %v10380_v24 }
 0x179   :  { %v3267_v9 = vrot.slane %v10523_v48, %v10383_v5  ;;  %v3758_v31 = vsel %vm3094_vm6, %v3259_v27, %v3757_v37  ;;  %v3773_v19 = vsel %vm3096_vm7, %v3327_v50, %v3772_v25  ;;  %v13482_v32 = vrot.slane %v10490_v16, %v10380_v24  ;;  %v10693_v25 = vpop.f32.mrf.mxu0 }
 0x17a   :  { %v2655_v0 = vrot.slane %v2113_v15, %v10380_v24  ;;  %v10681_v49 = vsel %vm3098_vm8, %v3331_v60, %v3773_v19  ;;  %v2148_v10 = vcombine.high %v10595_v11, %v10595_v11  ;;  %v2659_v63 = vrot.slane %v10605_v55, %v10380_v24 }
 0x17b   :  { %v3095_v1 = vsel %vm3094_vm6, %v13482_v32, %v3093_v44  ;;  %v3110_v27 = vsel %vm3090_vm4, %v2651_v61, %v3109_v3  ;;  %v2145_v37 = vrot.slane %v2131_v45, %v10375_v41  ;;  %v2146_v50 = vcombine.high %v2138_v39, %v2138_v39 }
 0x17c   :  { %v3339_v28 = vrot.slane %v10652_v46, %v10383_v5  ;;  %v2163_v44 = vcombine.high %v2155_v22, %v2155_v22  ;;  %v2675_v15 = vrot.slane %v2138_v39, %v10380_v24  ;;  %v3343_v60 = vrot.slane %v2138_v39, %v10383_v5 }
 0x17d   :  { %v2147_v19 = vcombine.high %v2145_v37, %v2145_v37  ;;  %v2679_v11 = vrot.slane %v2146_v50, %v10380_v24  ;;  %v2683_v55 = vrot.slane %v2145_v37, %v10380_v24  ;;  %v3347_v61 = vrot.slane %v2146_v50, %v10383_v5 }
 0x17e   :  { %v3111_v45 = vsel %vm3092_vm5, %v2655_v0, %v3110_v27  ;;  %v10700_v3 = vrot.slane %v2148_v10, %v10375_v41  ;;  %v3351_v32 = vrot.slane %v2145_v37, %v10383_v5  ;;  %v3776_v57 = vsel %vm3088_vm3, %v3343_v60, %v3339_v28  ;;  %v10713_v27 = vpop.f32.mrf.mxu0 }
 0x17f   :  { %v2687_v39 = vrot.slane %v2147_v19, %v10380_v24  ;;  %v3116_v29 = vsel %vm3088_vm3, %v2679_v11, %v2675_v15  ;;  %v3355_v17 = vrot.slane %v2147_v19, %v10383_v5  ;;  %v3777_v58 = vsel %vm3090_vm4, %v3347_v61, %v3776_v57 }
 0x180   :  { %v3359_v7 = vrot.slane %v2155_v22, %v10383_v5  ;;  %v3117_v50 = vsel %vm3090_vm4, %v2683_v55, %v3116_v29  ;;  %v3778_v0 = vsel %vm3092_vm5, %v3351_v32, %v3777_v58  ;;  %v2182_v10 = vcombine.high %v10619_v40, %v10619_v40 }
 0x181   :  { %v3271_v37 = vrot.slane %v10493_v18, %v10383_v5  ;;  %v13483_v28 = vrot.slane %v10490_v16, %v10383_v5  ;;  %v3363_v15 = vrot.slane %v2163_v44, %v10383_v5  ;;  %v3779_v29 = vsel %vm3094_vm6, %v3355_v17, %v3778_v0 }
 0x182   :  { %v13484_v58 = vrot.slane %v10523_v48, %v10380_v24  ;;  %v2663_v19 = vrot.slane %v10630_v23, %v10380_v24  ;;  %v3112_v11 = vsel %vm3094_vm6, %v2659_v63, %v3111_v45  ;;  %v3780_v18 = vsel %vm3096_vm7, %v3359_v7, %v3779_v29 }
 0x183   :  { %v3759_v57 = vsel %vm3096_vm7, %v13483_v28, %v3758_v31  ;;  %v2691_v16 = vrot.slane %v2155_v22, %v10380_v24  ;;  %v3118_v31 = vsel %vm3092_vm5, %v2687_v39, %v3117_v50  ;;  %v3781_v55 = vsel %vm3098_vm8, %v3363_v15, %v3780_v18  ;;  %v10748_v22 = vpop.f32.mrf.mxu0 }
 0x184   :  { %v3097_v60 = vsel %vm3096_vm7, %v13484_v58, %v3095_v1  ;;  %v10736_v17 = vrot.slane %v10619_v40, %v10375_v41  ;;  %v10740_v48 = vcombine.high %v10700_v3, %v10700_v3  ;;  %v10743_v23 = vrot.slane %v2182_v10, %v10375_v41 }
 0x185   :  { %v1905_v7 = vadd.f32 %v10460_v30, %v10425_v47  ;;  %v2607_v1 = vrot.slane %v10527_v42, %v10380_v24  ;;  %v3099_v40 = vsel %vm3098_vm8, %v2603_v35, %v3097_v60  ;;  %v3760_v63 = vsel %vm3098_vm8, %v3267_v9, %v3759_v57 }
 0x186   :  { %v3113_v61 = vsel %vm3096_vm7, %v2663_v19, %v3112_v11  ;;  %v2667_v45 = vrot.slane %v10617_v20, %v10380_v24  ;;  %v3119_v32 = vsel %vm3094_vm6, %v2691_v16, %v3118_v31  ;;  %v1904_v47 = vadd.f32 %v10468_v34, %v10428_v52 }
 0x187   :  { %v1944_v8 = vadd.f32 %v10348_v14, %v1905_v7  ;;  %v2671_v30 = vrot.slane %v10652_v46, %v10380_v24  ;;  %v3335_v42 = vrot.slane %v10617_v20, %v10383_v5  ;;  %v2695_v35 = vrot.slane %v2163_v44, %v10380_v24  ;;  %v10779_v46 = vpop.f32.mrf.mxu0 }
 0x188   :  { %v10768_v9 = vcombine.high %v10736_v17, %v10736_v17  ;;  %v3114_v39 = vsel %vm3098_vm8, %v2667_v45, %v3113_v61  ;;  %v2699_v50 = vrot.slane %v10700_v3, %v10380_v24  ;;  %v2703_v52 = vrot.slane %v10740_v48, %v10380_v24 }
 0x189   :  { %v10777_v34 = vcombine.high %v10743_v23, %v10743_v23  ;;  %v3367_v20 = vrot.slane %v10700_v3, %v10383_v5  ;;  %v3120_v44 = vsel %vm3096_vm7, %v2695_v35, %v3119_v32  ;;  %9223 = vtanh.f32 %v1944_v8  ;;  %v1845_v11 = vpop.f32.mrf.mxu0  ;;  %v4332_v32 = vld [vmem:[#allocation2 + $0x9] sm:$0xff] }
 0x18a   :  { %v1907_v0 = vadd.f32 %v10507_v26, %v10433_v53  ;;  %v3371_v10 = vrot.slane %v10740_v48, %v10383_v5  ;;  %v1943_v28 = vadd.f32 %v10348_v14, %v1904_v47  ;;  %v3761_v57 = vsel %vm3100_vm9, %v3271_v37, %v3760_v63 }
 0x18b   :  { %v3101_v15 = vsel %vm3100_vm9, %v2607_v1, %v3099_v40  ;;  %v2723_v29 = vrot.slane %v10736_v17, %v10380_v24  ;;  %v2727_v3 = vrot.slane %v10768_v9, %v10380_v24  ;;  %v2731_v58 = vrot.slane %v10743_v23, %v10380_v24  ;;  %3885 = vst.msk [vmem:[#allocation3] sm:$0xfe] %vm3884_vm11, %v3761_v57  ;;  %v9222_v40 = vpop.eup %9221 }
 0x18c   :  { %v1906_v53 = vadd.f32 %v10537_v62, %v10436_v56  ;;  %3224 = vst.msk [vmem:[#allocation2 + $0x1] sm:$0xff] %vm3223_vm10, %v3101_v15  ;;  %v3121_v26 = vsel %vm3098_vm8, %v2699_v50, %v3120_v44  ;;  %v3391_v60 = vrot.slane %v10736_v17, %v10383_v5  ;;  %v1909_v19 = vadd.f32 %v10568_v51, %v10440_v12  ;;  %v13485_v50 = vld [vmem:[#allocation17_spill] sm:$0xff]  ;;  %v4808_v17 = vld [vmem:[%s13386_s4 + $0x98] sm:$0xff] }
 0x18d   :  { %v1946_v18 = vadd.f32 %v10348_v14, %v1907_v0  ;;  %v1908_v56 = vadd.f32 %v10586_v38, %v10444_v13  ;;  %v1911_v62 = vadd.f32 %v10608_v33, %v10448_v36  ;;  %v3775_v16 = vsel %vm3100_vm9, %v3335_v42, %v10681_v49  ;;  %9027 = vmatprep.subr.mxu0 %v4808_v17 }
 0x18e   :  { %v3395_v31 = vrot.slane %v10768_v9, %v10383_v5  ;;  %9225 = vtanh.f32 %v1943_v28  ;;  %v1910_v7 = vadd.f32 %v10635_v6, %v10453_v59  ;;  %3887 = vst.msk [vmem:[#allocation3 + $0x10] sm:$0xff] %vm3223_vm10, %v3775_v16  ;;  %v3115_v12 = vsel %vm3100_vm9, %v2671_v30, %v3114_v39  ;;  %v8889_v6 = vpop.f32.mrf.mxu0  ;;  %v3924_v28 = vld [vmem:[%s13386_s4 + $0x18] sm:$0xff]  ;;  %v13488_v16 = vld [vmem:[#allocation9_spill] sm:$0xff] }
 0x18f   :  { %v1945_v51 = vadd.f32 %v10348_v14, %v1906_v53  ;;  %v1913_v13 = vadd.f32 %v10667_v21, %v10457_v43  ;;  %v1912_v36 = vadd.f32 %v10693_v25, %v10463_v4  ;;  %v1915_v38 = vadd.f32 %v10713_v27, %v10472_v2  ;;  %3226 = vst.msk [vmem:[#allocation2 + $0x11] sm:$0xff] %vm3223_vm10, %v3115_v12  ;;  %v3926_v21 = vld [vmem:[#allocation3 + $0x8] sm:$0xff] }
 0x190   :  { %v3399_v59 = vrot.slane %v10743_v23, %v10383_v5  ;;  %v1948_v33 = vadd.f32 %v10348_v14, %v1909_v19  ;;  %v3782_v49 = vsel %vm3100_vm9, %v3367_v20, %v3781_v55  ;;  %v3122_v1 = vsel %vm3100_vm9, %v2703_v52, %v3121_v26  ;;  %v13486_v20 = vld [vmem:[#allocation13_spill] sm:$0xff]  ;;  %8931 = vmatprep.subr.mxu1 %v3924_v28 }
 0x191   :  { %v3403_v43 = vrot.slane %v10777_v34, %v10383_v5  ;;  %9227 = vtanh.f32 %v1946_v18  ;;  %v1947_v4 = vadd.f32 %v10348_v14, %v1908_v56  ;;  %v1950_v2 = vadd.f32 %v10348_v14, %v1911_v62  ;;  %3888 = vst.msk [vmem:[#allocation3 + $0x18] sm:$0xff] %vm3223_vm10, %v3782_v49  ;;  %3227 = vst.msk [vmem:[#allocation2 + $0x19] sm:$0xff] %vm3223_vm10, %v3122_v1  ;;  %v13487_v56 = vld [vmem:[#allocation11_spill] sm:$0xff] }
 0x192   :  { %v2165_v25 = vcombine.high %v9222_v40, %v9222_v40  ;;  %v2172_v27 = vrot.slane %v9222_v40, %v10375_v41  ;;  %v1949_v55 = vadd.f32 %v10348_v14, %v1910_v7  ;;  %v3925_v63 = vld [vmem:[#allocation3] sm:$0xff]  ;;  %v1914_v61 = vadd.f32 %v10748_v22, %v10475_v54  ;;  %v1855_v54 = vpop.f32.mrf.mxu0 }
 0x193   :  { %v4331_v45 = vld [vmem:[#allocation2 + $0x1] sm:$0xff]  ;;  %9229 = vtanh.f32 %v1945_v51  ;;  %v1952_v8 = vadd.f32 %v10348_v14, %v1913_v13  ;;  %v1951_v47 = vadd.f32 %v10348_v14, %v1912_v36  ;;  %v1954_v30 = vadd.f32 %v10348_v14, %v1915_v38  ;;  %8907 = vmatprep.mubr.msk.f32.mxu1 %vm3223_vm10, %v3925_v63  ;;  %v3923_v1 = vld [vmem:[%s13386_s4 + $0x10] sm:$0xff] }
 0x194   :  { %8971 = vmatprep.mubr.msk.f32.mxu0 %vm3223_vm10, %v4331_v45  ;;  %v2179_v42 = vrot.slane %v2165_v25, %v10375_v41  ;;  %v2180_v35 = vcombine.high %v2172_v27, %v2172_v27  ;;  %v3375_v39 = vrot.slane %v2172_v27, %v10383_v5  ;;  %9231 = vtanh.f32 %v1948_v33  ;;  %8908 = vmatmul.mubr.msk.f32.vlgmr.msra.gmra.mxu1 %vm3223_vm10, %v3926_v21  ;;  %v8892_v38 = vpop.f32.mrf.mxu0 }
 0x195   :  { %v2707_v22 = vrot.slane %v2172_v27, %v10380_v24  ;;  %9233 = vtanh.f32 %v1947_v4  ;;  %v1917_v52 = vadd.f32 %v10779_v46, %v13485_v50  ;;  %v1916_v44 = vadd.f32 %v1845_v11, %v13486_v20  ;;  %8972 = vmatmul.mubr.msk.f32.vlgmr.msra.gmra.mxu0 %vm3223_vm10, %v4332_v32  ;;  %v3927_v0 = vld [vmem:[#allocation3 + $0x10] sm:$0xff]  ;;  %8932 = vmatpush3.msra.mxu1 %v3924_v28 }
 0x196   :  { %v9224_v57 = vpop.eup %9223  ;;  %v2181_v15 = vcombine.high %v2179_v42, %v2179_v42  ;;  %v2711_v53 = vrot.slane %v2180_v35, %v10380_v24  ;;  %v2715_v26 = vrot.slane %v2179_v42, %v10380_v24  ;;  %v3379_v19 = vrot.slane %v2180_v35, %v10383_v5  ;;  %8910 = vmatprep.mubr.msk.f32.mxu1 %vm3223_vm10, %v3927_v0  ;;  %v4333_v46 = vld [vmem:[#allocation2 + $0x11] sm:$0xff]  ;;  %v1865_v32 = vpop.f32.mrf.mxu0  ;;  %v13489_v35 = vld [vmem:[#allocation12_spill] sm:$0xff] }
 0x197   :  { %v3383_v11 = vrot.slane %v2179_v42, %v10383_v5  ;;  %v3783_v18 = vsel %vm3088_vm3, %v3375_v39, %v3371_v10  ;;  %v1919_v62 = vadd.f32 %v8889_v6, %v13487_v56  ;;  %v1918_v7 = vadd.f32 %v1855_v54, %v13488_v16  ;;  %8974 = vmatprep.mubr.msk.f32.mxu0 %vm3223_vm10, %v4333_v46 }
 0x198   :  { %v2719_v12 = vrot.slane %v2181_v15, %v10380_v24  ;;  %v3123_v51 = vsel %vm3088_vm3, %v2711_v53, %v2707_v22  ;;  %v3387_v13 = vrot.slane %v2181_v15, %v10383_v5  ;;  %v3784_v36 = vsel %vm3090_vm4, %v3379_v19, %v3783_v18  ;;  %v3928_v33 = vld [vmem:[#allocation3 + $0x18] sm:$0xff]  ;;  %v4334_v49 = vld [vmem:[#allocation2 + $0x19] sm:$0xff]  ;;  %8933 = vmatprep.subr.mxu1 %v3923_v1 }
 0x199   :  { %v3124_v48 = vsel %vm3090_vm4, %v2715_v26, %v3123_v51  ;;  %v3785_v10 = vsel %vm3092_vm5, %v3383_v11, %v3784_v36  ;;  %v2216_v6 = vcombine.high %v9224_v57, %v9224_v57  ;;  %9235 = vtanh.f32 %v1950_v2  ;;  %8911 = vmatmul.mubr.msk.f32.gmra.mxu1 %vm3223_vm10, %v3928_v33  ;;  %8975 = vmatmul.mubr.msk.f32.gmra.mxu0 %vm3223_vm10, %v4334_v49  ;;  %v4807_v11 = vld [vmem:[%s13386_s4 + $0x90] sm:$0xff] }
 0x19a   :  { %v3786_v40 = vsel %vm3094_vm6, %v3387_v13, %v3785_v10  ;;  %9237 = vtanh.f32 %v1949_v55  ;;  %v1953_v4 = vadd.f32 %v10348_v14, %v1914_v61  ;;  %v1956_v21 = vadd.f32 %v10348_v14, %v1917_v52  ;;  %v3922_v55 = vld [vmem:[%s13386_s4 + $0x8] sm:$0xff]  ;;  %8934 = vmatpush3.msra.mxu1 %v3923_v1  ;;  %9028 = vmatpush3.msra.mxu0 %v4808_v17  ;;  %v4805_v1 = vld [vmem:[%s13386_s4 + $0x80] sm:$0xff] }
 0x19b   :  { %v9226_v25 = vpop.eup %9225  ;;  %v3125_v27 = vsel %vm3092_vm5, %v2719_v12, %v3124_v48  ;;  %v3787_v2 = vsel %vm3096_vm7, %v3391_v60, %v3786_v40  ;;  %v10892_v63 = vrot.slane %v9224_v57, %v10375_v41  ;;  %9239 = vtanh.f32 %v1952_v8  ;;  %8935 = vmatprep.subr.mxu1 %v3922_v55  ;;  %v13490_v52 = vld [vmem:[#allocation10_spill] sm:$0xff]  ;;  %9029 = vmatprep.subr.mxu0 %v4807_v11 }
 0x19c   :  { %v10901_v61 = vsel %vm3098_vm8, %v3395_v31, %v3787_v2  ;;  %9241 = vtanh.f32 %v1951_v47  ;;  %v10904_v45 = vadd.f32 %v10348_v14, %v1916_v44  ;;  %v10907_v60 = vadd.f32 %v10348_v14, %v1919_v62  ;;  %v3921_v31 = vld [vmem:[%s13386_s4] sm:$0xff]  ;;  %8936 = vmatpush3.msra.mxu1 %v3922_v55  ;;  %v4806_v13 = vld [vmem:[%s13386_s4 + $0x88] sm:$0xff]  ;;  %9030 = vmatpush3.msra.mxu0 %v4807_v11  ;;  %v4579_v2 = vld [vmem:[%s13386_s4 + $0x78] sm:$0xff] }
 0x19d   :  { %v10910_v8 = vrot.slane %v2216_v6, %v10375_v41  ;;  %9243 = vtanh.f32 %v1954_v30  ;;  %v10913_v42 = vadd.f32 %v10348_v14, %v1918_v7  ;;  %v10916_v39 = vadd.f32 %v8892_v38, %v13489_v35  ;;  %8937 = vmatprep.subr.mxu1 %v3921_v31  ;;  %9031 = vmatprep.subr.mxu0 %v4806_v13 }
 0x19e   :  { %v10921_v47 = vpop.eup %9227  ;;  %v3126_v54 = vsel %vm3094_vm6, %v2723_v29, %v3125_v27  ;;  %v2199_v22 = vcombine.high %v9226_v25, %v9226_v25  ;;  %v2206_v30 = vrot.slane %v9226_v25, %v10375_v41  ;;  %9245 = vtanh.f32 %v1953_v4  ;;  %8938 = vmatpush3.msra.mxu1 %v3921_v31  ;;  %9032 = vmatpush3.msra.mxu0 %v4806_v13 }
 0x19f   :  { %v10930_v14 = vcombine.high %v10892_v63, %v10892_v63  ;;  %v2755_v50 = vrot.slane %v10892_v63, %v10380_v24  ;;  %9247 = vtanh.f32 %v1956_v21  ;;  %v10935_v20 = vadd.f32 %v1865_v32, %v13490_v52  ;;  %9033 = vmatprep.subr.mxu0 %v4805_v1  ;;  %8995 = vmatprep.subr.mxu1 %v4579_v2 }
 0x1a0   :  { %v9230_v29 = vpop.eup %9229  ;;  %v3423_v44 = vrot.slane %v10892_v63, %v10383_v5  ;;  %v2213_v0 = vrot.slane %v2199_v22, %v10375_v41  ;;  %v2214_v28 = vcombine.high %v2206_v30, %v2206_v30  ;;  %v3407_v57 = vrot.slane %v2206_v30, %v10383_v5  ;;  %9034 = vmatpush3.msra.mxu0 %v4805_v1 }
 0x1a1   :  { %v10944_v15 = vpop.eup %9231  ;;  %v3127_v53 = vsel %vm3096_vm7, %v2727_v3, %v3126_v54  ;;  %v10952_v26 = vcombine.high %v10910_v8, %v10910_v8  ;;  %v2739_v19 = vrot.slane %v2206_v30, %v10380_v24  ;;  %v2250_v46 = vcombine.high %v10921_v47, %v10921_v47 }
 0x1a2   :  { %v10960_v18 = vpop.eup %9233  ;;  %v2215_v56 = vcombine.high %v2213_v0, %v2213_v0  ;;  %v2743_v9 = vrot.slane %v2214_v28, %v10380_v24  ;;  %v2747_v3 = vrot.slane %v2213_v0, %v10380_v24  ;;  %v3411_v62 = vrot.slane %v2214_v28, %v10383_v5 }
 0x1a3   :  { %v3415_v16 = vrot.slane %v2213_v0, %v10383_v5  ;;  %v3790_v7 = vsel %vm3088_vm3, %v3407_v57, %v3403_v43  ;;  %v10972_v12 = vrot.slane %v10921_v47, %v10375_v41  ;;  %v2233_v51 = vcombine.high %v9230_v29, %v9230_v29 }
 0x1a4   :  { %v3130_v36 = vsel %vm3088_vm3, %v2743_v9, %v2739_v19  ;;  %v3419_v38 = vrot.slane %v2215_v56, %v10383_v5  ;;  %v3791_v33 = vsel %vm3090_vm4, %v3411_v62, %v3790_v7  ;;  %v2240_v49 = vrot.slane %v9230_v29, %v10375_v41 }
 0x1a5   :  { %v2759_v43 = vrot.slane %v10930_v14, %v10380_v24  ;;  %v2763_v48 = vrot.slane %v10910_v8, %v10380_v24  ;;  %v2751_v10 = vrot.slane %v2215_v56, %v10380_v24  ;;  %v3792_v6 = vsel %vm3092_vm5, %v3415_v16, %v3791_v33 }
 0x1a6   :  { %v10990_v40 = vpop.eup %9235  ;;  %v3427_v4 = vrot.slane %v10930_v14, %v10383_v5  ;;  %v3131_v21 = vsel %vm3090_vm4, %v2747_v3, %v3130_v36  ;;  %v3793_v25 = vsel %vm3094_vm6, %v3419_v38, %v3792_v6  ;;  %v2284_v27 = vcombine.high %v10944_v15, %v10944_v15 }
 0x1a7   :  { %v11001_v55 = vpop.eup %9237  ;;  %v11007_v32 = vsel %vm3098_vm8, %v2731_v58, %v3127_v53  ;;  %v3435_v35 = vrot.slane %v10952_v26, %v10383_v5  ;;  %v3794_v31 = vsel %vm3096_vm7, %v3423_v44, %v3793_v25  ;;  %v2247_v47 = vrot.slane %v2233_v51, %v10375_v41 }
 0x1a8   :  { %v11013_v54 = vpop.eup %9239  ;;  %v11016_v22 = vsel %vm3098_vm8, %v3427_v4, %v3794_v31  ;;  %v11019_v30 = vrot.slane %v2250_v46, %v10375_v41  ;;  %v11023_v58 = vcombine.high %v10972_v12, %v10972_v12  ;;  %v2248_v14 = vcombine.high %v2240_v49, %v2240_v49 }
 0x1a9   :  { %v11025_v52 = vpop.eup %9241  ;;  %v3132_v17 = vsel %vm3092_vm5, %v2751_v10, %v3131_v21  ;;  %v2249_v29 = vcombine.high %v2247_v47, %v2247_v47  ;;  %v2771_v44 = vrot.slane %v2240_v49, %v10380_v24  ;;  %v3439_v0 = vrot.slane %v2240_v49, %v10383_v5 }
 0x1aa   :  { %v11030_v28 = vpop.eup %9243  ;;  %v2775_v57 = vrot.slane %v2248_v14, %v10380_v24  ;;  %v3443_v53 = vrot.slane %v2248_v14, %v10383_v5  ;;  %v3447_v19 = vrot.slane %v2247_v47, %v10383_v5  ;;  %v11036_v46 = vrot.slane %v2284_v27, %v10375_v41 }
 0x1ab   :  { %v11038_v11 = vpop.eup %9245  ;;  %v2779_v56 = vrot.slane %v2247_v47, %v10380_v24  ;;  %v3451_v9 = vrot.slane %v2249_v29, %v10383_v5  ;;  %v3797_v3 = vsel %vm3088_vm3, %v3439_v0, %v3435_v35  ;;  %v11045_v62 = vrot.slane %v10944_v15, %v10375_v41 }
 0x1ac   :  { %v11047_v16 = vpop.eup %9247  ;;  %v3133_v7 = vsel %vm3094_vm6, %v2755_v50, %v3132_v17  ;;  %v3137_v51 = vsel %vm3088_vm3, %v2775_v57, %v2771_v44  ;;  %v3798_v13 = vsel %vm3090_vm4, %v3443_v53, %v3797_v3  ;;  %v11057_v36 = vcombine.high %v11036_v46, %v11036_v46 }
 0x1ad   :  { %v11063_v15 = vcombine.high %v11019_v30, %v11019_v30  ;;  %v3455_v63 = vrot.slane %v10972_v12, %v10383_v5  ;;  %v3799_v50 = vsel %vm3092_vm5, %v3447_v19, %v3798_v13  ;;  %v3459_v49 = vrot.slane %v11023_v58, %v10383_v5 }
 0x1ae   :  { %v2783_v10 = vrot.slane %v2249_v29, %v10380_v24  ;;  %v3800_v6 = vsel %vm3094_vm6, %v3451_v9, %v3799_v50  ;;  %v3134_v1 = vsel %vm3096_vm7, %v2759_v43, %v3133_v7  ;;  %v2787_v4 = vrot.slane %v10972_v12, %v10380_v24 }
 0x1af   :  { %v3138_v21 = vsel %vm3090_vm4, %v2779_v56, %v3137_v51  ;;  %v3801_v25 = vsel %vm3096_vm7, %v3455_v63, %v3800_v6  ;;  %v11084_v2 = vcombine.high %v11045_v62, %v11045_v62  ;;  %v3499_v35 = vrot.slane %v11057_v36, %v10383_v5 }
 0x1b0   :  { %v11080_v27 = vsel %vm3098_vm8, %v3459_v49, %v3801_v25  ;;  %v2267_v43 = vcombine.high %v10960_v18, %v10960_v18  ;;  %v2791_v12 = vrot.slane %v11023_v58, %v10380_v24  ;;  %v2795_v31 = vrot.slane %v11019_v30, %v10380_v24 }
 0x1b1   :  { %v2274_v14 = vrot.slane %v10960_v18, %v10375_v41  ;;  %v3139_v29 = vsel %vm3092_vm5, %v2783_v10, %v3138_v21  ;;  %3893 = vst.msk [vmem:[#allocation3 + $0x40] sm:$0x1] %vm2573_vm2, %v3499_v35  ;;  %v2318_v58 = vcombine.high %v10990_v40, %v10990_v40  ;;  %v11109_v0 = vsel %vm3098_vm8, %v2763_v48, %v3134_v1 }
 0x1b2   :  { %v2281_v44 = vrot.slane %v2267_v43, %v10375_v41  ;;  %v3467_v18 = vrot.slane %v11063_v15, %v10383_v5  ;;  %v2819_v19 = vrot.slane %v11045_v62, %v10380_v24  ;;  %v2823_v56 = vrot.slane %v11084_v2, %v10380_v24 }
 0x1b3   :  { %v2282_v57 = vcombine.high %v2274_v14, %v2274_v14  ;;  %v3471_v53 = vrot.slane %v2274_v14, %v10383_v5  ;;  %v3140_v7 = vsel %vm3094_vm6, %v2787_v4, %v3139_v29  ;;  %v2325_v13 = vrot.slane %v10990_v40, %v10375_v41 }
 0x1b4   :  { %v2283_v9 = vcombine.high %v2281_v44, %v2281_v44  ;;  %v3479_v3 = vrot.slane %v2281_v44, %v10383_v5  ;;  %v11126_v50 = vrot.slane %v2318_v58, %v10375_v41  ;;  %v2301_v49 = vcombine.high %v11001_v55, %v11001_v55 }
 0x1b5   :  { %v3475_v48 = vrot.slane %v2282_v57, %v10383_v5  ;;  %v3804_v51 = vsel %vm3088_vm3, %v3471_v53, %v3467_v18  ;;  %v2308_v10 = vrot.slane %v11001_v55, %v10375_v41  ;;  %v2827_v6 = vrot.slane %v11036_v46, %v10380_v24 }
 0x1b6   :  { %v3483_v63 = vrot.slane %v2283_v9, %v10383_v5  ;;  %v3487_v1 = vrot.slane %v11045_v62, %v10383_v5  ;;  %v2807_v4 = vrot.slane %v2282_v57, %v10380_v24  ;;  %v3141_v21 = vsel %vm3096_vm7, %v2791_v12, %v3140_v7 }
 0x1b7   :  { %v3805_v40 = vsel %vm3090_vm4, %v3475_v48, %v3804_v51  ;;  %v3491_v25 = vrot.slane %v11084_v2, %v10383_v5  ;;  %v2352_v55 = vcombine.high %v11013_v54, %v11013_v54  ;;  %v2803_v43 = vrot.slane %v2274_v14, %v10380_v24  ;;  %v8895_v2 = vpop.f32.mrf.mxu0 }
 0x1b8   :  { %v3806_v35 = vsel %vm3092_vm5, %v3479_v3, %v3805_v40  ;;  %v2811_v29 = vrot.slane %v2281_v44, %v10380_v24  ;;  %v2333_v18 = vcombine.high %v2325_v13, %v2325_v13  ;;  %v11150_v12 = vcombine.high %v11126_v50, %v11126_v50 }
 0x1b9   :  { %v3807_v58 = vsel %vm3094_vm6, %v3483_v63, %v3806_v35  ;;  %v2315_v53 = vrot.slane %v2301_v49, %v10375_v41  ;;  %v2316_v7 = vcombine.high %v2308_v10, %v2308_v10  ;;  %v2815_v3 = vrot.slane %v2283_v9, %v10380_v24 }
 0x1ba   :  { %v3808_v57 = vsel %vm3096_vm7, %v3487_v1, %v3807_v58  ;;  %v3144_v48 = vsel %vm3088_vm3, %v2807_v4, %v2803_v43  ;;  %v2851_v44 = vrot.slane %v2325_v13, %v10380_v24  ;;  %v2835_v63 = vrot.slane %v2308_v10, %v10380_v24 }
 0x1bb   :  { %v11156_v14 = vsel %vm3098_vm8, %v3491_v25, %v3808_v57  ;;  %v2317_v51 = vcombine.high %v2315_v53, %v2315_v53  ;;  %v2839_v1 = vrot.slane %v2316_v7, %v10380_v24  ;;  %v2843_v40 = vrot.slane %v2315_v53, %v10380_v24 }
 0x1bc   :  { %v2855_v35 = vrot.slane %v2333_v18, %v10380_v24  ;;  %v3503_v49 = vrot.slane %v2308_v10, %v10383_v5  ;;  %v3507_v9 = vrot.slane %v2316_v7, %v10383_v5  ;;  %v3511_v4 = vrot.slane %v2315_v53, %v10383_v5 }
 0x1bd   :  { %v2859_v25 = vrot.slane %v11126_v50, %v10380_v24  ;;  %v2847_v43 = vrot.slane %v2317_v51, %v10380_v24  ;;  %v3151_v58 = vsel %vm3088_vm3, %v2839_v1, %v2835_v63  ;;  %v3515_v57 = vrot.slane %v2317_v51, %v10383_v5 }
 0x1be   :  { %v3145_v47 = vsel %vm3090_vm4, %v2811_v29, %v3144_v48  ;;  %v3519_v17 = vrot.slane %v2325_v13, %v10383_v5  ;;  %v3152_v38 = vsel %vm3090_vm4, %v2843_v40, %v3151_v58  ;;  %v3811_v10 = vsel %vm3090_vm4, %v3507_v9, %v3503_v49 }
 0x1bf   :  { %v3523_v7 = vrot.slane %v2333_v18, %v10383_v5  ;;  %v3153_v53 = vsel %vm3092_vm5, %v2847_v43, %v3152_v38  ;;  %v3812_v33 = vsel %vm3092_vm5, %v3511_v4, %v3811_v10  ;;  %v2335_v37 = vcombine.high %v11025_v52, %v11025_v52 }
 0x1c0   :  { %v3154_v63 = vsel %vm3094_vm6, %v2851_v44, %v3153_v53  ;;  %v3813_v51 = vsel %vm3094_vm6, %v3515_v57, %v3812_v33  ;;  %v2359_v13 = vrot.slane %v11013_v54, %v10375_v41  ;;  %v11185_v29 = vrot.slane %v2352_v55, %v10375_v41 }
 0x1c1   :  { %v2831_v18 = vrot.slane %v11057_v36, %v10380_v24  ;;  %v3146_v38 = vsel %vm3092_vm5, %v2815_v3, %v3145_v47  ;;  %v3155_v48 = vsel %vm3096_vm7, %v2855_v35, %v3154_v63  ;;  %v3814_v1 = vsel %vm3096_vm7, %v3519_v17, %v3813_v51 }
 0x1c2   :  { %v11196_v33 = vsel %vm3098_vm8, %v2795_v31, %v3141_v21  ;;  %v3495_v54 = vrot.slane %v11036_v46, %v10383_v5  ;;  %v11201_v55 = vsel %vm3098_vm8, %v2859_v25, %v3155_v48  ;;  %v11204_v44 = vsel %vm3098_vm8, %v3523_v7, %v3814_v1 }
 0x1c3   :  { %v3531_v17 = vrot.slane %v11150_v12, %v10383_v5  ;;  %v2342_v3 = vrot.slane %v11025_v52, %v10375_v41  ;;  %v2349_v31 = vrot.slane %v2335_v37, %v10375_v41  ;;  %v3147_v21 = vsel %vm3094_vm6, %v2819_v19, %v3146_v38 }
 0x1c4   :  { %v2367_v40 = vcombine.high %v2359_v13, %v2359_v13  ;;  %v11219_v35 = vcombine.high %v11185_v29, %v11185_v29  ;;  %v2883_v49 = vrot.slane %v2359_v13, %v10380_v24  ;;  %v2386_v25 = vcombine.high %v11030_v28, %v11030_v28 }
 0x1c5   :  { %v2350_v9 = vcombine.high %v2342_v3, %v2342_v3  ;;  %v2351_v4 = vcombine.high %v2349_v31, %v2349_v31  ;;  %v11226_v37 = vrot.slane %v11030_v28, %v10375_v41  ;;  %v2867_v52 = vrot.slane %v2342_v3, %v10380_v24 }
 0x1c6   :  { %v2875_v62 = vrot.slane %v2349_v31, %v10380_v24  ;;  %v3535_v19 = vrot.slane %v2342_v3, %v10383_v5  ;;  %v3543_v43 = vrot.slane %v2349_v31, %v10383_v5  ;;  %v2891_v28 = vrot.slane %v11185_v29, %v10380_v24 }
 0x1c7   :  { %v2871_v58 = vrot.slane %v2350_v9, %v10380_v24  ;;  %v2879_v57 = vrot.slane %v2351_v4, %v10380_v24  ;;  %v3539_v10 = vrot.slane %v2350_v9, %v10383_v5  ;;  %v3547_v7 = vrot.slane %v2351_v4, %v10383_v5 }
 0x1c8   :  { %v3817_v53 = vsel %vm3088_vm3, %v3535_v19, %v3531_v17  ;;  %v2369_v63 = vcombine.high %v11038_v11, %v11038_v11  ;;  %v2376_v51 = vrot.slane %v11038_v11, %v10375_v41  ;;  %v2887_v38 = vrot.slane %v2367_v40, %v10380_v24 }
 0x1c9   :  { %v3551_v48 = vrot.slane %v2359_v13, %v10383_v5  ;;  %v3158_v1 = vsel %vm3088_vm3, %v2871_v58, %v2867_v52  ;;  %v3818_v3 = vsel %vm3090_vm4, %v3539_v10, %v3817_v53  ;;  %v3555_v31 = vrot.slane %v2367_v40, %v10383_v5 }
 0x1ca   :  { %v3563_v9 = vrot.slane %v11219_v35, %v10383_v5  ;;  %v3159_v17 = vsel %vm3090_vm4, %v2875_v62, %v3158_v1  ;;  %v3819_v4 = vsel %vm3092_vm5, %v3543_v43, %v3818_v3  ;;  %v11255_v47 = vrot.slane %v2386_v25, %v10375_v41 }
 0x1cb   :  { %v3160_v19 = vsel %vm3092_vm5, %v2879_v57, %v3159_v17  ;;  %v3820_v11 = vsel %vm3094_vm6, %v3547_v7, %v3819_v4  ;;  %v2401_v13 = vcombine.high %v11226_v37, %v11226_v37  ;;  %v2383_v58 = vrot.slane %v2369_v63, %v10375_v41 }
 0x1cc   :  { %v3161_v52 = vsel %vm3094_vm6, %v2883_v49, %v3160_v19  ;;  %v3821_v40 = vsel %vm3096_vm7, %v3551_v48, %v3820_v11  ;;  %v2384_v10 = vcombine.high %v2376_v51, %v2376_v51  ;;  %v2899_v57 = vrot.slane %v2376_v51, %v10380_v24 }
 0x1cd   :  { %v3162_v62 = vsel %vm3096_vm7, %v2887_v38, %v3161_v52  ;;  %v11264_v43 = vsel %vm3098_vm8, %v3555_v31, %v3821_v40  ;;  %v3567_v25 = vrot.slane %v2376_v51, %v10383_v5  ;;  %v2385_v53 = vcombine.high %v2383_v58, %v2383_v58  ;;  %v1486_v40 = vpop.f32.mrf.mxu1 }
 0x1ce   :  { %v11269_v7 = vsel %vm3098_vm8, %v2891_v28, %v3162_v62  ;;  %v2903_v49 = vrot.slane %v2384_v10, %v10380_v24  ;;  %v2907_v48 = vrot.slane %v2383_v58, %v10380_v24  ;;  %v3527_v63 = vrot.slane %v11126_v50, %v10383_v5 }
 0x1cf   :  { %v3571_v38 = vrot.slane %v2384_v10, %v10383_v5  ;;  %v3575_v1 = vrot.slane %v2383_v58, %v10383_v5  ;;  %v3824_v3 = vsel %vm3088_vm3, %v3567_v25, %v3563_v9  ;;  %v3148_v28 = vsel %vm3096_vm7, %v2823_v56, %v3147_v21 }
 0x1d0   :  { %v2911_v51 = vrot.slane %v2385_v53, %v10380_v24  ;;  %v3165_v31 = vsel %vm3088_vm3, %v2903_v49, %v2899_v57  ;;  %v3579_v17 = vrot.slane %v2385_v53, %v10383_v5  ;;  %v11287_v50 = vcombine.high %v11255_v47, %v11255_v47 }
 0x1d1   :  { %v2915_v4 = vrot.slane %v11226_v37, %v10380_v24  ;;  %v3166_v9 = vsel %vm3090_vm4, %v2907_v48, %v3165_v31  ;;  %v3825_v19 = vsel %vm3090_vm4, %v3571_v38, %v3824_v3  ;;  %v2919_v56 = vrot.slane %v2401_v13, %v10380_v24 }
 0x1d2   :  { %v3583_v21 = vrot.slane %v11226_v37, %v10383_v5  ;;  %v3167_v11 = vsel %vm3092_vm5, %v2911_v51, %v3166_v9  ;;  %v3826_v52 = vsel %vm3092_vm5, %v3575_v1, %v3825_v19  ;;  %v2923_v58 = vrot.slane %v11255_v47, %v10380_v24  ;;  %v1875_v1 = vpop.f32.mrf.mxu0  ;;  %v13500_v19 = vld [vmem:[#allocation15_spill] sm:$0xff] }
 0x1d3   :  { %v3587_v10 = vrot.slane %v2401_v13, %v10383_v5  ;;  %v3168_v62 = vsel %vm3094_vm6, %v2915_v4, %v3167_v11  ;;  %v3827_v57 = vsel %vm3094_vm6, %v3579_v17, %v3826_v52  ;;  %v3149_v25 = vsel %vm3098_vm8, %v2827_v6, %v3148_v28  ;;  %v8848_v28 = vpop.f32.mrf.mxu1 }
 0x1d4   :  { %v2895_v37 = vrot.slane %v11219_v35, %v10380_v24  ;;  %v3169_v53 = vsel %vm3096_vm7, %v2919_v56, %v3168_v62  ;;  %v3828_v49 = vsel %vm3096_vm7, %v3583_v21, %v3827_v57  ;;  %v3559_v48 = vrot.slane %v11185_v29, %v10383_v5 }
 0x1d5   :  { %v3170_v13 = vsel %vm3098_vm8, %v2923_v58, %v3169_v53  ;;  %v3829_v38 = vsel %vm3098_vm8, %v3587_v10, %v3828_v49  ;;  %9249 = vtanh.f32 %v10904_v45  ;;  %v3789_v6 = vsel %vm3100_vm9, %v3399_v59, %v10901_v61  ;;  %v1496_v51 = vpop.f32.mrf.mxu1 }
 0x1d6   :  { %9251 = vtanh.f32 %v10907_v60  ;;  %v13491_v35 = vrot.slane %v10777_v34, %v10380_v24  ;;  %v13492_v3 = vrot.slane %v10910_v8, %v10383_v5  ;;  %v2927_v60 = vrot.slane %v11287_v50, %v10380_v24  ;;  %3889 = vst.msk [vmem:[#allocation3 + $0x20] sm:$0xff] %vm3223_vm10, %v3789_v6 }
 0x1d7   :  { %v2420_v23 = vcombine.high %v11047_v16, %v11047_v16  ;;  %v13493_v34 = vrot.slane %v10952_v26, %v10380_v24  ;;  %v13494_v61 = vrot.slane %v11019_v30, %v10383_v5  ;;  %v3810_v30 = vsel %vm3100_vm9, %v3495_v54, %v11156_v14 }
 0x1d8   :  { %v3129_v29 = vsel %vm3100_vm9, %v13491_v35, %v11007_v32  ;;  %v3796_v45 = vsel %vm3100_vm9, %v13492_v3, %v11016_v22  ;;  %v3591_v32 = vrot.slane %v11255_v47, %v10383_v5  ;;  %v13495_v22 = vrot.slane %v11063_v15, %v10380_v24  ;;  %3892 = vst.msk [vmem:[#allocation3 + $0x38] sm:$0xff] %vm3223_vm10, %v3810_v30 }
 0x1d9   :  { %3228 = vst.msk [vmem:[#allocation2 + $0x21] sm:$0xff] %vm3223_vm10, %v3129_v29  ;;  %3890 = vst.msk [vmem:[#allocation3 + $0x28] sm:$0xff] %vm3223_vm10, %v3796_v45  ;;  %v3136_v59 = vsel %vm3100_vm9, %v13493_v34, %v11109_v0  ;;  %v3803_v8 = vsel %vm3100_vm9, %v13494_v61, %v11080_v27  ;;  %v3150_v27 = vsel %vm3100_vm9, %v2831_v18, %v3149_v25  ;;  %v11370_v0 = vld [vmem:[%s13387_s3] ss:$0 sm:$0xff]  ;;  %9253 = vtanh.f32 %v10913_v42 }
 0x1da   :  { %3229 = vst.msk [vmem:[#allocation2 + $0x29] sm:$0xff] %vm3223_vm10, %v3136_v59  ;;  %3891 = vst.msk [vmem:[#allocation3 + $0x30] sm:$0xff] %vm3223_vm10, %v3803_v8  ;;  %v3143_v26 = vsel %vm3100_vm9, %v13495_v22, %v11196_v33  ;;  %v1960_v15 = vadd.f32 %v11370_v0, %v10916_v39  ;;  %v8898_v33 = vpop.f32.mrf.mxu0  ;;  %v3816_v46 = vsel %vm3100_vm9, %v3527_v63, %v11204_v44  ;;  %v13497_v44 = vld [vmem:[#allocation19_spill] sm:$0xff] }
 0x1db   :  { %3230 = vst.msk [vmem:[#allocation2 + $0x31] sm:$0xff] %vm3223_vm10, %v3143_v26  ;;  %3231 = vst.msk [vmem:[#allocation2 + $0x39] sm:$0xff] %vm3223_vm10, %v3150_v27  ;;  %v13496_v36 = vrot.slane %v11150_v12, %v10380_v24  ;;  %v3823_v18 = vsel %vm3100_vm9, %v3559_v48, %v11264_v43  ;;  %v11388_v39 = vrot.slane %v11047_v16, %v10375_v41  ;;  %v13498_v43 = vld [vmem:[#allocation41_spill] sm:$0xff] }
 0x1dc   :  { %3894 = vst.msk [vmem:[#allocation3 + $0x48] sm:$0xfe] %vm3884_vm11, %v3816_v46  ;;  %v3164_v54 = vsel %vm3100_vm9, %v2895_v37, %v11269_v7  ;;  %v3830_v12 = vsel %vm3100_vm9, %v3591_v32, %v3829_v38  ;;  %v1533_v47 = vadd.f32 %v1486_v40, %v13497_v44  ;;  %v1536_v63 = vadd.f32 %v8848_v28, %v13498_v43  ;;  %v13499_v7 = vld [vmem:[#allocation14_spill] sm:$0xff]  ;;  %v1885_v9 = vpop.f32.mrf.mxu0 }
 0x1dd   :  { %v3157_v14 = vsel %vm3100_vm9, %v13496_v36, %v11201_v55  ;;  %3895 = vst.msk [vmem:[#allocation3 + $0x50] sm:$0xff] %vm3223_vm10, %v3823_v18  ;;  %v3171_v55 = vsel %vm3100_vm9, %v2927_v60, %v3170_v13  ;;  %v11400_v16 = vrot.slane %v2420_v23, %v10375_v41  ;;  %3233 = vst.msk [vmem:[#allocation2 + $0x51] sm:$0xff] %vm3223_vm10, %v3164_v54  ;;  %9255 = vtanh.f32 %v1960_v15  ;;  %v3929_v52 = vld [vmem:[#allocation3 + $0x20] sm:$0xff] }
 0x1de   :  { %3232 = vst.msk [vmem:[#allocation2 + $0x49] sm:$0xff] %vm3223_vm10, %v3157_v14  ;;  %3896 = vst.msk [vmem:[#allocation3 + $0x58] sm:$0xff] %vm3223_vm10, %v3830_v12  ;;  %v1923_v31 = vadd.f32 %v8895_v2, %v13499_v7  ;;  %v1922_v17 = vadd.f32 %v1875_v1, %v1533_v47  ;;  %v1925_v4 = vadd.f32 %v8898_v33, %v1536_v63  ;;  %8913 = vmatprep.mubr.msk.f32.mxu1 %vm3223_vm10, %v3929_v52 }
 0x1df   :  { %3234 = vst.msk [vmem:[#allocation2 + $0x59] sm:$0xff] %vm3223_vm10, %v3171_v55  ;;  %v1535_v56 = vadd.f32 %v1496_v51, %v13500_v19  ;;  %v11410_v21 = vcombine.high %v11388_v39, %v11388_v39  ;;  %v1959_v11 = vadd.f32 %v11370_v0, %v10935_v20  ;;  %v11416_v42 = vcombine.high %v11400_v16, %v11400_v16  ;;  %v3932_v49 = vld [vmem:[#allocation3 + $0x38] sm:$0xff] }
 0x1e0   :  { %v4335_v40 = vld [vmem:[#allocation2 + $0x21] sm:$0xff]  ;;  %v3930_v58 = vld [vmem:[#allocation3 + $0x28] sm:$0xff]  ;;  %v1962_v62 = vadd.f32 %v11370_v0, %v1923_v31  ;;  %v3595_v25 = vrot.slane %v11287_v50, %v10383_v5  ;;  %v1961_v37 = vadd.f32 %v11370_v0, %v1922_v17  ;;  %v1964_v53 = vadd.f32 %v11370_v0, %v1925_v4 }
 0x1e1   :  { %8977 = vmatprep.mubr.msk.f32.mxu0 %vm3223_vm10, %v4335_v40  ;;  %v4336_v2 = vld [vmem:[#allocation2 + $0x29] sm:$0xff]  ;;  %v3931_v10 = vld [vmem:[#allocation3 + $0x30] sm:$0xff]  ;;  %8914 = vmatmul.mubr.msk.f32.gmra.mxu1 %vm3223_vm10, %v3930_v58  ;;  %v1924_v57 = vadd.f32 %v1885_v9, %v1535_v56  ;;  %v2947_v38 = vrot.slane %v11388_v39, %v10380_v24  ;;  %v2951_v1 = vrot.slane %v11410_v21, %v10380_v24  ;;  %9257 = vtanh.f32 %v1959_v11 }
 0x1e2   :  { %8978 = vmatmul.mubr.msk.f32.gmra.mxu0 %vm3223_vm10, %v4336_v2  ;;  %v4337_v20 = vld [vmem:[#allocation2 + $0x31] sm:$0xff]  ;;  %8916 = vmatprep.mubr.msk.f32.mxu1 %vm3223_vm10, %v3931_v10  ;;  %v4338_v48 = vld [vmem:[#allocation2 + $0x39] sm:$0xff]  ;;  %v9250_v13 = vpop.eup %9249  ;;  %v2955_v50 = vrot.slane %v11400_v16, %v10380_v24  ;;  %v2959_v29 = vrot.slane %v11416_v42, %v10380_v24  ;;  %v3615_v3 = vrot.slane %v11388_v39, %v10383_v5  ;;  %9259 = vtanh.f32 %v1962_v62 }
 0x1e3   :  { %8980 = vmatprep.mubr.msk.f32.mxu0 %vm3223_vm10, %v4337_v20  ;;  %v3933_v6 = vld [vmem:[#allocation3 + $0x48] sm:$0xff]  ;;  %v9252_v35 = vpop.eup %9251  ;;  %v2403_v45 = vcombine.high %v9250_v13, %v9250_v13  ;;  %v2410_v28 = vrot.slane %v9250_v13, %v10375_v41  ;;  %v3619_v23 = vrot.slane %v11410_v21, %v10383_v5  ;;  %v3623_v34 = vrot.slane %v11400_v16, %v10383_v5 }
 0x1e4   :  { %v1963_v59 = vadd.f32 %v11370_v0, %v1924_v57  ;;  %v3934_v22 = vld [vmem:[#allocation3 + $0x50] sm:$0xff]  ;;  %v2454_v30 = vcombine.high %v9252_v35, %v9252_v35  ;;  %v11452_v27 = vrot.slane %v9252_v35, %v10375_v41  ;;  %9261 = vtanh.f32 %v1961_v37  ;;  %v4340_v0 = vld [vmem:[#allocation2 + $0x51] sm:$0xff] }
 0x1e5   :  { %v4339_v60 = vld [vmem:[#allocation2 + $0x49] sm:$0xff]  ;;  %8917 = vmatmul.mubr.msk.f32.gmra.mxu1 %vm3223_vm10, %v3932_v49  ;;  %v2417_v61 = vrot.slane %v2403_v45, %v10375_v41  ;;  %v2418_v8 = vcombine.high %v2410_v28, %v2410_v28  ;;  %v3599_v32 = vrot.slane %v2410_v28, %v10383_v5  ;;  %v2931_v26 = vrot.slane %v2410_v28, %v10380_v24 }
 0x1e6   :  { %8981 = vmatmul.mubr.msk.f32.gmra.mxu0 %vm3223_vm10, %v4338_v48  ;;  %8919 = vmatprep.mubr.msk.f32.mxu1 %vm3223_vm10, %v3933_v6  ;;  %v3935_v14 = vld [vmem:[#allocation3 + $0x58] sm:$0xff]  ;;  %v3627_v18 = vrot.slane %v11416_v42, %v10383_v5  ;;  %9263 = vtanh.f32 %v1964_v53  ;;  %v4341_v12 = vld [vmem:[#allocation2 + $0x59] sm:$0xff]  ;;  %v9254_v55 = vpop.eup %9253  ;;  %v11471_v17 = vrot.slane %v2454_v30, %v10375_v41  ;;  %v2469_v4 = vcombine.high %v11452_v27, %v11452_v27 }
 0x1e7   :  { %8983 = vmatprep.mubr.msk.f32.mxu0 %vm3223_vm10, %v4339_v60  ;;  %v2419_v15 = vcombine.high %v2417_v61, %v2417_v61  ;;  %v2935_v33 = vrot.slane %v2418_v8, %v10380_v24  ;;  %v2939_v46 = vrot.slane %v2417_v61, %v10380_v24  ;;  %v3603_v36 = vrot.slane %v2418_v8, %v10383_v5 }
 0x1e8   :  { %v3607_v39 = vrot.slane %v2417_v61, %v10383_v5  ;;  %v3831_v54 = vsel %vm3088_vm3, %v3599_v32, %v3595_v25  ;;  %v2979_v56 = vrot.slane %v11452_v27, %v10380_v24  ;;  %9265 = vtanh.f32 %v1963_v59 }
 0x1e9   :  { %8920 = vmatmul.mubr.msk.f32.gmra.mxu1 %vm3223_vm10, %v3934_v22  ;;  %v2943_v44 = vrot.slane %v2419_v15, %v10380_v24  ;;  %v3172_v47 = vsel %vm3088_vm3, %v2935_v33, %v2931_v26  ;;  %v3611_v43 = vrot.slane %v2419_v15, %v10383_v5  ;;  %v3832_v63 = vsel %vm3090_vm4, %v3603_v36, %v3831_v54 }
 0x1ea   :  { %8984 = vmatmul.mubr.msk.f32.gmra.mxu0 %vm3223_vm10, %v4340_v0  ;;  %v9256_v51 = vpop.eup %9255  ;;  %v3173_v7 = vsel %vm3090_vm4, %v2939_v46, %v3172_v47  ;;  %v3833_v31 = vsel %vm3092_vm5, %v3607_v39, %v3832_v63  ;;  %8922 = vmatprep.mubr.msk.f32.mxu1 %vm3223_vm10, %v3935_v14  ;;  %v3647_v52 = vrot.slane %v11452_v27, %v10383_v5 }
 0x1eb   :  { %v3174_v9 = vsel %vm3092_vm5, %v2943_v44, %v3173_v7  ;;  %v3834_v19 = vsel %vm3094_vm6, %v3611_v43, %v3833_v31  ;;  %8986 = vmatprep.mubr.msk.f32.mxu0 %vm3223_vm10, %v4341_v12  ;;  %v2437_v40 = vcombine.high %v9254_v55, %v9254_v55  ;;  %v2444_v10 = vrot.slane %v9254_v55, %v10375_v41 }
 0x1ec   :  { %v3175_v21 = vsel %vm3094_vm6, %v2947_v38, %v3174_v9  ;;  %v3835_v11 = vsel %vm3096_vm7, %v3615_v3, %v3834_v19  ;;  %v2488_v62 = vcombine.high %v9256_v51, %v9256_v51  ;;  %v11498_v20 = vcombine.high %v11471_v17, %v11471_v17 }
 0x1ed   :  { %v3176_v58 = vsel %vm3096_vm7, %v2951_v1, %v3175_v21  ;;  %v11487_v2 = vsel %vm3098_vm8, %v3619_v23, %v3835_v11  ;;  %v2983_v25 = vrot.slane %v2469_v4, %v10380_v24  ;;  %v2451_v37 = vrot.slane %v2437_v40, %v10375_v41 }
 0x1ee   :  { %v11494_v57 = vsel %vm3098_vm8, %v2955_v50, %v3176_v58  ;;  %v9258_v53 = vpop.eup %9257  ;;  %v2987_v49 = vrot.slane %v11471_v17, %v10380_v24  ;;  %v2452_v48 = vcombine.high %v2444_v10, %v2444_v10  ;;  %v3631_v13 = vrot.slane %v2444_v10, %v10383_v5 }
 0x1ef   :  { %v11506_v38 = vrot.slane %v9256_v51, %v10375_v41  ;;  %v2453_v1 = vcombine.high %v2451_v37, %v2451_v37  ;;  %v2963_v50 = vrot.slane %v2444_v10, %v10380_v24  ;;  %v2971_v6 = vrot.slane %v2451_v37, %v10380_v24  ;;  %v9260_v23 = vpop.eup %9259 }
 0x1f0   :  { %v3639_v35 = vrot.slane %v2451_v37, %v10383_v5  ;;  %v2967_v3 = vrot.slane %v2452_v48, %v10380_v24  ;;  %v3635_v45 = vrot.slane %v2452_v48, %v10383_v5  ;;  %v3838_v28 = vsel %vm3088_vm3, %v3631_v13, %v3627_v18 }
 0x1f1   :  { %v11515_v60 = vrot.slane %v2488_v62, %v10375_v41  ;;  %v2991_v59 = vrot.slane %v11498_v20, %v10380_v24  ;;  %v2975_v61 = vrot.slane %v2453_v1, %v10380_v24  ;;  %v3643_v8 = vrot.slane %v2453_v1, %v10383_v5  ;;  %v11521_v22 = vpop.eup %9261 }
 0x1f2   :  { %v2471_v32 = vcombine.high %v9258_v53, %v9258_v53  ;;  %v3651_v26 = vrot.slane %v2469_v4, %v10383_v5  ;;  %v3655_v30 = vrot.slane %v11471_v17, %v10383_v5  ;;  %v3179_v27 = vsel %vm3088_vm3, %v2967_v3, %v2963_v50 }
 0x1f3   :  { %v3839_v0 = vsel %vm3090_vm4, %v3635_v45, %v3838_v28  ;;  %v3659_v15 = vrot.slane %v11498_v20, %v10383_v5  ;;  %v3180_v33 = vsel %vm3090_vm4, %v2971_v6, %v3179_v27  ;;  %v2503_v36 = vcombine.high %v11506_v38, %v11506_v38  ;;  %v9264_v14 = vpop.eup %9263 }
 0x1f4   :  { %v3840_v46 = vsel %vm3092_vm5, %v3639_v35, %v3839_v0  ;;  %v3181_v18 = vsel %vm3092_vm5, %v2975_v61, %v3180_v33  ;;  %v11538_v54 = vcombine.high %v11515_v60, %v11515_v60  ;;  %v3011_v12 = vrot.slane %v11506_v38, %v10380_v24 }
 0x1f5   :  { %v3841_v39 = vsel %vm3094_vm6, %v3643_v8, %v3840_v46  ;;  %v3182_v55 = vsel %vm3094_vm6, %v2979_v56, %v3181_v18  ;;  %v2478_v47 = vrot.slane %v9258_v53, %v10375_v41  ;;  %v2485_v43 = vrot.slane %v2471_v32, %v10375_v41  ;;  %v11553_v4 = vpop.eup %9265 }
 0x1f6   :  { %v3842_v44 = vsel %vm3096_vm7, %v3647_v52, %v3841_v39  ;;  %v3183_v63 = vsel %vm3096_vm7, %v2983_v25, %v3182_v55  ;;  %v2522_v7 = vcombine.high %v9260_v23, %v9260_v23  ;;  %v11551_v31 = vrot.slane %v9260_v23, %v10375_v41 }
 0x1f7   :  { %v11548_v51 = vsel %vm3098_vm8, %v3651_v26, %v3842_v44  ;;  %v11556_v9 = vsel %vm3098_vm8, %v2987_v49, %v3183_v63  ;;  %v2486_v19 = vcombine.high %v2478_v47, %v2478_v47  ;;  %v2487_v56 = vcombine.high %v2485_v43, %v2485_v43 }
 0x1f8   :  { %v2995_v21 = vrot.slane %v2478_v47, %v10380_v24  ;;  %v3003_v11 = vrot.slane %v2485_v43, %v10380_v24  ;;  %v3663_v52 = vrot.slane %v2478_v47, %v10383_v5  ;;  %v3671_v40 = vrot.slane %v2485_v43, %v10383_v5 }
 0x1f9   :  { %v11563_v58 = vrot.slane %v2522_v7, %v10375_v41  ;;  %v2999_v10 = vrot.slane %v2486_v19, %v10380_v24  ;;  %v3007_v62 = vrot.slane %v2487_v56, %v10380_v24  ;;  %v3667_v25 = vrot.slane %v2486_v19, %v10383_v5 }
 0x1fa   :  { %v3675_v37 = vrot.slane %v2487_v56, %v10383_v5  ;;  %v3015_v53 = vrot.slane %v2503_v36, %v10380_v24  ;;  %v3019_v49 = vrot.slane %v11515_v60, %v10380_v24  ;;  %v3023_v48 = vrot.slane %v11538_v54, %v10380_v24 }
 0x1fb   :  { %v3845_v13 = vsel %vm3088_vm3, %v3663_v52, %v3659_v15  ;;  %v3679_v1 = vrot.slane %v11506_v38, %v10383_v5  ;;  %v3683_v50 = vrot.slane %v2503_v36, %v10383_v5  ;;  %v3186_v6 = vsel %vm3088_vm3, %v2999_v10, %v2995_v21 }
 0x1fc   :  { %v3846_v35 = vsel %vm3090_vm4, %v3667_v25, %v3845_v13  ;;  %v3687_v3 = vrot.slane %v11515_v60, %v10383_v5  ;;  %v3691_v45 = vrot.slane %v11538_v54, %v10383_v5  ;;  %v3187_v28 = vsel %vm3090_vm4, %v3003_v11, %v3186_v6 }
 0x1fd   :  { %v3847_v23 = vsel %vm3092_vm5, %v3671_v40, %v3846_v35  ;;  %v3188_v61 = vsel %vm3092_vm5, %v3007_v62, %v3187_v28  ;;  %v2537_v8 = vcombine.high %v11551_v31, %v11551_v31  ;;  %v11592_v32 = vcombine.high %v11563_v58, %v11563_v58 }
 0x1fe   :  { %v3848_v38 = vsel %vm3094_vm6, %v3675_v37, %v3847_v23  ;;  %v3189_v26 = vsel %vm3094_vm6, %v3011_v12, %v3188_v61  ;;  %v3043_v0 = vrot.slane %v11551_v31, %v10380_v24  ;;  %v2505_v15 = vcombine.high %v11521_v22, %v11521_v22 }
 0x1ff   :  { %v3849_v27 = vsel %vm3096_vm7, %v3679_v1, %v3848_v38  ;;  %v3190_v33 = vsel %vm3096_vm7, %v3015_v53, %v3189_v26  ;;  %v2512_v36 = vrot.slane %v11521_v22, %v10375_v41  ;;  %v2556_v18 = vcombine.high %v9264_v14, %v9264_v14 }
 0x200   :  { %v3850_v46 = vsel %vm3098_vm8, %v3683_v50, %v3849_v27  ;;  %v3191_v39 = vsel %vm3098_vm8, %v3019_v49, %v3190_v33  ;;  %v3051_v12 = vrot.slane %v11563_v58, %v10380_v24  ;;  %v3711_v55 = vrot.slane %v11551_v31, %v10383_v5 }
 0x201   :  { %v2519_v44 = vrot.slane %v2505_v15, %v10375_v41  ;;  %v2520_v47 = vcombine.high %v2512_v36, %v2512_v36  ;;  %v3695_v43 = vrot.slane %v2512_v36, %v10383_v5  ;;  %v11612_v63 = vrot.slane %v9264_v14, %v10375_v41 }
 0x202   :  { %v11615_v7 = vrot.slane %v2556_v18, %v10375_v41  ;;  %v3027_v19 = vrot.slane %v2512_v36, %v10380_v24  ;;  %v3047_v40 = vrot.slane %v2537_v8, %v10380_v24  ;;  %v2539_v25 = vcombine.high %v11553_v4, %v11553_v4 }
 0x203   :  { %v2521_v22 = vcombine.high %v2519_v44, %v2519_v44  ;;  %v3035_v56 = vrot.slane %v2519_v44, %v10380_v24  ;;  %v3703_v21 = vrot.slane %v2519_v44, %v10383_v5  ;;  %v3031_v31 = vrot.slane %v2520_v47, %v10380_v24 }
 0x204   :  { %v3699_v11 = vrot.slane %v2520_v47, %v10383_v5  ;;  %v3852_v52 = vsel %vm3088_vm3, %v3695_v43, %v3691_v45  ;;  %v11625_v14 = vcombine.high %v11615_v7, %v11615_v7  ;;  %v3055_v37 = vrot.slane %v11592_v32, %v10380_v24 }
 0x205   :  { %v3039_v10 = vrot.slane %v2521_v22, %v10380_v24  ;;  %v3707_v62 = vrot.slane %v2521_v22, %v10383_v5  ;;  %v3715_v53 = vrot.slane %v2537_v8, %v10383_v5  ;;  %v3193_v49 = vsel %vm3088_vm3, %v3031_v31, %v3027_v19 }
 0x206   :  { %v3853_v13 = vsel %vm3090_vm4, %v3699_v11, %v3852_v52  ;;  %v3719_v1 = vrot.slane %v11563_v58, %v10383_v5  ;;  %v3723_v50 = vrot.slane %v11592_v32, %v10383_v5  ;;  %v3194_v6 = vsel %vm3090_vm4, %v3035_v56, %v3193_v49 }
 0x207   :  { %v3854_v35 = vsel %vm3092_vm5, %v3703_v21, %v3853_v13  ;;  %v3195_v45 = vsel %vm3092_vm5, %v3039_v10, %v3194_v6  ;;  %v2571_v23 = vcombine.high %v11612_v63, %v11612_v63  ;;  %v3755_v61 = vrot.slane %v11625_v14, %v10383_v5  ;;  %v3905_v6 = vld [vmem:[#allocation2] sm:$0xff] }
 0x208   :  { %v3855_v28 = vsel %vm3094_vm6, %v3707_v62, %v3854_v35  ;;  %v3196_v38 = vsel %vm3094_vm6, %v3043_v0, %v3195_v45  ;;  %v2546_v8 = vrot.slane %v11553_v4, %v10375_v41  ;;  %v2553_v32 = vrot.slane %v2539_v25, %v10375_v41  ;;  %v4789_v45 = vld [vmem:[#allocation2 + $0x2] sm:$0xff] }
 0x209   :  { %v3856_v58 = vsel %vm3096_vm7, %v3711_v55, %v3855_v28  ;;  %v3197_v26 = vsel %vm3096_vm7, %v3047_v40, %v3196_v38  ;;  %3902 = vst.msk [vmem:[#allocation3 + $0x88] sm:$0x1] %vm2573_vm2, %v3755_v61  ;;  %v3837_v15 = vsel %vm3100_vm9, %v3623_v34, %v11487_v2  ;;  %v3178_v4 = vsel %vm3100_vm9, %v2959_v29, %v11494_v57  ;;  %v3906_v28 = vld [vmem:[#allocation2 + $0x8] sm:$0xff]  ;;  %v3907_v61 = vld [vmem:[#allocation2 + $0x10] sm:$0xff]  ;;  %v9332_v38 = vld [vmem:[%s13386_s4 + $0x78] sm:$0xff] }
 0x20a   :  { %v3857_v27 = vsel %vm3098_vm8, %v3715_v53, %v3856_v58  ;;  %v3198_v0 = vsel %vm3098_vm8, %v3051_v12, %v3197_v26  ;;  %v2554_v33 = vcombine.high %v2546_v8, %v2546_v8  ;;  %v2555_v36 = vcombine.high %v2553_v32, %v2553_v32  ;;  %3897 = vst.msk [vmem:[#allocation3 + $0x60] sm:$0xff] %vm3223_vm10, %v3837_v15  ;;  %v4790_v58 = vld [vmem:[#allocation2 + $0xa] sm:$0xff]  ;;  %v3908_v26 = vld [vmem:[#allocation2 + $0x18] sm:$0xff]  ;;  %v3909_v15 = vld [vmem:[#allocation2 + $0x20] sm:$0xff] }
 0x20b   :  { %v3059_v18 = vrot.slane %v2546_v8, %v10380_v24  ;;  %3235 = vst.msk [vmem:[#allocation2 + $0x61] sm:$0xff] %vm3223_vm10, %v3178_v4  ;;  %v3067_v16 = vrot.slane %v2553_v32, %v10380_v24  ;;  %v3727_v34 = vrot.slane %v2546_v8, %v10383_v5  ;;  %v3735_v2 = vrot.slane %v2553_v32, %v10383_v5  ;;  %v4577_v8 = vld [vmem:[%s13386_s4 + $0x68] sm:$0xff]  ;;  %v4791_v32 = vld [vmem:[#allocation2 + $0x12] sm:$0xff]  ;;  %v4792_v4 = vld [vmem:[#allocation2 + $0x1a] sm:$0xff] }
 0x20c   :  { %v3844_v42 = vsel %vm3100_vm9, %v3655_v30, %v11548_v51  ;;  %v3063_v29 = vrot.slane %v2554_v33, %v10380_v24  ;;  %v3071_v57 = vrot.slane %v2555_v36, %v10380_v24  ;;  %v3731_v12 = vrot.slane %v2554_v33, %v10383_v5  ;;  %v3910_v33 = vld [vmem:[#allocation2 + $0x28] sm:$0xff] }
 0x20d   :  { %v3739_v55 = vrot.slane %v2555_v36, %v10383_v5  ;;  %3898 = vst.msk [vmem:[#allocation3 + $0x68] sm:$0xff] %vm3223_vm10, %v3844_v42  ;;  %v3859_v44 = vsel %vm3088_vm3, %v3727_v34, %v3723_v50  ;;  %v3185_v17 = vsel %vm3100_vm9, %v2991_v59, %v11556_v9  ;;  %v3851_v30 = vsel %vm3100_vm9, %v3687_v3, %v3850_v46  ;;  %v3911_v36 = vld [vmem:[#allocation2 + $0x30] sm:$0xff]  ;;  %v3912_v34 = vld [vmem:[#allocation2 + $0x38] sm:$0xff] }
 0x20e   :  { %v3192_v51 = vsel %vm3100_vm9, %v3023_v48, %v3191_v39  ;;  %v3200_v47 = vsel %vm3088_vm3, %v3063_v29, %v3059_v18  ;;  %v3860_v43 = vsel %vm3090_vm4, %v3731_v12, %v3859_v44  ;;  %3236 = vst.msk [vmem:[#allocation2 + $0x69] sm:$0xff] %vm3223_vm10, %v3185_v17  ;;  %3899 = vst.msk [vmem:[#allocation3 + $0x70] sm:$0xff] %vm3223_vm10, %v3851_v30  ;;  %v4794_v18 = vld [vmem:[#allocation2 + $0x2a] sm:$0xff]  ;;  %v4796_v42 = vld [vmem:[#allocation2 + $0x3a] sm:$0xff] }
 0x20f   :  { %3237 = vst.msk [vmem:[#allocation2 + $0x71] sm:$0xff] %vm3223_vm10, %v3192_v51  ;;  %v3858_v20 = vsel %vm3100_vm9, %v3719_v1, %v3857_v27  ;;  %v3199_v60 = vsel %vm3100_vm9, %v3055_v37, %v3198_v0  ;;  %v3075_v59 = vrot.slane %v11612_v63, %v10380_v24  ;;  %v3743_v54 = vrot.slane %v11612_v63, %v10383_v5  ;;  %v4576_v27 = vld [vmem:[%s13386_s4 + $0x60] sm:$0xff]  ;;  %v4797_v29 = vld [vmem:[#allocation2 + $0x4a] sm:$0xff]  ;;  %v3915_v12 = vld [vmem:[#allocation2 + $0x58] sm:$0xff] }
 0x210   :  { %v3201_v9 = vsel %vm3090_vm4, %v3067_v16, %v3200_v47  ;;  %v3861_v48 = vsel %vm3092_vm5, %v3735_v2, %v3860_v43  ;;  %3900 = vst.msk [vmem:[#allocation3 + $0x78] sm:$0xff] %vm3223_vm10, %v3858_v20  ;;  %3238 = vst.msk [vmem:[#allocation2 + $0x79] sm:$0xff] %vm3223_vm10, %v3199_v60  ;;  %v3079_v3 = vrot.slane %v2571_v23, %v10380_v24  ;;  %v4793_v0 = vld [vmem:[#allocation2 + $0x22] sm:$0xff]  ;;  %v4795_v16 = vld [vmem:[#allocation2 + $0x32] sm:$0xff] }
 0x211   :  { %v3747_v46 = vrot.slane %v2571_v23, %v10383_v5  ;;  %v3202_v39 = vsel %vm3092_vm5, %v3071_v57, %v3201_v9  ;;  %v3862_v22 = vsel %vm3094_vm6, %v3739_v55, %v3861_v48  ;;  %v3083_v19 = vrot.slane %v11615_v7, %v10380_v24  ;;  %v3936_v31 = vld [vmem:[#allocation3 + $0x60] sm:$0xff]  ;;  %v3913_v2 = vld [vmem:[#allocation2 + $0x48] sm:$0xff] }
 0x212   :  { %v3751_v63 = vrot.slane %v11615_v7, %v10383_v5  ;;  %v3203_v56 = vsel %vm3094_vm6, %v3075_v59, %v3202_v39  ;;  %v3863_v21 = vsel %vm3096_vm7, %v3743_v54, %v3862_v22  ;;  %v4342_v11 = vld [vmem:[#allocation2 + $0x61] sm:$0xff]  ;;  %v3087_v52 = vrot.slane %v11625_v14, %v10380_v24  ;;  %8923 = vmatmul.mubr.msk.f32.gmra.mxu1 %vm3223_vm10, %v3936_v31  ;;  %v4578_v23 = vld [vmem:[%s13386_s4 + $0x70] sm:$0xff] }
 0x213   :  { %v3204_v40 = vsel %vm3096_vm7, %v3079_v3, %v3203_v56  ;;  %v3864_v10 = vsel %vm3098_vm8, %v3747_v46, %v3863_v21  ;;  %8987 = vmatmul.mubr.msk.f32.gmra.mxu0 %vm3223_vm10, %v4342_v11  ;;  %v3914_v57 = vld [vmem:[#allocation2 + $0x50] sm:$0xff]  ;;  %v4799_v44 = vld [vmem:[#allocation2 + $0x5a] sm:$0xff] }
 0x214   :  { %v3205_v62 = vsel %vm3098_vm8, %v3083_v19, %v3204_v40  ;;  %v3937_v7 = vld [vmem:[#allocation3 + $0x68] sm:$0xff]  ;;  %v3865_v25 = vsel %vm3100_vm9, %v3751_v63, %v3864_v10  ;;  %v3916_v17 = vld [vmem:[#allocation2 + $0x60] sm:$0xff]  ;;  %v4563_v39 = vld [vmem:[#allocation3 + $0x19] sm:$0xff] }
 0x215   :  { %8925 = vmatprep.mubr.msk.f32.mxu1 %vm3223_vm10, %v3937_v7  ;;  %3901 = vst.msk [vmem:[#allocation3 + $0x80] sm:$0xff] %vm3223_vm10, %v3865_v25  ;;  %v3206_v37 = vsel %vm3100_vm9, %v3087_v52, %v3205_v62  ;;  %v4343_v14 = vld [vmem:[#allocation2 + $0x69] sm:$0xff]  ;;  %v3938_v53 = vld [vmem:[#allocation3 + $0x70] sm:$0xff]  ;;  %v4798_v55 = vld [vmem:[#allocation2 + $0x52] sm:$0xff]  ;;  %v13501_v25 = vmov 0.0  }
 0x216   :  { %v4344_v49 = vld [vmem:[#allocation2 + $0x71] sm:$0xff]  ;;  %3239 = vst.msk [vmem:[#allocation2 + $0x81] sm:$0xff] %vm3223_vm10, %v3206_v37  ;;  %8989 = vmatprep.mubr.msk.f32.mxu0 %vm3223_vm10, %v4343_v14  ;;  %8926 = vmatmul.mubr.msk.f32.gmra.mxu1 %vm3223_vm10, %v3938_v53  ;;  %v3917_v30 = vld [vmem:[#allocation2 + $0x68] sm:$0xff]  ;;  %v4561_v3 = vld [vmem:[#allocation3 + $0x9] sm:$0xff] }
 0x217   :  { %v3939_v13 = vld [vmem:[#allocation3 + $0x78] sm:$0xff]  ;;  %v4345_v1 = vld [vmem:[#allocation2 + $0x79] sm:$0xff]  ;;  %8990 = vmatmul.mubr.msk.f32.gmra.mxu0 %vm3223_vm10, %v4344_v49  ;;  %v3918_v43 = vld [vmem:[#allocation2 + $0x70] sm:$0xff]  ;;  %5346 = vst.msk [vmem:[#allocation4] sm:$0x1] %vm5345_vm12, %v13501_v25 }
 0x218   :  { %8928 = vmatprep.mubr.msk.f32.mxu1 %vm3223_vm10, %v3939_v13  ;;  %8992 = vmatprep.mubr.msk.f32.mxu0 %vm3223_vm10, %v4345_v1  ;;  %v4800_v51 = vld [vmem:[#allocation2 + $0x62] sm:$0xff]  ;;  %v4801_v47 = vld [vmem:[#allocation2 + $0x6a] sm:$0xff]  ;;  %v3919_v20 = vld [vmem:[#allocation2 + $0x78] sm:$0xff]  ;;  %5347 = vst.msk [vmem:[#allocation4 + $0x28] sm:$0x1] %vm5345_vm12, %v13501_v25 }
 0x219   :  { %v4802_v60 = vld [vmem:[#allocation2 + $0x72] sm:$0xff]  ;;  %v4562_v46 = vld [vmem:[#allocation3 + $0x11] sm:$0xff]  ;;  %v4567_v56 = vld [vmem:[#allocation3 + $0x39] sm:$0xff]  ;;  %5677 = vst.msk [vmem:[#allocation4 + $0x21] sm:$0x1] %vm5345_vm12, %v13501_v25 }
 0x21a   :  { %v4560_v9 = vld [vmem:[#allocation3 + $0x1] sm:$0xff]  ;;  %v4565_v19 = vld [vmem:[#allocation3 + $0x29] sm:$0xff]  ;;  %v4566_v63 = vld [vmem:[#allocation3 + $0x31] sm:$0xff]  ;;  %5678 = vst.msk [vmem:[#allocation4 + $0x49] sm:$0x1] %vm5345_vm12, %v13501_v25 }
 0x21b   :  { %v4564_v22 = vld [vmem:[#allocation3 + $0x21] sm:$0xff]  ;;  %v4568_v21 = vld [vmem:[#allocation3 + $0x49] sm:$0xff]  ;;  %v4569_v31 = vld [vmem:[#allocation3 + $0x51] sm:$0xff]  ;;  %5679 = vst.msk [vmem:[#allocation5] sm:$0x1] %vm5345_vm12, %v13501_v25 }
 0x21c   :  { %v3940_v50 = vld [vmem:[#allocation3 + $0x80] sm:$0xff]  ;;  %v4572_v40 = vld [vmem:[#allocation3 + $0x69] sm:$0xff]  ;;  %v4573_v10 = vld [vmem:[#allocation3 + $0x71] sm:$0xff]  ;;  %5680 = vst.msk [vmem:[#allocation5 + $0x28] sm:$0x1] %vm5345_vm12, %v13501_v25 }
 0x21d   :  { %8929 = vmatmul.mubr.msk.f32.gmra.mxu1 %vm3223_vm10, %v3940_v50  ;;  %v4346_v35 = vld [vmem:[#allocation2 + $0x81] sm:$0xff]  ;;  %v4570_v11 = vld [vmem:[#allocation3 + $0x59] sm:$0xff]  ;;  %v4571_v52 = vld [vmem:[#allocation3 + $0x61] sm:$0xff] }
 0x21e   :  { %8939 = vmatprep.mubr.msk.f32.mxu1 %vm3223_vm10, %v3905_v6  ;;  %8993 = vmatmul.mubr.msk.f32.gmra.mxu0 %vm3223_vm10, %v4346_v35  ;;  %v4803_v59 = vld [vmem:[#allocation2 + $0x7a] sm:$0xff]  ;;  %v4804_v48 = vld [vmem:[#allocation2 + $0x82] sm:$0xff]  ;;  %v4575_v7 = vld [vmem:[#allocation3 + $0x81] sm:$0xff] }
 0x21f   :  { %9035 = vmatprep.mubr.msk.f32.mxu0 %vm3223_vm10, %v4789_v45  ;;  %v3920_v54 = vld [vmem:[#allocation2 + $0x80] sm:$0xff]  ;;  %v4574_v62 = vld [vmem:[#allocation3 + $0x79] sm:$0xff] }
 0x221   :  { %8940 = vmatmul.mubr.msk.f32.vlgmr.msra.gmra.mxu1 %vm3223_vm10, %v3906_v28 }
 0x222   :  { %8942 = vmatprep.mubr.msk.f32.mxu1 %vm3223_vm10, %v3907_v61  ;;  %8996 = vmatpush3.msra.mxu1 %v9332_v38 }
 0x223   :  { %9036 = vmatmul.mubr.msk.f32.vlgmr.msra.gmra.mxu0 %vm3223_vm10, %v4790_v58  ;;  %8997 = vmatprep.subr.mxu1 %v4578_v23 }
 0x224   :  { %9038 = vmatprep.mubr.msk.f32.mxu0 %vm3223_vm10, %v4791_v32  ;;  %8998 = vmatpush3.msra.mxu1 %v4578_v23 }
 0x225   :  { %8943 = vmatmul.mubr.msk.f32.gmra.mxu1 %vm3223_vm10, %v3908_v26  ;;  %8999 = vmatprep.subr.mxu1 %v4577_v8  ;;  %v6045_v26 = vld [vmem:[%s13388_s6 + $0x78] sm:$0xff] }
 0x226   :  { %8945 = vmatprep.mubr.msk.f32.mxu1 %vm3223_vm10, %v3909_v15  ;;  %9000 = vmatpush3.msra.mxu1 %v4577_v8 }
 0x227   :  { %9039 = vmatmul.mubr.msk.f32.gmra.mxu0 %vm3223_vm10, %v4792_v4  ;;  %9001 = vmatprep.subr.mxu1 %v4576_v27 }
 0x228   :  { %9041 = vmatprep.mubr.msk.f32.mxu0 %vm3223_vm10, %v4793_v0  ;;  %9002 = vmatpush3.msra.mxu1 %v4576_v27 }
 0x229   :  { %8946 = vmatmul.mubr.msk.f32.gmra.mxu1 %vm3223_vm10, %v3910_v33  ;;  %9059 = vmatprep.subr.mxu1 %v6045_v26 }
 0x22a   :  { %8948 = vmatprep.mubr.msk.f32.mxu1 %vm3223_vm10, %v3911_v36  ;;  %v6319_v36 = vld [vmem:[%s13388_s6 + $0xb8] sm:$0xff] }
 0x22b   :  { %9042 = vmatmul.mubr.msk.f32.gmra.mxu0 %vm3223_vm10, %v4794_v18  ;;  %9115 = vmatprep.subr.mxu0 %v6319_v36 }
 0x22c   :  { %9044 = vmatprep.mubr.msk.f32.mxu0 %vm3223_vm10, %v4795_v16  ;;  %v6044_v16 = vld [vmem:[%s13388_s6 + $0x70] sm:$0xff]  ;;  %9116 = vmatpush3.msra.mxu0 %v6319_v36 }
 0x22d   :  { %8949 = vmatmul.mubr.msk.f32.gmra.mxu1 %vm3223_vm10, %v3912_v34 }
 0x22e   :  { %8951 = vmatprep.mubr.msk.f32.mxu1 %vm3223_vm10, %v3913_v2  ;;  %v6318_v2 = vld [vmem:[%s13388_s6 + $0xb0] sm:$0xff] }
 0x22f   :  { %9045 = vmatmul.mubr.msk.f32.gmra.mxu0 %vm3223_vm10, %v4796_v42  ;;  %9117 = vmatprep.subr.mxu0 %v6318_v2 }
 0x230   :  { %9047 = vmatprep.mubr.msk.f32.mxu0 %vm3223_vm10, %v4797_v29  ;;  %v6043_v29 = vld [vmem:[%s13388_s6 + $0x68] sm:$0xff]  ;;  %9118 = vmatpush3.msra.mxu0 %v6318_v2 }
 0x231   :  { %8952 = vmatmul.mubr.msk.f32.gmra.mxu1 %vm3223_vm10, %v3914_v57 }
 0x232   :  { %8954 = vmatprep.mubr.msk.f32.mxu1 %vm3223_vm10, %v3915_v12  ;;  %v6317_v12 = vld [vmem:[%s13388_s6 + $0xa8] sm:$0xff] }
 0x233   :  { %9048 = vmatmul.mubr.msk.f32.gmra.mxu0 %vm3223_vm10, %v4798_v55  ;;  %9119 = vmatprep.subr.mxu0 %v6317_v12 }
 0x234   :  { %9050 = vmatprep.mubr.msk.f32.mxu0 %vm3223_vm10, %v4799_v44  ;;  %v6042_v44 = vld [vmem:[%s13388_s6 + $0x60] sm:$0xff]  ;;  %9120 = vmatpush3.msra.mxu0 %v6317_v12 }
 0x235   :  { %8955 = vmatmul.mubr.msk.f32.gmra.mxu1 %vm3223_vm10, %v3916_v17  ;;  %v6316_v17 = vld [vmem:[%s13388_s6 + $0xa0] sm:$0xff] }
 0x236   :  { %8957 = vmatprep.mubr.msk.f32.mxu1 %vm3223_vm10, %v3917_v30  ;;  %9121 = vmatprep.subr.mxu0 %v6316_v17 }
 0x237   :  { %9051 = vmatmul.mubr.msk.f32.gmra.mxu0 %vm3223_vm10, %v4800_v51  ;;  %v6041_v51 = vld [vmem:[%s13388_s6 + $0x58] sm:$0xff] }
 0x238   :  { %9053 = vmatprep.mubr.msk.f32.mxu0 %vm3223_vm10, %v4801_v47  ;;  %9122 = vmatpush3.msra.mxu0 %v6316_v17 }
 0x239   :  { %8958 = vmatmul.mubr.msk.f32.gmra.mxu1 %vm3223_vm10, %v3918_v43  ;;  %v6315_v43 = vld [vmem:[%s13388_s6 + $0x98] sm:$0xff] }
 0x23a   :  { %8960 = vmatprep.mubr.msk.f32.mxu1 %vm3223_vm10, %v3919_v20  ;;  %9123 = vmatprep.subr.mxu0 %v6315_v43 }
 0x23b   :  { %9054 = vmatmul.mubr.msk.f32.gmra.mxu0 %vm3223_vm10, %v4802_v60  ;;  %v6040_v60 = vld [vmem:[%s13388_s6 + $0x50] sm:$0xff] }
 0x23c   :  { %9056 = vmatprep.mubr.msk.f32.mxu0 %vm3223_vm10, %v4803_v59  ;;  %9124 = vmatpush3.msra.mxu0 %v6315_v43 }
 0x23d   :  { %8961 = vmatmul.mubr.msk.f32.gmra.mxu1 %vm3223_vm10, %v3920_v54  ;;  %v6314_v54 = vld [vmem:[%s13388_s6 + $0x90] sm:$0xff] }
 0x23e   :  { %9003 = vmatprep.mubr.msk.f32.mxu1 %vm3223_vm10, %v4560_v9  ;;  %9125 = vmatprep.subr.mxu0 %v6314_v54 }
 0x23f   :  { %9057 = vmatmul.mubr.msk.f32.gmra.mxu0 %vm3223_vm10, %v4804_v48  ;;  %v6039_v48 = vld [vmem:[%s13388_s6 + $0x48] sm:$0xff] }
 0x240   :  { %9126 = vmatpush3.msra.mxu0 %v6314_v54 }
 0x241   :  { %9004 = vmatmul.mubr.msk.f32.vlgmr.msra.gmra.mxu1 %vm3223_vm10, %v4561_v3  ;;  %v6313_v3 = vld [vmem:[%s13388_s6 + $0x88] sm:$0xff] }
 0x242   :  { %9006 = vmatprep.mubr.msk.f32.mxu1 %vm3223_vm10, %v4562_v46  ;;  %9060 = vmatpush3.msra.mxu1 %v6045_v26 }
 0x243   :  { %9061 = vmatprep.subr.mxu1 %v6044_v16  ;;  %9127 = vmatprep.subr.mxu0 %v6313_v3 }
 0x244   :  { %9062 = vmatpush3.msra.mxu1 %v6044_v16  ;;  %9128 = vmatpush3.msra.mxu0 %v6313_v3 }
 0x245   :  { %9007 = vmatmul.mubr.msk.f32.gmra.mxu1 %vm3223_vm10, %v4563_v39  ;;  %9063 = vmatprep.subr.mxu1 %v6043_v29  ;;  %v6038_v39 = vld [vmem:[%s13388_s6 + $0x40] sm:$0xff] }
 0x246   :  { %9009 = vmatprep.mubr.msk.f32.mxu1 %vm3223_vm10, %v4564_v22  ;;  %9064 = vmatpush3.msra.mxu1 %v6043_v29  ;;  %v11928_v29 = vld [vmem:[%s13388_s6 + $0x38] sm:$0xff] }
 0x247   :  { %9065 = vmatprep.subr.mxu1 %v6042_v44 }
 0x248   :  { %9066 = vmatpush3.msra.mxu1 %v6042_v44 }
 0x249   :  { %9010 = vmatmul.mubr.msk.f32.gmra.mxu1 %vm3223_vm10, %v4565_v19  ;;  %9067 = vmatprep.subr.mxu1 %v6041_v51  ;;  %v6312_v19 = vld [vmem:[%s13388_s6 + $0x80] sm:$0xff] }
 0x24a   :  { %9012 = vmatprep.mubr.msk.f32.mxu1 %vm3223_vm10, %v4566_v63  ;;  %9068 = vmatpush3.msra.mxu1 %v6041_v51 }
 0x24b   :  { %9069 = vmatprep.subr.mxu1 %v6040_v60  ;;  %9129 = vmatprep.subr.mxu0 %v6312_v19 }
 0x24c   :  { %9070 = vmatpush3.msra.mxu1 %v6040_v60  ;;  %9130 = vmatpush3.msra.mxu0 %v6312_v19 }
 0x24d   :  { %9013 = vmatmul.mubr.msk.f32.gmra.mxu1 %vm3223_vm10, %v4567_v56  ;;  %9071 = vmatprep.subr.mxu1 %v6039_v48 }
 0x24e   :  { %9015 = vmatprep.mubr.msk.f32.mxu1 %vm3223_vm10, %v4568_v21  ;;  %9072 = vmatpush3.msra.mxu1 %v6039_v48 }
 0x24f   :  { %9073 = vmatprep.subr.mxu1 %v6038_v39 }
 0x250   :  { %9074 = vmatpush3.msra.mxu1 %v6038_v39 }
 0x251   :  { %9016 = vmatmul.mubr.msk.f32.gmra.mxu1 %vm3223_vm10, %v4569_v31  ;;  %9087 = vmatprep.subr.mxu1 %v11928_v29 }
 0x252   :  { %9018 = vmatprep.mubr.msk.f32.mxu1 %vm3223_vm10, %v4570_v11 }
 0x254   :  { %v11814_v37 = vpop.f32.mrf.mxu1 }
 0x255   :  { %9019 = vmatmul.mubr.msk.f32.gmra.mxu1 %vm3223_vm10, %v4571_v52  ;;  %v11822_v13 = vpop.f32.mrf.mxu0 }
 0x256   :  { %9021 = vmatprep.mubr.msk.f32.mxu1 %vm3223_vm10, %v4572_v40  ;;  %v11816_v14 = vpop.f32.mrf.mxu1 }
 0x257   :  { %v11826_v50 = vpop.f32.mrf.mxu0 }
 0x259   :  { %9022 = vmatmul.mubr.msk.f32.gmra.mxu1 %vm3223_vm10, %v4573_v10  ;;  %v11818_v53 = vpop.f32.mrf.mxu1  ;;  %v11830_v35 = vpop.f32.mrf.mxu0 }
 0x25a   :  { %9024 = vmatprep.mubr.msk.f32.mxu1 %vm3223_vm10, %v4574_v62 }
 0x25b   :  { %v11820_v49 = vpop.f32.mrf.mxu1  ;;  %v11834_v28 = vpop.f32.mrf.mxu0 }
 0x25d   :  { %9025 = vmatmul.mubr.msk.f32.gmra.mxu1 %vm3223_vm10, %v4575_v7 }
 0x2a1   :  { %v11824_v1 = vpop.f32.mrf.mxu1 }
 0x2a2   :  { %v11838_v61 = vpop.f32.mrf.mxu0 }
 0x2a3   :  { %v11828_v6 = vpop.f32.mrf.mxu1 }
 0x2a4   :  { %v11842_v58 = vpop.f32.mrf.mxu0 }
 0x2a5   :  { %v11832_v45 = vpop.f32.mrf.mxu1 }
 0x2a6   :  { %v11846_v32 = vpop.f32.mrf.mxu0 }
 0x2a7   :  { %v11836_v23 = vpop.f32.mrf.mxu1 }
 0x2a8   :  { %v11855_v4 = vpop.f32.mrf.mxu0 }
 0x2a9   :  { %v11840_v38 = vpop.f32.mrf.mxu1 }
 0x2aa   :  { %v11859_v33 = vpop.f32.mrf.mxu0 }
 0x2ab   :  { %v11844_v8 = vpop.f32.mrf.mxu1 }
 0x2ac   :  { %v11869_v34 = vpop.f32.mrf.mxu0 }
 0x2d2   :  { %v11851_v27 = vpop.f32.mrf.mxu1 }
 0x2d3   :  { %v11879_v57 = vpop.f32.mrf.mxu0 }
 0x2d4   :  { %v11853_v15 = vpop.f32.mrf.mxu1 }
 0x2d5   :  { %v4515_v47 = vpop.f32.mrf.mxu0 }
 0x2d6   :  { %v11857_v0 = vpop.f32.mrf.mxu1 }
 0x2d7   :  { %v8991_v59 = vpop.f32.mrf.mxu0 }
 0x2d8   :  { %v11864_v18 = vpop.f32.mrf.mxu1 }
 0x2d9   :  { %v4525_v22 = vpop.f32.mrf.mxu0 }
 0x2dd   :  { %v11874_v42 = vpop.f32.mrf.mxu1 }
 0x2de   :  { %v8994_v56 = vpop.f32.mrf.mxu0 }
 0x2df   :  { %v11884_v55 = vpop.f32.mrf.mxu1 }
 0x2e0   :  { %v4535_v11 = vpop.f32.mrf.mxu0 }
 0x2e1   :  { %v8941_v30 = vpop.f32.mrf.mxu1 }
 0x2e2   :  { %v4258_v54 = vadd.f32 %v8941_v30, %v11814_v37 }
 0x2e3   :  { %v4252_v20 = vpop.f32.mrf.mxu1  ;;  %v9037_v10 = vpop.f32.mrf.mxu0 }
 0x2e4   :  { %v4253_v3 = vadd.f32 %v4252_v20, %v11816_v14 }
 0x2e5   :  { %v8944_v9 = vpop.f32.mrf.mxu1  ;;  %v4923_v36 = vpop.f32.mrf.mxu0 }
 0x2e6   :  { %v4544_v14 = vadd.f32 %v11826_v50, %v4253_v3 }
 0x2e7   :  { %v4262_v46 = vpop.f32.mrf.mxu1 }
 0x2e8   :  { %v4263_v30 = vadd.f32 %v4262_v46, %v11820_v49 }
 0x2e9   :  { %v8947_v63 = vpop.f32.mrf.mxu1 }
 0x2eb   :  { %v4272_v21 = vpop.f32.mrf.mxu1 }
 0x2ed   :  { %v8950_v31 = vpop.f32.mrf.mxu1 }
 0x2ef   :  { %v11916_v52 = vpop.f32.mrf.mxu1 }
 0x2f1   :  { %v11918_v40 = vpop.f32.mrf.mxu1 }
 0x2f3   :  { %v4292_v62 = vpop.f32.mrf.mxu1 }
 0x2f4   :  { %v4293_v7 = vadd.f32 %v4292_v62, %v11844_v8  ;;  %v11938_v8 = vld [vmem:[%s13388_s6 + $0x138] sm:$0xff] }
 0x2f5   :  { %v8956_v26 = vpop.f32.mrf.mxu1  ;;  %9171 = vmatprep.subr.mxu0 %v11938_v8 }
 0x2f6   :  { %v4308_v16 = vadd.f32 %v8956_v26, %v11851_v27  ;;  %v11923_v2 = vadd.f32 %v11869_v34, %v4293_v7  ;;  %v9040_v34 = vpop.f32.mrf.mxu0  ;;  %v4545_v26 = vadd.f32 %v11822_v13, %v4258_v54 }
 0x2f7   :  { %v4302_v12 = vpop.f32.mrf.mxu1 }
 0x2f8   :  { %v4303_v44 = vadd.f32 %v4302_v12, %v11853_v15  ;;  %v11933_v17 = vadd.f32 %v11879_v57, %v4308_v16  ;;  %v4933_v39 = vpop.f32.mrf.mxu0 }
 0x2f9   :  { %v8959_v27 = vpop.f32.mrf.mxu1 }
 0x2fa   :  { %v4318_v51 = vadd.f32 %v8959_v27, %v11857_v0  ;;  %v11942_v43 = vadd.f32 %v4515_v47, %v4303_v44  ;;  %v4268_v0 = vadd.f32 %v8944_v9, %v11818_v53  ;;  %v11965_v53 = vld [vmem:[%s13389_s5] ss:$0 sm:$0xff] }
 0x2fb   :  { %v4312_v60 = vpop.f32.mrf.mxu1 }
 0x2fc   :  { %v4313_v15 = vadd.f32 %v4312_v60, %v11864_v18  ;;  %v11946_v57 = vadd.f32 %v8991_v59, %v4318_v51  ;;  %v9043_v59 = vpop.f32.mrf.mxu0 }
 0x2fd   :  { %v8962_v48 = vpop.f32.mrf.mxu1 }
 0x2fe   :  { %v4328_v19 = vadd.f32 %v8962_v48, %v11874_v42  ;;  %v11950_v62 = vadd.f32 %v4525_v22, %v4313_v15  ;;  %v4278_v42 = vadd.f32 %v8947_v63, %v11824_v1  ;;  %v4547_v22 = vadd.f32 %v11830_v35, %v4268_v0  ;;  %v4943_v49 = vpop.f32.mrf.mxu0 }
 0x2ff   :  { %v4322_v7 = vpop.f32.mrf.mxu1  ;;  %v4273_v1 = vadd.f32 %v4272_v21, %v11828_v6  ;;  %v4288_v35 = vadd.f32 %v8950_v31, %v11832_v45 }
 0x300   :  { %v4323_v47 = vadd.f32 %v4322_v7, %v11884_v55  ;;  %v11955_v37 = vadd.f32 %v8994_v56, %v4328_v19  ;;  %v4549_v44 = vadd.f32 %v11838_v61, %v4278_v42  ;;  %v9046_v54 = vpop.f32.mrf.mxu0  ;;  %v4283_v61 = vadd.f32 %v11916_v52, %v11836_v23 }
 0x301   :  { %v9005_v18 = vpop.f32.mrf.mxu1  ;;  %v4551_v3 = vadd.f32 %v11846_v32, %v4288_v35  ;;  %v4298_v19 = vadd.f32 %v11918_v40, %v11840_v38 }
 0x302   :  { %v4774_v16 = vadd.f32 %v9005_v18, %v4545_v26  ;;  %v11959_v20 = vadd.f32 %v4535_v11, %v4323_v47  ;;  %v4546_v11 = vadd.f32 %v11834_v28, %v4263_v30  ;;  %v4548_v28 = vadd.f32 %v11842_v58, %v4273_v1  ;;  %v4953_v31 = vpop.f32.mrf.mxu0 }
 0x303   :  { %v4694_v55 = vpop.f32.mrf.mxu1  ;;  %v4550_v58 = vadd.f32 %v11855_v4, %v4283_v61  ;;  %v4553_v30 = vadd.f32 %v11859_v33, %v4298_v19 }
 0x304   :  { %v5003_v13 = vadd.f32 %v9037_v10, %v4774_v16  ;;  %v4773_v9 = vadd.f32 %v4694_v55, %v4544_v14  ;;  %v9049_v23 = vpop.f32.mrf.mxu0 }
 0x305   :  { %v9008_v56 = vpop.f32.mrf.mxu1 }
 0x306   :  { %v5026_v46 = vadd.f32 %v11965_v53, %v5003_v13  ;;  %v5002_v12 = vadd.f32 %v4923_v36, %v4773_v9  ;;  %v4776_v50 = vadd.f32 %v9008_v56, %v4547_v22 }
 0x307   :  { %v4704_v63 = vpop.f32.mrf.mxu1 }
 0x308   :  { %9267 = vtanh.f32 %v5026_v46  ;;  %v5025_v27 = vadd.f32 %v11965_v53, %v5002_v12  ;;  %v5005_v10 = vadd.f32 %v9040_v34, %v4776_v50  ;;  %v4775_v51 = vadd.f32 %v4704_v63, %v4546_v11 }
 0x309   :  { %v9011_v60 = vpop.f32.mrf.mxu1 }
 0x30a   :  { %9269 = vtanh.f32 %v5025_v27  ;;  %v5028_v36 = vadd.f32 %v11965_v53, %v5005_v10  ;;  %v5004_v15 = vadd.f32 %v4933_v39, %v4775_v51  ;;  %v4778_v48 = vadd.f32 %v9011_v60, %v4549_v44 }
 0x30b   :  { %v4714_v6 = vpop.f32.mrf.mxu1 }
 0x30c   :  { %9271 = vtanh.f32 %v5028_v36  ;;  %v5027_v21 = vadd.f32 %v11965_v53, %v5004_v15  ;;  %v4777_v34 = vadd.f32 %v4714_v6, %v4548_v28  ;;  %v5007_v7 = vadd.f32 %v9043_v59, %v4778_v48  ;;  %v4963_v59 = vpop.f32.mrf.mxu0 }
 0x30d   :  { %v9014_v45 = vpop.f32.mrf.mxu1 }
 0x30e   :  { %v4780_v39 = vadd.f32 %v9014_v45, %v4551_v3  ;;  %9273 = vtanh.f32 %v5027_v21  ;;  %v5006_v47 = vadd.f32 %v4943_v49, %v4777_v34  ;;  %v5030_v52 = vadd.f32 %v11965_v53, %v5007_v7 }
 0x30f   :  { %v4724_v0 = vpop.f32.mrf.mxu1 }
 0x310   :  { %v4779_v18 = vadd.f32 %v4724_v0, %v4550_v58  ;;  %v5009_v32 = vadd.f32 %v9046_v54, %v4780_v39  ;;  %v5029_v40 = vadd.f32 %v11965_v53, %v5006_v47  ;;  %9275 = vtanh.f32 %v5030_v52 }
 0x311   :  { %v9017_v26 = vpop.f32.mrf.mxu1 }
 0x312   :  { %v4782_v14 = vadd.f32 %v9017_v26, %v4553_v30  ;;  %v5008_v55 = vadd.f32 %v4953_v31, %v4779_v18  ;;  %v5032_v9 = vadd.f32 %v11965_v53, %v5009_v32  ;;  %9277 = vtanh.f32 %v5029_v40 }
 0x313   :  { %v4734_v16 = vpop.f32.mrf.mxu1 }
 0x314   :  { %v4781_v42 = vadd.f32 %v4734_v16, %v11923_v2  ;;  %v5011_v56 = vadd.f32 %v9049_v23, %v4782_v14  ;;  %v5031_v50 = vadd.f32 %v11965_v53, %v5008_v55  ;;  %9279 = vtanh.f32 %v5032_v9 }
 0x315   :  { %v9268_v38 = vpop.eup %9267  ;;  %v9020_v48 = vpop.f32.mrf.mxu1 }
 0x316   :  { %v5090_v13 = vcombine.high %v9268_v38, %v9268_v38  ;;  %v5010_v22 = vadd.f32 %v4963_v59, %v4781_v42  ;;  %v11993_v2 = vrot.slane %v9268_v38, %v10375_v41  ;;  %v5034_v51 = vadd.f32 %v11965_v53, %v5011_v56 }
 0x317   :  { %v9270_v4 = vpop.eup %9269  ;;  %9281 = vtanh.f32 %v5031_v50  ;;  %v12026_v39 = vadd.f32 %v9020_v48, %v11933_v17 }
 0x318   :  { %v5073_v46 = vcombine.high %v9270_v4, %v9270_v4  ;;  %v5080_v33 = vrot.slane %v9270_v4, %v10375_v41  ;;  %v11990_v12 = vadd.f32 %v11965_v53, %v5010_v22  ;;  %v11997_v11 = vrot.slane %v5090_v13, %v10375_v41 }
 0x319   :  { %v9272_v49 = vpop.eup %9271  ;;  %v12008_v28 = vcombine.high %v11993_v2, %v11993_v2  ;;  %v5367_v0 = vrot.slane %v11993_v2, %v10380_v24  ;;  %v5700_v58 = vrot.slane %v11993_v2, %v10383_v5  ;;  %9283 = vtanh.f32 %v5034_v51 }
 0x31a   :  { %v5087_v1 = vrot.slane %v5073_v46, %v10375_v41  ;;  %v5088_v63 = vcombine.high %v5080_v33, %v5080_v33  ;;  %v5351_v44 = vrot.slane %v5080_v33, %v10380_v24  ;;  %v5684_v27 = vrot.slane %v5080_v33, %v10383_v5 }
 0x31b   :  { %v5124_v10 = vcombine.high %v9272_v49, %v9272_v49  ;;  %v9274_v35 = vpop.eup %9273  ;;  %v12012_v61 = vrot.slane %v9272_v49, %v10375_v41  ;;  %v12016_v21 = vcombine.high %v11997_v11, %v11997_v11  ;;  %v5371_v26 = vrot.slane %v12008_v28, %v10380_v24 }
 0x31c   :  { %v5089_v60 = vcombine.high %v5087_v1, %v5087_v1  ;;  %v5355_v54 = vrot.slane %v5088_v63, %v10380_v24  ;;  %v5359_v36 = vrot.slane %v5087_v1, %v10380_v24  ;;  %v5688_v15 = vrot.slane %v5088_v63, %v10383_v5 }
 0x31d   :  { %v5692_v6 = vrot.slane %v5087_v1, %v10383_v5  ;;  %v12023_v19 = vrot.slane %v5124_v10, %v10375_v41  ;;  %v5107_v7 = vcombine.high %v9274_v35, %v9274_v35  ;;  %v5139_v17 = vcombine.high %v12012_v61, %v12012_v61  ;;  %v9276_v18 = vpop.eup %9275 }
 0x31e   :  { %v5363_v34 = vrot.slane %v5089_v60, %v10380_v24  ;;  %v5604_v3 = vsel %vm3088_vm3, %v5355_v54, %v5351_v44  ;;  %v5937_v45 = vsel %vm3090_vm4, %v5688_v15, %v5684_v27  ;;  %v5696_v47 = vrot.slane %v5089_v60, %v10383_v5 }
 0x31f   :  { %v5605_v31 = vsel %vm3090_vm4, %v5359_v36, %v5604_v3  ;;  %v5938_v52 = vsel %vm3092_vm5, %v5692_v6, %v5937_v45  ;;  %v5375_v30 = vrot.slane %v11997_v11, %v10380_v24  ;;  %v5379_v32 = vrot.slane %v12016_v21, %v10380_v24  ;;  %v9278_v22 = vpop.eup %9277 }
 0x320   :  { %v5606_v23 = vsel %vm3092_vm5, %v5363_v34, %v5605_v31  ;;  %v5704_v16 = vrot.slane %v12008_v28, %v10383_v5  ;;  %v5708_v14 = vrot.slane %v11997_v11, %v10383_v5  ;;  %v5712_v42 = vrot.slane %v12016_v21, %v10383_v5 }
 0x321   :  { %v12051_v38 = vcombine.high %v12023_v19, %v12023_v19  ;;  %v5114_v40 = vrot.slane %v9274_v35, %v10375_v41  ;;  %v5121_v59 = vrot.slane %v5107_v7, %v10375_v41  ;;  %v5607_v55 = vsel %vm3094_vm6, %v5367_v0, %v5606_v23  ;;  %v9280_v27 = vpop.eup %9279 }
 0x322   :  { %v5939_v4 = vsel %vm3094_vm6, %v5696_v47, %v5938_v52  ;;  %v5399_v13 = vrot.slane %v12012_v61, %v10380_v24  ;;  %v5407_v9 = vrot.slane %v12023_v19, %v10380_v24  ;;  %v5403_v56 = vrot.slane %v5139_v17, %v10380_v24 }
 0x323   :  { %v5122_v49 = vcombine.high %v5114_v40, %v5114_v40  ;;  %v5123_v46 = vcombine.high %v5121_v59, %v5121_v59  ;;  %v5158_v33 = vcombine.high %v9276_v18, %v9276_v18  ;;  %v5383_v50 = vrot.slane %v5114_v40, %v10380_v24 }
 0x324   :  { %v5391_v1 = vrot.slane %v5121_v59, %v10380_v24  ;;  %v5716_v63 = vrot.slane %v5114_v40, %v10383_v5  ;;  %v5724_v44 = vrot.slane %v5121_v59, %v10383_v5  ;;  %v5411_v54 = vrot.slane %v12051_v38, %v10380_v24  ;;  %v9282_v31 = vpop.eup %9281 }
 0x325   :  { %v5387_v10 = vrot.slane %v5122_v49, %v10380_v24  ;;  %v5395_v51 = vrot.slane %v5123_v46, %v10380_v24  ;;  %v5720_v35 = vrot.slane %v5122_v49, %v10383_v5  ;;  %v5728_v60 = vrot.slane %v5123_v46, %v10383_v5 }
 0x326   :  { %v5943_v36 = vsel %vm3088_vm3, %v5716_v63, %v5712_v42  ;;  %v5141_v15 = vcombine.high %v9278_v22, %v9278_v22  ;;  %v5148_v48 = vrot.slane %v9278_v22, %v10375_v41  ;;  %v5732_v6 = vrot.slane %v12012_v61, %v10383_v5  ;;  %v12096_v22 = vpop.eup %9283 }
 0x327   :  { %v5736_v34 = vrot.slane %v5139_v17, %v10383_v5  ;;  %v5611_v3 = vsel %vm3088_vm3, %v5387_v10, %v5383_v50  ;;  %v5944_v45 = vsel %vm3090_vm4, %v5720_v35, %v5943_v36  ;;  %v5740_v7 = vrot.slane %v12023_v19, %v10383_v5  ;;  %v12107_v10 = vpop.f32.mrf.mxu1 }
 0x328   :  { %v5744_v0 = vrot.slane %v12051_v38, %v10383_v5  ;;  %v5612_v47 = vsel %vm3090_vm4, %v5391_v1, %v5611_v3  ;;  %v5945_v23 = vsel %vm3092_vm5, %v5724_v44, %v5944_v45  ;;  %v12088_v17 = vrot.slane %v9276_v18, %v10375_v41  ;;  %v12102_v1 = vpop.f32.mrf.mxu0 }
 0x329   :  { %v5613_v52 = vsel %vm3092_vm5, %v5395_v51, %v5612_v47  ;;  %v5946_v61 = vsel %vm3094_vm6, %v5728_v60, %v5945_v23  ;;  %v12091_v42 = vrot.slane %v5158_v33, %v10375_v41  ;;  %v5155_v38 = vrot.slane %v5141_v15, %v10375_v41 }
 0x32a   :  { %v5614_v40 = vsel %vm3094_vm6, %v5399_v13, %v5613_v52  ;;  %v5947_v19 = vsel %vm3096_vm7, %v5732_v6, %v5946_v61  ;;  %v5156_v59 = vcombine.high %v5148_v48, %v5148_v48  ;;  %v5415_v50 = vrot.slane %v5148_v48, %v10380_v24  ;;  %v12136_v6 = vpop.f32.mrf.mxu0 }
 0x32b   :  { %v5615_v49 = vsel %vm3096_vm7, %v5403_v56, %v5614_v40  ;;  %v5948_v46 = vsel %vm3098_vm8, %v5736_v34, %v5947_v19  ;;  %v5748_v18 = vrot.slane %v5148_v48, %v10383_v5  ;;  %v5157_v63 = vcombine.high %v5155_v38, %v5155_v38 }
 0x32c   :  { %v5616_v33 = vsel %vm3098_vm8, %v5407_v9, %v5615_v49  ;;  %v5949_v13 = vsel %vm3100_vm9, %v5740_v7, %v5948_v46  ;;  %v5419_v44 = vrot.slane %v5156_v59, %v10380_v24  ;;  %v5423_v56 = vrot.slane %v5155_v38, %v10380_v24 }
 0x32d   :  { %v5617_v51 = vsel %vm3100_vm9, %v5411_v54, %v5616_v33  ;;  %6003 = vst.msk [vmem:[#allocation5 + $0x8] sm:$0xff] %vm5668_vm13, %v5949_v13  ;;  %v5752_v35 = vrot.slane %v5156_v59, %v10383_v5  ;;  %v5756_v60 = vrot.slane %v5155_v38, %v10383_v5  ;;  %v5940_v9 = vsel %vm3096_vm7, %v5700_v58, %v5939_v4  ;;  %v9055_v38 = vpop.f32.mrf.mxu0 }
 0x32e   :  { %5670 = vst.msk [vmem:[#allocation4 + $0x9] sm:$0xff] %vm5668_vm13, %v5617_v51  ;;  %v12121_v36 = vcombine.high %v12088_v17, %v12088_v17  ;;  %v5618_v54 = vsel %vm3088_vm3, %v5419_v44, %v5415_v50  ;;  %v5950_v15 = vsel %vm3088_vm3, %v5748_v18, %v5744_v0  ;;  %v12129_v48 = vsel %vm3096_vm7, %v5371_v26, %v5607_v55  ;;  %v12141_v0 = vpop.f32.mrf.mxu1 }
 0x32f   :  { %v12133_v2 = vcombine.high %v12091_v42, %v12091_v42  ;;  %v5951_v58 = vsel %vm3090_vm4, %v5752_v35, %v5950_v15  ;;  %v5192_v4 = vcombine.high %v9280_v27, %v9280_v27  ;;  %v5427_v34 = vrot.slane %v5157_v63, %v10380_v24 }
 0x330   :  { %v5760_v3 = vrot.slane %v5157_v63, %v10383_v5  ;;  %v5175_v45 = vcombine.high %v9282_v31, %v9282_v31  ;;  %v5182_v7 = vrot.slane %v9282_v31, %v10375_v41  ;;  %v5619_v26 = vsel %vm3090_vm4, %v5423_v56, %v5618_v54  ;;  %v4754_v18 = vpop.f32.mrf.mxu1 }
 0x331   :  { %v5952_v55 = vsel %vm3092_vm5, %v5756_v60, %v5951_v58  ;;  %v5199_v47 = vrot.slane %v9280_v27, %v10375_v41  ;;  %v12147_v23 = vrot.slane %v5192_v4, %v10375_v41  ;;  %v12153_v52 = vsel %vm3098_vm8, %v5704_v16, %v5940_v9  ;;  %v4983_v58 = vpop.f32.mrf.mxu0 }
 0x332   :  { %v5431_v31 = vrot.slane %v12088_v17, %v10380_v24  ;;  %v5435_v61 = vrot.slane %v12121_v36, %v10380_v24  ;;  %v5439_v40 = vrot.slane %v12091_v42, %v10380_v24  ;;  %v5443_v27 = vrot.slane %v12133_v2, %v10380_v24 }
 0x333   :  { %v5764_v19 = vrot.slane %v12088_v17, %v10383_v5  ;;  %v5776_v28 = vrot.slane %v12133_v2, %v10383_v5  ;;  %v12169_v16 = vcombine.high %v12147_v23, %v12147_v23  ;;  %v5620_v59 = vsel %vm3092_vm5, %v5427_v34, %v5619_v26 }
 0x334   :  { %v5953_v49 = vsel %vm3094_vm6, %v5760_v3, %v5952_v55  ;;  %v5189_v46 = vrot.slane %v5175_v45, %v10375_v41  ;;  %v5190_v50 = vcombine.high %v5182_v7, %v5182_v7  ;;  %v5207_v33 = vcombine.high %v5199_v47, %v5199_v47 }
 0x335   :  { %v5808_v17 = vrot.slane %v12169_v16, %v10383_v5  ;;  %v5447_v13 = vrot.slane %v5182_v7, %v10380_v24  ;;  %v5780_v63 = vrot.slane %v5182_v7, %v10383_v5  ;;  %v5621_v60 = vsel %vm3094_vm6, %v5431_v31, %v5620_v59  ;;  %v9026_v7 = vpop.f32.mrf.mxu1  ;;  %v6305_v2 = vld [vmem:[#allocation4 + $0x9] sm:$0xff] }
 0x336   :  { %v5191_v44 = vcombine.high %v5189_v46, %v5189_v46  ;;  %v5451_v51 = vrot.slane %v5190_v50, %v10380_v24  ;;  %v5455_v56 = vrot.slane %v5189_v46, %v10380_v24  ;;  %v5784_v35 = vrot.slane %v5190_v50, %v10383_v5 }
 0x337   :  { %v5954_v9 = vsel %vm3096_vm7, %v5764_v19, %v5953_v49  ;;  %6006 = vst.msk [vmem:[#allocation5 + $0x20] sm:$0x1] %vm5345_vm12, %v5808_v17  ;;  %v5788_v54 = vrot.slane %v5189_v46, %v10383_v5  ;;  %v5957_v15 = vsel %vm3088_vm3, %v5780_v63, %v5776_v28  ;;  %v5463_v26 = vrot.slane %v5199_v47, %v10380_v24  ;;  %v9058_v63 = vpop.f32.mrf.mxu0 }
 0x338   :  { %v5459_v4 = vrot.slane %v5191_v44, %v10380_v24  ;;  %v5625_v34 = vsel %vm3088_vm3, %v5451_v51, %v5447_v13  ;;  %v5792_v3 = vrot.slane %v5191_v44, %v10383_v5  ;;  %v5958_v45 = vsel %vm3090_vm4, %v5784_v35, %v5957_v15  ;;  %v4764_v35 = vpop.f32.mrf.mxu1 }
 0x339   :  { %v5796_v55 = vrot.slane %v5199_v47, %v10383_v5  ;;  %v5626_v31 = vsel %vm3090_vm4, %v5455_v56, %v5625_v34  ;;  %v5959_v19 = vsel %vm3092_vm5, %v5788_v54, %v5958_v45  ;;  %v5768_v28 = vrot.slane %v12121_v36, %v10383_v5 }
 0x33a   :  { %v5467_v59 = vrot.slane %v5207_v33, %v10380_v24  ;;  %v5627_v49 = vsel %vm3092_vm5, %v5459_v4, %v5626_v31  ;;  %v5960_v46 = vsel %vm3094_vm6, %v5792_v3, %v5959_v19  ;;  %v5471_v50 = vrot.slane %v12147_v23, %v10380_v24  ;;  %v4993_v3 = vpop.f32.mrf.mxu0 }
 0x33b   :  { %v5800_v17 = vrot.slane %v5207_v33, %v10383_v5  ;;  %v5628_v47 = vsel %vm3094_vm6, %v5463_v26, %v5627_v49  ;;  %v5961_v13 = vsel %vm3096_vm7, %v5796_v55, %v5960_v46  ;;  %v5772_v44 = vrot.slane %v12091_v42, %v10383_v5  ;;  %v6624_v55 = vld [vmem:[%s13388_s6 + $0x130] sm:$0xff] }
 0x33c   :  { %v5622_v36 = vsel %vm3096_vm7, %v5435_v61, %v5621_v60  ;;  %v5955_v51 = vsel %vm3098_vm8, %v5768_v28, %v5954_v9  ;;  %v5629_v56 = vsel %vm3096_vm7, %v5467_v59, %v5628_v47  ;;  %v5475_v54 = vrot.slane %v12169_v16, %v10380_v24 }
 0x33d   :  { %v5804_v33 = vrot.slane %v12147_v23, %v10383_v5  ;;  %v5630_v15 = vsel %vm3098_vm8, %v5471_v50, %v5629_v56  ;;  %v5962_v4 = vsel %vm3098_vm8, %v5800_v17, %v5961_v13  ;;  %9285 = vtanh.f32 %v11990_v12 }
 0x33e   :  { %v5013_v61 = vadd.f32 %v12102_v1, %v12026_v39  ;;  %v4783_v60 = vadd.f32 %v12107_v10, %v11942_v43  ;;  %v4786_v9 = vadd.f32 %v12141_v0, %v11946_v57  ;;  %v4785_v16 = vadd.f32 %v4754_v18, %v11950_v62  ;;  %v6028_v18 = vld [vmem:[%s13388_s6 + $0x30] sm:$0xff] }
 0x33f   :  { %v4788_v34 = vadd.f32 %v9026_v7, %v11955_v37  ;;  %v4787_v23 = vadd.f32 %v4764_v35, %v11959_v20  ;;  %v5942_v12 = vsel %vm3100_vm9, %v5708_v14, %v12153_v52  ;;  %v5609_v57 = vsel %vm3098_vm8, %v5375_v30, %v12129_v48 }
 0x340   :  { %v5036_v39 = vadd.f32 %v11965_v53, %v5013_v61  ;;  %v5012_v43 = vadd.f32 %v12136_v6, %v4783_v60  ;;  %v5015_v1 = vadd.f32 %v9055_v38, %v4786_v9  ;;  %6002 = vst.msk [vmem:[#allocation5] sm:$0xfe] %vm6001_vm14, %v5942_v12  ;;  %v5014_v62 = vadd.f32 %v4983_v58, %v4785_v16 }
 0x341   :  { %v5017_v37 = vadd.f32 %v9058_v63, %v4788_v34  ;;  %v5016_v20 = vadd.f32 %v4993_v3, %v4787_v23  ;;  %v5610_v14 = vsel %vm3100_vm9, %v5379_v32, %v5609_v57  ;;  %v5956_v0 = vsel %vm3100_vm9, %v5772_v44, %v5955_v51  ;;  %v6623_v44 = vld [vmem:[%s13388_s6 + $0x128] sm:$0xff] }
 0x342   :  { %9287 = vtanh.f32 %v5036_v39  ;;  %v5035_v10 = vadd.f32 %v11965_v53, %v5012_v43  ;;  %v5038_v6 = vadd.f32 %v11965_v53, %v5015_v1  ;;  %5669 = vst.msk [vmem:[#allocation4 + $0x1] sm:$0xff] %vm5668_vm13, %v5610_v14  ;;  %v5037_v11 = vadd.f32 %v11965_v53, %v5014_v62  ;;  %6004 = vst.msk [vmem:[#allocation5 + $0x10] sm:$0xff] %vm5668_vm13, %v5956_v0  ;;  %v6622_v39 = vld [vmem:[%s13388_s6 + $0x120] sm:$0xff] }
 0x343   :  { %v5040_v30 = vadd.f32 %v11965_v53, %v5017_v37  ;;  %v12249_v48 = vadd.f32 %v11965_v53, %v5016_v20  ;;  %v5623_v21 = vsel %vm3098_vm8, %v5439_v40, %v5622_v36  ;;  %v5963_v52 = vsel %vm3100_vm9, %v5804_v33, %v5962_v4  ;;  %v6031_v53 = vld [vmem:[#allocation5 + $0x8] sm:$0xff] }
 0x344   :  { %v5624_v32 = vsel %vm3100_vm9, %v5443_v27, %v5623_v21  ;;  %v5631_v38 = vsel %vm3100_vm9, %v5475_v54, %v5630_v15  ;;  %6005 = vst.msk [vmem:[#allocation5 + $0x18] sm:$0xff] %vm5668_vm13, %v5963_v52  ;;  %v5226_v42 = vcombine.high %v12096_v22, %v12096_v22  ;;  %9289 = vtanh.f32 %v5035_v10  ;;  %v6026_v54 = vld [vmem:[%s13388_s6 + $0x20] sm:$0xff]  ;;  %v6025_v20 = vld [vmem:[%s13388_s6 + $0x18] sm:$0xff] }
 0x345   :  { %5671 = vst.msk [vmem:[#allocation4 + $0x11] sm:$0xff] %vm5668_vm13, %v5624_v32  ;;  %5672 = vst.msk [vmem:[#allocation4 + $0x19] sm:$0xff] %vm5668_vm13, %v5631_v38  ;;  %9291 = vtanh.f32 %v5038_v6  ;;  %v12274_v58 = vrot.slane %v12096_v22, %v10375_v41 }
 0x346   :  { %v12279_v26 = vrot.slane %v5226_v42, %v10375_v41  ;;  %9293 = vtanh.f32 %v5037_v11 }
 0x347   :  { %v6030_v40 = vld [vmem:[#allocation5] sm:$0xff]  ;;  %v5241_v49 = vcombine.high %v12274_v58, %v12274_v58  ;;  %v5495_v46 = vrot.slane %v12274_v58, %v10380_v24  ;;  %9295 = vtanh.f32 %v5040_v30  ;;  %v5828_v34 = vrot.slane %v12274_v58, %v10383_v5 }
 0x348   :  { %9075 = vmatprep.mubr.msk.f32.mxu1 %vm5668_vm13, %v6030_v40  ;;  %v12300_v47 = vcombine.high %v12279_v26, %v12279_v26  ;;  %v5503_v10 = vrot.slane %v12279_v26, %v10380_v24  ;;  %v5836_v38 = vrot.slane %v12279_v26, %v10383_v5  ;;  %9297 = vtanh.f32 %v12249_v48  ;;  %v6621_v40 = vld [vmem:[%s13388_s6 + $0x118] sm:$0xff] }
 0x349   :  { %v6304_v27 = vld [vmem:[#allocation4 + $0x1] sm:$0xff]  ;;  %9076 = vmatmul.mubr.msk.f32.vlgmr.msra.gmra.mxu1 %vm5668_vm13, %v6031_v53  ;;  %v5499_v1 = vrot.slane %v5241_v49, %v10380_v24  ;;  %v5832_v57 = vrot.slane %v5241_v49, %v10383_v5 }
 0x34a   :  { %9131 = vmatprep.mubr.msk.f32.mxu0 %vm5668_vm13, %v6304_v27  ;;  %v6032_v45 = vld [vmem:[#allocation5 + $0x10] sm:$0xff]  ;;  %9088 = vmatpush3.msra.mxu1 %v11928_v29  ;;  %v9286_v7 = vpop.eup %9285  ;;  %v6027_v29 = vld [vmem:[%s13388_s6 + $0x28] sm:$0xff]  ;;  %v5507_v30 = vrot.slane %v12300_v47, %v10380_v24  ;;  %v5840_v53 = vrot.slane %v12300_v47, %v10383_v5 }
 0x34b   :  { %9132 = vmatmul.mubr.msk.f32.vlgmr.msra.gmra.mxu0 %vm5668_vm13, %v6305_v2  ;;  %9078 = vmatprep.mubr.msk.f32.mxu1 %vm5668_vm13, %v6032_v45  ;;  %v5209_v31 = vcombine.high %v9286_v7, %v9286_v7  ;;  %v5216_v22 = vrot.slane %v9286_v7, %v10375_v41  ;;  %v6033_v28 = vld [vmem:[#allocation5 + $0x18] sm:$0xff]  ;;  %v6024_v45 = vld [vmem:[%s13388_s6 + $0x10] sm:$0xff] }
 0x34c   :  { %v6306_v19 = vld [vmem:[#allocation4 + $0x11] sm:$0xff]  ;;  %v6307_v59 = vld [vmem:[#allocation4 + $0x19] sm:$0xff]  ;;  %9089 = vmatprep.subr.mxu1 %v6028_v18  ;;  %9172 = vmatpush3.msra.mxu0 %v11938_v8 }
 0x34d   :  { %9134 = vmatprep.mubr.msk.f32.mxu0 %vm5668_vm13, %v6306_v19  ;;  %9079 = vmatmul.mubr.msk.f32.gmra.mxu1 %vm5668_vm13, %v6033_v28  ;;  %v5223_v50 = vrot.slane %v5209_v31, %v10375_v41  ;;  %v5224_v17 = vcombine.high %v5216_v22, %v5216_v22  ;;  %v5479_v13 = vrot.slane %v5216_v22, %v10380_v24 }
 0x34e   :  { %9090 = vmatpush3.msra.mxu1 %v6028_v18  ;;  %v5812_v63 = vrot.slane %v5216_v22, %v10383_v5  ;;  %9173 = vmatprep.subr.mxu0 %v6624_v55 }
 0x34f   :  { %v9288_v8 = vpop.eup %9287  ;;  %9135 = vmatmul.mubr.msk.f32.gmra.mxu0 %vm5668_vm13, %v6307_v59  ;;  %v5225_v36 = vcombine.high %v5223_v50, %v5223_v50  ;;  %v5483_v51 = vrot.slane %v5224_v17, %v10380_v24  ;;  %v5487_v56 = vrot.slane %v5223_v50, %v10380_v24  ;;  %v5816_v35 = vrot.slane %v5224_v17, %v10383_v5 }
 0x350   :  { %9091 = vmatprep.subr.mxu1 %v6027_v29  ;;  %v5820_v33 = vrot.slane %v5223_v50, %v10383_v5  ;;  %v5260_v15 = vcombine.high %v9288_v8, %v9288_v8  ;;  %v12316_v4 = vrot.slane %v9288_v8, %v10375_v41  ;;  %9174 = vmatpush3.msra.mxu0 %v6624_v55  ;;  %v6620_v8 = vld [vmem:[%s13388_s6 + $0x110] sm:$0xff] }
 0x351   :  { %9092 = vmatpush3.msra.mxu1 %v6027_v29  ;;  %v5491_v61 = vrot.slane %v5225_v36, %v10380_v24  ;;  %v5632_v60 = vsel %vm3088_vm3, %v5483_v51, %v5479_v13  ;;  %v5824_v9 = vrot.slane %v5225_v36, %v10383_v5  ;;  %v5964_v16 = vsel %vm3090_vm4, %v5816_v35, %v5812_v63  ;;  %v9290_v43 = vpop.eup %9289 }
 0x352   :  { %9175 = vmatprep.subr.mxu0 %v6623_v44  ;;  %v5633_v23 = vsel %vm3090_vm4, %v5487_v56, %v5632_v60  ;;  %v5965_v12 = vsel %vm3092_vm5, %v5820_v33, %v5964_v16  ;;  %v12327_v3 = vrot.slane %v5260_v15, %v10375_v41  ;;  %9093 = vmatprep.subr.mxu1 %v6026_v54  ;;  %v9292_v14 = vpop.eup %9291  ;;  %v6023_v56 = vld [vmem:[%s13388_s6 + $0x8] sm:$0xff] }
 0x353   :  { %v5634_v62 = vsel %vm3092_vm5, %v5491_v61, %v5633_v23  ;;  %v5966_v37 = vsel %vm3094_vm6, %v5824_v9, %v5965_v12  ;;  %9176 = vmatpush3.msra.mxu0 %v6623_v44  ;;  %v12345_v11 = vcombine.high %v12316_v4, %v12316_v4  ;;  %9094 = vmatpush3.msra.mxu1 %v6026_v54  ;;  %v9294_v22 = vpop.eup %9293 }
 0x354   :  { %v5635_v6 = vsel %vm3094_vm6, %v5495_v46, %v5634_v62  ;;  %v5967_v0 = vsel %vm3096_vm7, %v5828_v34, %v5966_v37  ;;  %v12357_v52 = vcombine.high %v12327_v3, %v12327_v3  ;;  %9177 = vmatprep.subr.mxu0 %v6622_v39  ;;  %v5243_v42 = vcombine.high %v9290_v43, %v9290_v43  ;;  %v9296_v13 = vpop.eup %9295  ;;  %v6022_v37 = vld [vmem:[%s13388_s6] sm:$0xff] }
 0x355   :  { %v12350_v21 = vsel %vm3096_vm7, %v5499_v1, %v5635_v6  ;;  %v12353_v32 = vsel %vm3098_vm8, %v5832_v57, %v5967_v0  ;;  %9095 = vmatprep.subr.mxu1 %v6025_v20  ;;  %v5527_v2 = vrot.slane %v12316_v4, %v10380_v24  ;;  %v5860_v27 = vrot.slane %v12316_v4, %v10383_v5 }
 0x356   :  { %v5250_v18 = vrot.slane %v9290_v43, %v10375_v41  ;;  %v5294_v58 = vcombine.high %v9292_v14, %v9292_v14  ;;  %9178 = vmatpush3.msra.mxu0 %v6622_v39  ;;  %v5531_v48 = vrot.slane %v12345_v11, %v10380_v24  ;;  %v5535_v7 = vrot.slane %v12327_v3, %v10380_v24  ;;  %v6619_v39 = vld [vmem:[%s13388_s6 + $0x108] sm:$0xff] }
 0x357   :  { %v5864_v55 = vrot.slane %v12345_v11, %v10383_v5  ;;  %v5257_v31 = vrot.slane %v5243_v42, %v10375_v41  ;;  %9096 = vmatpush3.msra.mxu1 %v6025_v20  ;;  %v5539_v19 = vrot.slane %v12357_v52, %v10380_v24  ;;  %v12386_v29 = vrot.slane %v9292_v14, %v10375_v41 }
 0x358   :  { %v5258_v28 = vcombine.high %v5250_v18, %v5250_v18  ;;  %v5844_v59 = vrot.slane %v5250_v18, %v10383_v5  ;;  %9179 = vmatprep.subr.mxu0 %v6621_v40  ;;  %v5511_v46 = vrot.slane %v5250_v18, %v10380_v24  ;;  %9097 = vmatprep.subr.mxu1 %v6024_v45 }
 0x359   :  { %v5259_v49 = vcombine.high %v5257_v31, %v5257_v31  ;;  %v5519_v50 = vrot.slane %v5257_v31, %v10380_v24  ;;  %v5852_v17 = vrot.slane %v5257_v31, %v10383_v5  ;;  %v12398_v51 = vrot.slane %v5294_v58, %v10375_v41  ;;  %9180 = vmatpush3.msra.mxu0 %v6621_v40 }
 0x35a   :  { %v5515_v63 = vrot.slane %v5258_v28, %v10380_v24  ;;  %v5848_v44 = vrot.slane %v5258_v28, %v10383_v5  ;;  %v5970_v36 = vsel %vm3088_vm3, %v5844_v59, %v5840_v53  ;;  %v5277_v33 = vcombine.high %v9294_v22, %v9294_v22  ;;  %9098 = vmatpush3.msra.mxu1 %v6024_v45  ;;  %v6618_v45 = vld [vmem:[%s13388_s6 + $0x100] sm:$0xff] }
 0x35b   :  { %v5523_v35 = vrot.slane %v5259_v49, %v10380_v24  ;;  %v5856_v54 = vrot.slane %v5259_v49, %v10383_v5  ;;  %v5284_v15 = vrot.slane %v9294_v22, %v10375_v41  ;;  %v5868_v4 = vrot.slane %v12327_v3, %v10383_v5  ;;  %9181 = vmatprep.subr.mxu0 %v6620_v8 }
 0x35c   :  { %v5872_v61 = vrot.slane %v12357_v52, %v10383_v5  ;;  %v5639_v60 = vsel %vm3088_vm3, %v5515_v63, %v5511_v46  ;;  %v5971_v9 = vsel %vm3090_vm4, %v5848_v44, %v5970_v36  ;;  %v5328_v23 = vcombine.high %v9296_v13, %v9296_v13  ;;  %9099 = vmatprep.subr.mxu1 %v6023_v56 }
 0x35d   :  { %v5640_v16 = vsel %vm3090_vm4, %v5519_v50, %v5639_v60  ;;  %v5972_v34 = vsel %vm3092_vm5, %v5852_v17, %v5971_v9  ;;  %v12415_v12 = vrot.slane %v9296_v13, %v10375_v41  ;;  %v5309_v57 = vcombine.high %v12386_v29, %v12386_v29  ;;  %9182 = vmatpush3.msra.mxu0 %v6620_v8 }
 0x35e   :  { %v5641_v43 = vsel %vm3092_vm5, %v5523_v35, %v5640_v16  ;;  %v5973_v1 = vsel %vm3094_vm6, %v5856_v54, %v5972_v34  ;;  %v12426_v62 = vcombine.high %v12398_v51, %v12398_v51  ;;  %v5291_v6 = vrot.slane %v5277_v33, %v10375_v41  ;;  %9100 = vmatpush3.msra.mxu1 %v6023_v56 }
 0x35f   :  { %v5642_v20 = vsel %vm3094_vm6, %v5527_v2, %v5641_v43  ;;  %v5974_v14 = vsel %vm3096_vm7, %v5860_v27, %v5973_v1  ;;  %v5292_v0 = vcombine.high %v5284_v15, %v5284_v15  ;;  %v5543_v42 = vrot.slane %v5284_v15, %v10380_v24  ;;  %9183 = vmatprep.subr.mxu0 %v6619_v39 }
 0x360   :  { %v5643_v11 = vsel %vm3096_vm7, %v5531_v48, %v5642_v20  ;;  %v5975_v53 = vsel %vm3098_vm8, %v5864_v55, %v5974_v14  ;;  %v5876_v40 = vrot.slane %v5284_v15, %v10383_v5  ;;  %v5293_v58 = vcombine.high %v5291_v6, %v5291_v6  ;;  %9101 = vmatprep.subr.mxu1 %v6022_v37  ;;  %v9298_v48 = vpop.eup %9297 }
 0x361   :  { %v5644_v18 = vsel %vm3098_vm8, %v5535_v7, %v5643_v11  ;;  %v5547_v2 = vrot.slane %v5292_v0, %v10380_v24  ;;  %v5551_v27 = vrot.slane %v5291_v6, %v10380_v24  ;;  %v5880_v55 = vrot.slane %v5292_v0, %v10383_v5  ;;  %9184 = vmatpush3.msra.mxu0 %v6619_v39  ;;  %v12453_v7 = vld [vmem:[%s13388_s6 + $0xf8] sm:$0xff] }
 0x362   :  { %v5884_v31 = vrot.slane %v5291_v6, %v10383_v5  ;;  %v5977_v22 = vsel %vm3088_vm3, %v5876_v40, %v5872_v61  ;;  %v12448_v28 = vrot.slane %v5328_v23, %v10375_v41  ;;  %v5559_v59 = vrot.slane %v12386_v29, %v10380_v24  ;;  %9102 = vmatpush3.msra.mxu1 %v6022_v37 }
 0x363   :  { %v5555_v49 = vrot.slane %v5293_v58, %v10380_v24  ;;  %v5646_v46 = vsel %vm3088_vm3, %v5547_v2, %v5543_v42  ;;  %v5888_v50 = vrot.slane %v5293_v58, %v10383_v5  ;;  %v5563_v17 = vrot.slane %v5309_v57, %v10380_v24  ;;  %9185 = vmatprep.subr.mxu0 %v6618_v45 }
 0x364   :  { %v5647_v8 = vsel %vm3090_vm4, %v5551_v27, %v5646_v46  ;;  %v5978_v13 = vsel %vm3090_vm4, %v5880_v55, %v5977_v22  ;;  %v12465_v63 = vcombine.high %v12448_v28, %v12448_v28  ;;  %v5567_v44 = vrot.slane %v12398_v51, %v10380_v24  ;;  %9143 = vmatprep.subr.mxu1 %v12453_v7 }
 0x365   :  { %v5892_v36 = vrot.slane %v12386_v29, %v10383_v5  ;;  %v5648_v56 = vsel %vm3092_vm5, %v5555_v49, %v5647_v8  ;;  %v5979_v35 = vsel %vm3092_vm5, %v5884_v31, %v5978_v13  ;;  %v5571_v54 = vrot.slane %v12426_v62, %v10380_v24  ;;  %9186 = vmatpush3.msra.mxu0 %v6618_v45 }
 0x366   :  { %v5896_v33 = vrot.slane %v5309_v57, %v10383_v5  ;;  %v5649_v15 = vsel %vm3094_vm6, %v5559_v59, %v5648_v56  ;;  %v5980_v61 = vsel %vm3094_vm6, %v5888_v50, %v5979_v35  ;;  %v5900_v60 = vrot.slane %v12398_v51, %v10383_v5 }
 0x367   :  { %v5904_v29 = vrot.slane %v12426_v62, %v10383_v5  ;;  %v5650_v9 = vsel %vm3096_vm7, %v5563_v17, %v5649_v15  ;;  %v5981_v16 = vsel %vm3096_vm7, %v5892_v36, %v5980_v61  ;;  %v5936_v23 = vrot.slane %v12465_v63, %v10383_v5  ;;  %v6610_v61 = vld [vmem:[#allocation4 + $0x2] sm:$0xff] }
 0x368   :  { %v5982_v34 = vsel %vm3098_vm8, %v5896_v33, %v5981_v16  ;;  %v5311_v39 = vcombine.high %v9298_v48, %v9298_v48  ;;  %v5318_v43 = vrot.slane %v9298_v48, %v10375_v41  ;;  %v5969_v51 = vsel %vm3100_vm9, %v5836_v38, %v12353_v32  ;;  %v6014_v33 = vld [vmem:[#allocation4] sm:$0xff]  ;;  %v6611_v16 = vld [vmem:[#allocation4 + $0xa] sm:$0xff] }
 0x369   :  { %v5637_v1 = vsel %vm3098_vm8, %v5503_v10, %v12350_v21  ;;  %v5976_v57 = vsel %vm3100_vm9, %v5868_v4, %v5975_v53  ;;  %v5645_v62 = vsel %vm3100_vm9, %v5539_v19, %v5644_v18  ;;  %v5343_v37 = vcombine.high %v12415_v12, %v12415_v12  ;;  %6011 = vst.msk [vmem:[#allocation5 + $0x48] sm:$0x1] %vm5345_vm12, %v5936_v23  ;;  %v6612_v23 = vld [vmem:[#allocation4 + $0x12] sm:$0xff] }
 0x36a   :  { %v5325_v32 = vrot.slane %v5311_v39, %v10375_v41  ;;  %v5326_v26 = vcombine.high %v5318_v43, %v5318_v43  ;;  %v5908_v10 = vrot.slane %v5318_v43, %v10383_v5  ;;  %6007 = vst.msk [vmem:[#allocation5 + $0x28] sm:$0xfe] %vm6001_vm14, %v5969_v51  ;;  %v5575_v3 = vrot.slane %v5318_v43, %v10380_v24  ;;  %v6017_v39 = vld [vmem:[#allocation4 + $0x18] sm:$0xff]  ;;  %v6469_v43 = vld [vmem:[%s13388_s6 + $0xe0] sm:$0xff] }
 0x36b   :  { %6008 = vst.msk [vmem:[#allocation5 + $0x30] sm:$0xff] %vm5668_vm13, %v5976_v57  ;;  %5674 = vst.msk [vmem:[#allocation4 + $0x31] sm:$0xff] %vm5668_vm13, %v5645_v62  ;;  %v5638_v21 = vsel %vm3100_vm9, %v5507_v30, %v5637_v1  ;;  %v5983_v52 = vsel %vm3100_vm9, %v5900_v60, %v5982_v34  ;;  %v5651_v38 = vsel %vm3098_vm8, %v5567_v44, %v5650_v9  ;;  %v6015_v60 = vld [vmem:[#allocation4 + $0x8] sm:$0xff]  ;;  %v6016_v9 = vld [vmem:[#allocation4 + $0x10] sm:$0xff] }
 0x36c   :  { %v5327_v19 = vcombine.high %v5325_v32, %v5325_v32  ;;  %v5579_v4 = vrot.slane %v5326_v26, %v10380_v24  ;;  %v5583_v20 = vrot.slane %v5325_v32, %v10380_v24  ;;  %v5912_v14 = vrot.slane %v5326_v26, %v10383_v5  ;;  %5673 = vst.msk [vmem:[#allocation4 + $0x29] sm:$0xff] %vm5668_vm13, %v5638_v21  ;;  %v6470_v34 = vld [vmem:[%s13388_s6 + $0xe8] sm:$0xff]  ;;  %v6613_v51 = vld [vmem:[#allocation4 + $0x1a] sm:$0xff] }
 0x36d   :  { %6009 = vst.msk [vmem:[#allocation5 + $0x38] sm:$0xff] %vm5668_vm13, %v5983_v52  ;;  %v5916_v6 = vrot.slane %v5325_v32, %v10383_v5  ;;  %v5984_v47 = vsel %vm3088_vm3, %v5908_v10, %v5904_v29  ;;  %v5652_v30 = vsel %vm3100_vm9, %v5571_v54, %v5651_v38  ;;  %v5591_v40 = vrot.slane %v12415_v12, %v10380_v24  ;;  %v6471_v29 = vld [vmem:[%s13388_s6 + $0xf0] sm:$0xff]  ;;  %v6468_v1 = vld [vmem:[%s13388_s6 + $0xd8] sm:$0xff]  ;;  %v6466_v10 = vld [vmem:[%s13388_s6 + $0xc8] sm:$0xff] }
 0x36e   :  { %v5587_v0 = vrot.slane %v5327_v19, %v10380_v24  ;;  %v5653_v11 = vsel %vm3088_vm3, %v5579_v4, %v5575_v3  ;;  %v5920_v53 = vrot.slane %v5327_v19, %v10383_v5  ;;  %v5985_v42 = vsel %vm3090_vm4, %v5912_v14, %v5984_v47  ;;  %5675 = vst.msk [vmem:[#allocation4 + $0x39] sm:$0xff] %vm5668_vm13, %v5652_v30  ;;  %v6465_v52 = vld [vmem:[%s13388_s6 + $0xc0] sm:$0xff]  ;;  %v6457_v38 = vld [vmem:[#allocation5 + $0x1] sm:$0xff]  ;;  %v6460_v14 = vld [vmem:[#allocation5 + $0x19] sm:$0xff] }
 0x36f   :  { %v5924_v18 = vrot.slane %v12415_v12, %v10383_v5  ;;  %v5654_v58 = vsel %vm3090_vm4, %v5583_v20, %v5653_v11  ;;  %v5986_v2 = vsel %vm3092_vm5, %v5916_v6, %v5985_v42  ;;  %v5595_v27 = vrot.slane %v5343_v37, %v10380_v24  ;;  %v6458_v4 = vld [vmem:[#allocation5 + $0x9] sm:$0xff]  ;;  %v6459_v20 = vld [vmem:[#allocation5 + $0x11] sm:$0xff] }
 0x370   :  { %v5928_v45 = vrot.slane %v5343_v37, %v10383_v5  ;;  %v5655_v48 = vsel %vm3092_vm5, %v5587_v0, %v5654_v58  ;;  %v5987_v55 = vsel %vm3094_vm6, %v5920_v53, %v5986_v2  ;;  %v5599_v31 = vrot.slane %v12448_v28, %v10380_v24  ;;  %v6467_v37 = vld [vmem:[%s13388_s6 + $0xd0] sm:$0xff]  ;;  %v7339_v11 = vld [vmem:[%s13390_s8 + $0x1f8] sm:$0xff]  ;;  %v7336_v58 = vld [vmem:[%s13390_s8 + $0x1e0] sm:$0xff] }
 0x371   :  { %v5932_v22 = vrot.slane %v12448_v28, %v10383_v5  ;;  %v5656_v12 = vsel %vm3094_vm6, %v5591_v40, %v5655_v48  ;;  %v5988_v59 = vsel %vm3096_vm7, %v5924_v18, %v5987_v55  ;;  %v6034_v49 = vld [vmem:[#allocation5 + $0x28] sm:$0xff]  ;;  %v5603_v50 = vrot.slane %v12465_v63, %v10380_v24  ;;  %v7338_v53 = vld [vmem:[%s13390_s8 + $0x1f0] sm:$0xff]  ;;  %v7337_v40 = vld [vmem:[%s13390_s8 + $0x1e8] sm:$0xff] }
 0x372   :  { %v6035_v46 = vld [vmem:[#allocation5 + $0x30] sm:$0xff]  ;;  %v5657_v17 = vsel %vm3096_vm7, %v5595_v27, %v5656_v12  ;;  %v5989_v8 = vsel %vm3098_vm8, %v5928_v45, %v5988_v59  ;;  %9081 = vmatprep.mubr.msk.f32.mxu1 %vm5668_vm13, %v6034_v49  ;;  %v6309_v13 = vld [vmem:[#allocation4 + $0x31] sm:$0xff]  ;;  %v7301_v2 = vld [vmem:[%s13390_s8 + $0xe8] sm:$0xff] }
 0x373   :  { %v5658_v44 = vsel %vm3098_vm8, %v5599_v31, %v5657_v17  ;;  %v6308_v36 = vld [vmem:[#allocation4 + $0x29] sm:$0xff]  ;;  %9082 = vmatmul.mubr.msk.f32.gmra.mxu1 %vm5668_vm13, %v6035_v46  ;;  %v5990_v56 = vsel %vm3100_vm9, %v5932_v22, %v5989_v8  ;;  %v6461_v6 = vld [vmem:[#allocation5 + $0x29] sm:$0xff] }
 0x374   :  { %v6036_v28 = vld [vmem:[#allocation5 + $0x38] sm:$0xff]  ;;  %9137 = vmatprep.mubr.msk.f32.mxu0 %vm5668_vm13, %v6308_v36  ;;  %6010 = vst.msk [vmem:[#allocation5 + $0x40] sm:$0xff] %vm5668_vm13, %v5990_v56  ;;  %v5659_v63 = vsel %vm3100_vm9, %v5603_v50, %v5658_v44  ;;  %v6019_v62 = vld [vmem:[#allocation4 + $0x30] sm:$0xff]  ;;  %v7303_v42 = vld [vmem:[%s13390_s8 + $0xf8] sm:$0xff] }
 0x375   :  { %9084 = vmatprep.mubr.msk.f32.mxu1 %vm5668_vm13, %v6036_v28  ;;  %9138 = vmatmul.mubr.msk.f32.gmra.mxu0 %vm5668_vm13, %v6309_v13  ;;  %v6310_v35 = vld [vmem:[#allocation4 + $0x39] sm:$0xff]  ;;  %5676 = vst.msk [vmem:[#allocation4 + $0x41] sm:$0xff] %vm5668_vm13, %v5659_v63  ;;  %v6614_v57 = vld [vmem:[#allocation4 + $0x2a] sm:$0xff]  ;;  %v6462_v47 = vld [vmem:[#allocation5 + $0x31] sm:$0xff] }
 0x376   :  { %9140 = vmatprep.mubr.msk.f32.mxu0 %vm5668_vm13, %v6310_v35  ;;  %v6020_v32 = vld [vmem:[#allocation4 + $0x38] sm:$0xff]  ;;  %7429 = vmatprep.subr.mxu0 %v7303_v42  ;;  %v7302_v18 = vld [vmem:[%s13390_s8 + $0xf0] sm:$0xff]  ;;  %v7300_v45 = vld [vmem:[%s13390_s8 + $0xe0] sm:$0xff] }
 0x377   :  { %v6615_v26 = vld [vmem:[#allocation4 + $0x32] sm:$0xff]  ;;  %v7333_v31 = vld [vmem:[%s13390_s8 + $0x1c8] sm:$0xff]  ;;  %v7332_v12 = vld [vmem:[%s13390_s8 + $0x1c0] sm:$0xff] }
 0x378   :  { %v7335_v27 = vld [vmem:[%s13390_s8 + $0x1d8] sm:$0xff]  ;;  %v7334_v48 = vld [vmem:[%s13390_s8 + $0x1d0] sm:$0xff]  ;;  %v7297_v59 = vld [vmem:[%s13390_s8 + $0xc8] sm:$0xff] }
 0x379   :  { %v7299_v55 = vld [vmem:[%s13390_s8 + $0xd8] sm:$0xff]  ;;  %v7298_v22 = vld [vmem:[%s13390_s8 + $0xd0] sm:$0xff]  ;;  %v7296_v46 = vld [vmem:[%s13390_s8 + $0xc0] sm:$0xff] }
 0x37a   :  { %v7331_v49 = vld [vmem:[%s13390_s8 + $0x1b8] sm:$0xff]  ;;  %v7330_v50 = vld [vmem:[%s13390_s8 + $0x1b0] sm:$0xff]  ;;  %v7329_v8 = vld [vmem:[%s13390_s8 + $0x1a8] sm:$0xff] }
 0x37b   :  { %v6037_v54 = vld [vmem:[#allocation5 + $0x40] sm:$0xff]  ;;  %v7295_v17 = vld [vmem:[%s13390_s8 + $0xb8] sm:$0xff]  ;;  %v7328_v44 = vld [vmem:[%s13390_s8 + $0x1a0] sm:$0xff] }
 0x37c   :  { %9085 = vmatmul.mubr.msk.f32.gmra.mxu1 %vm5668_vm13, %v6037_v54  ;;  %v6311_v15 = vld [vmem:[#allocation4 + $0x41] sm:$0xff]  ;;  %v6463_v30 = vld [vmem:[#allocation5 + $0x39] sm:$0xff]  ;;  %v6464_v0 = vld [vmem:[#allocation5 + $0x41] sm:$0xff] }
 0x37d   :  { %9103 = vmatprep.mubr.msk.f32.mxu1 %vm5668_vm13, %v6014_v33  ;;  %9141 = vmatmul.mubr.msk.f32.gmra.mxu0 %vm5668_vm13, %v6311_v15  ;;  %v6616_v3 = vld [vmem:[#allocation4 + $0x3a] sm:$0xff]  ;;  %v6617_v19 = vld [vmem:[#allocation4 + $0x42] sm:$0xff]  ;;  %v7294_v13 = vld [vmem:[%s13390_s8 + $0xb0] sm:$0xff] }
 0x37e   :  { %9187 = vmatprep.mubr.msk.f32.mxu0 %vm5668_vm13, %v6610_v61  ;;  %v6021_v21 = vld [vmem:[#allocation4 + $0x40] sm:$0xff]  ;;  %v7293_v36 = vld [vmem:[%s13390_s8 + $0xa8] sm:$0xff]  ;;  %v7327_v28 = vld [vmem:[%s13390_s8 + $0x198] sm:$0xff] }
 0x37f   :  { %v7292_v56 = vld [vmem:[%s13390_s8 + $0xa0] sm:$0xff]  ;;  %v7326_v63 = vld [vmem:[%s13390_s8 + $0x190] sm:$0xff]  ;;  %v7291_v35 = vld [vmem:[%s13390_s8 + $0x98] sm:$0xff] }
 0x380   :  { %9104 = vmatmul.mubr.msk.f32.vlgmr.msra.gmra.mxu1 %vm5668_vm13, %v6015_v60  ;;  %v7325_v54 = vld [vmem:[%s13390_s8 + $0x188] sm:$0xff]  ;;  %v7290_v33 = vld [vmem:[%s13390_s8 + $0x90] sm:$0xff]  ;;  %v7324_v15 = vld [vmem:[%s13390_s8 + $0x180] sm:$0xff] }
 0x381   :  { %9106 = vmatprep.mubr.msk.f32.mxu1 %vm5668_vm13, %v6016_v9  ;;  %9144 = vmatpush3.msra.mxu1 %v12453_v7  ;;  %v6018_v7 = vld [vmem:[#allocation4 + $0x28] sm:$0xff]  ;;  %v7323_v60 = vld [vmem:[%s13390_s8 + $0x178] sm:$0xff]  ;;  %v7322_v9 = vld [vmem:[%s13390_s8 + $0x170] sm:$0xff] }
 0x382   :  { %9188 = vmatmul.mubr.msk.f32.vlgmr.msra.gmra.mxu0 %vm5668_vm13, %v6611_v16  ;;  %9145 = vmatprep.subr.mxu1 %v6471_v29  ;;  %v7289_v61 = vld [vmem:[%s13390_s8 + $0x88] sm:$0xff]  ;;  %v7287_v16 = vld [vmem:[%s13390_s8 + $0x78] sm:$0xff] }
 0x383   :  { %9190 = vmatprep.mubr.msk.f32.mxu0 %vm5668_vm13, %v6612_v23  ;;  %9146 = vmatpush3.msra.mxu1 %v6471_v29  ;;  %v7288_v29 = vld [vmem:[%s13390_s8 + $0x80] sm:$0xff]  ;;  %v7286_v23 = vld [vmem:[%s13390_s8 + $0x70] sm:$0xff]  ;;  %v7273_v42 = vld [vmem:[%s13390_s8 + $0x8] sm:$0xff] }
 0x384   :  { %9107 = vmatmul.mubr.msk.f32.gmra.mxu1 %vm5668_vm13, %v6017_v39  ;;  %9147 = vmatprep.subr.mxu1 %v6470_v34  ;;  %v7320_v39 = vld [vmem:[%s13390_s8 + $0x160] sm:$0xff] }
 0x385   :  { %9109 = vmatprep.mubr.msk.f32.mxu1 %vm5668_vm13, %v6018_v7  ;;  %9148 = vmatpush3.msra.mxu1 %v6470_v34  ;;  %v7321_v34 = vld [vmem:[%s13390_s8 + $0x168] sm:$0xff]  ;;  %v7319_v7 = vld [vmem:[%s13390_s8 + $0x158] sm:$0xff] }
 0x386   :  { %9191 = vmatmul.mubr.msk.f32.gmra.mxu0 %vm5668_vm13, %v6613_v51  ;;  %9149 = vmatprep.subr.mxu1 %v6469_v43  ;;  %v7284_v51 = vld [vmem:[%s13390_s8 + $0x60] sm:$0xff] }
 0x387   :  { %9193 = vmatprep.mubr.msk.f32.mxu0 %vm5668_vm13, %v6614_v57  ;;  %9150 = vmatpush3.msra.mxu1 %v6469_v43  ;;  %v7285_v43 = vld [vmem:[%s13390_s8 + $0x68] sm:$0xff]  ;;  %v7283_v57 = vld [vmem:[%s13390_s8 + $0x58] sm:$0xff] }
 0x388   :  { %9110 = vmatmul.mubr.msk.f32.gmra.mxu1 %vm5668_vm13, %v6019_v62  ;;  %9151 = vmatprep.subr.mxu1 %v6468_v1  ;;  %v7317_v62 = vld [vmem:[%s13390_s8 + $0x148] sm:$0xff] }
 0x389   :  { %9112 = vmatprep.mubr.msk.f32.mxu1 %vm5668_vm13, %v6020_v32  ;;  %9152 = vmatpush3.msra.mxu1 %v6468_v1  ;;  %v7318_v1 = vld [vmem:[%s13390_s8 + $0x150] sm:$0xff]  ;;  %v7316_v32 = vld [vmem:[%s13390_s8 + $0x140] sm:$0xff] }
 0x38a   :  { %9194 = vmatmul.mubr.msk.f32.gmra.mxu0 %vm5668_vm13, %v6615_v26  ;;  %9153 = vmatprep.subr.mxu1 %v6467_v37  ;;  %v7281_v26 = vld [vmem:[%s13390_s8 + $0x48] sm:$0xff] }
 0x38b   :  { %9196 = vmatprep.mubr.msk.f32.mxu0 %vm5668_vm13, %v6616_v3  ;;  %9154 = vmatpush3.msra.mxu1 %v6467_v37  ;;  %v7282_v37 = vld [vmem:[%s13390_s8 + $0x50] sm:$0xff]  ;;  %v7280_v3 = vld [vmem:[%s13390_s8 + $0x40] sm:$0xff] }
 0x38c   :  { %9113 = vmatmul.mubr.msk.f32.gmra.mxu1 %vm5668_vm13, %v6021_v21  ;;  %9155 = vmatprep.subr.mxu1 %v6466_v10  ;;  %v7314_v21 = vld [vmem:[%s13390_s8 + $0x130] sm:$0xff] }
 0x38d   :  { %9156 = vmatpush3.msra.mxu1 %v6466_v10  ;;  %9159 = vmatprep.mubr.msk.f32.mxu1 %vm5668_vm13, %v6457_v38  ;;  %v7315_v10 = vld [vmem:[%s13390_s8 + $0x138] sm:$0xff]  ;;  %v7313_v38 = vld [vmem:[%s13390_s8 + $0x128] sm:$0xff] }
 0x38e   :  { %9197 = vmatmul.mubr.msk.f32.gmra.mxu0 %vm5668_vm13, %v6617_v19  ;;  %9157 = vmatprep.subr.mxu1 %v6465_v52  ;;  %v7278_v19 = vld [vmem:[%s13390_s8 + $0x30] sm:$0xff] }
 0x38f   :  { %9158 = vmatpush3.msra.mxu1 %v6465_v52  ;;  %7493 = vmatprep.mubr.f32.mxu0 %v13501_v25  ;;  %v7279_v52 = vld [vmem:[%s13390_s8 + $0x38] sm:$0xff] }
 0x390   :  { %9160 = vmatmul.mubr.msk.f32.vlgmr.msra.gmra.mxu1 %vm5668_vm13, %v6458_v4  ;;  %7340 = vmatprep.subr.mxu1 %v7339_v11  ;;  %v7312_v4 = vld [vmem:[%s13390_s8 + $0x120] sm:$0xff]  ;;  %v7274_v11 = vld [vmem:[%s13390_s8 + $0x10] sm:$0xff] }
 0x391   :  { %9162 = vmatprep.mubr.msk.f32.mxu1 %vm5668_vm13, %v6459_v20  ;;  %7341 = vmatpush1.msra.mxu1 %v7338_v53  ;;  %v7277_v20 = vld [vmem:[%s13390_s8 + $0x28] sm:$0xff]  ;;  %v7308_v53 = vld [vmem:[%s13390_s8 + $0x100] sm:$0xff] }
 0x392   :  { %7342 = vmatprep.subr.mxu1 %v7337_v40  ;;  %7430 = vmatpush1.msra.mxu0 %v7302_v18  ;;  %v7272_v40 = vld [vmem:[%s13390_s8] sm:$0xff]  ;;  %v7553_v18 = vld [vmem:[%s13390_s8 + $0x2f8] sm:$0xff] }
 0x393   :  { %7343 = vmatpush1.msra.mxu1 %v7336_v58  ;;  %7431 = vmatprep.subr.mxu0 %v7301_v2  ;;  %v7686_v58 = vld [vmem:[%s13390_s8 + $0x3f8] sm:$0xff] }
 0x394   :  { %9163 = vmatmul.mubr.msk.f32.gmra.mxu1 %vm5668_vm13, %v6460_v14  ;;  %7344 = vmatprep.subr.mxu1 %v7335_v27  ;;  %v7311_v14 = vld [vmem:[%s13390_s8 + $0x118] sm:$0xff] }
 0x395   :  { %9165 = vmatprep.mubr.msk.f32.mxu1 %vm5668_vm13, %v6461_v6  ;;  %7432 = vmatpush1.msra.mxu0 %v7300_v45  ;;  %v7276_v6 = vld [vmem:[%s13390_s8 + $0x20] sm:$0xff] }
 0x396   :  { %7345 = vmatpush1.msra.mxu1 %v7334_v48  ;;  %7433 = vmatprep.subr.mxu0 %v7299_v55 }
 0x397   :  { %7346 = vmatprep.subr.mxu1 %v7333_v31  ;;  %7434 = vmatpush1.msra.mxu0 %v7298_v22 }
 0x398   :  { %9166 = vmatmul.mubr.msk.f32.gmra.mxu1 %vm5668_vm13, %v6462_v47  ;;  %7435 = vmatprep.subr.mxu0 %v7297_v59  ;;  %v7310_v47 = vld [vmem:[%s13390_s8 + $0x110] sm:$0xff] }
 0x399   :  { %9168 = vmatprep.mubr.msk.f32.mxu1 %vm5668_vm13, %v6463_v30  ;;  %7347 = vmatpush1.msra.mxu1 %v7332_v12  ;;  %v7275_v30 = vld [vmem:[%s13390_s8 + $0x18] sm:$0xff] }
 0x39a   :  { %7348 = vmatprep.subr.mxu1 %v7331_v49  ;;  %7436 = vmatpush1.msra.mxu0 %v7296_v46 }
 0x39b   :  { %7349 = vmatpush1.msra.mxu1 %v7330_v50  ;;  %7437 = vmatprep.subr.mxu0 %v7295_v17 }
 0x39c   :  { %9169 = vmatmul.mubr.msk.f32.gmra.mxu1 %vm5668_vm13, %v6464_v0  ;;  %7350 = vmatprep.subr.mxu1 %v7329_v8  ;;  %v7309_v0 = vld [vmem:[%s13390_s8 + $0x108] sm:$0xff] }
 0x39d   :  { %7404 = vmatprep.mubr.f32.mxu1 %v13501_v25  ;;  %7438 = vmatpush1.msra.mxu0 %v7294_v13 }
 0x39e   :  { %7351 = vmatpush1.msra.mxu1 %v7328_v44  ;;  %7439 = vmatprep.subr.mxu0 %v7293_v36 }
 0x39f   :  { %7352 = vmatprep.subr.mxu1 %v7327_v28  ;;  %7440 = vmatpush1.msra.mxu0 %v7292_v56 }
 0x3a0   :  { %7353 = vmatpush1.msra.mxu1 %v7326_v63  ;;  %7441 = vmatprep.subr.mxu0 %v7291_v35 }
 0x3a1   :  { %7354 = vmatprep.subr.mxu1 %v7325_v54  ;;  %7442 = vmatpush1.msra.mxu0 %v7290_v33 }
 0x3a2   :  { %7355 = vmatpush1.msra.mxu1 %v7324_v15  ;;  %7443 = vmatprep.subr.mxu0 %v7289_v61 }
 0x3a3   :  { %7356 = vmatprep.subr.mxu1 %v7323_v60  ;;  %7444 = vmatpush1.msra.mxu0 %v7288_v29 }
 0x3a4   :  { %7357 = vmatpush1.msra.mxu1 %v7322_v9  ;;  %7445 = vmatprep.subr.mxu0 %v7287_v16 }
 0x3a5   :  { %7358 = vmatprep.subr.mxu1 %v7321_v34  ;;  %7446 = vmatpush1.msra.mxu0 %v7286_v23 }
 0x3a6   :  { %7359 = vmatpush1.msra.mxu1 %v7320_v39  ;;  %7447 = vmatprep.subr.mxu0 %v7285_v43 }
 0x3a7   :  { %7360 = vmatprep.subr.mxu1 %v7319_v7  ;;  %7448 = vmatpush1.msra.mxu0 %v7284_v51 }
 0x3a8   :  { %7361 = vmatpush1.msra.mxu1 %v7318_v1  ;;  %7449 = vmatprep.subr.mxu0 %v7283_v57  ;;  %v8302_v57 = vld [vmem:[%s13391_s7] ss:$0 sm:$0xff] }
 0x3a9   :  { %7362 = vmatprep.subr.mxu1 %v7317_v62  ;;  %7450 = vmatpush1.msra.mxu0 %v7282_v37 }
 0x3aa   :  { %7363 = vmatpush1.msra.mxu1 %v7316_v32  ;;  %7451 = vmatprep.subr.mxu0 %v7281_v26 }
 0x3ab   :  { %7364 = vmatprep.subr.mxu1 %v7315_v10  ;;  %7452 = vmatpush1.msra.mxu0 %v7280_v3 }
 0x3ac   :  { %7365 = vmatpush1.msra.mxu1 %v7314_v21  ;;  %7453 = vmatprep.subr.mxu0 %v7279_v52 }
 0x3ad   :  { %7366 = vmatprep.subr.mxu1 %v7313_v38  ;;  %7454 = vmatpush1.msra.mxu0 %v7278_v19 }
 0x3ae   :  { %7367 = vmatpush1.msra.mxu1 %v7312_v4  ;;  %7455 = vmatprep.subr.mxu0 %v7277_v20 }
 0x3af   :  { %7368 = vmatprep.subr.mxu1 %v7311_v14  ;;  %7456 = vmatpush1.msra.mxu0 %v7276_v6 }
 0x3b0   :  { %7369 = vmatpush1.msra.mxu1 %v7310_v47  ;;  %7457 = vmatprep.subr.mxu0 %v7275_v30 }
 0x3b1   :  { %7370 = vmatprep.subr.mxu1 %v7309_v0  ;;  %7458 = vmatpush1.msra.mxu0 %v7274_v11 }
 0x3b2   :  { %7371 = vmatpush1.msra.mxu1 %v7308_v53  ;;  %7459 = vmatprep.subr.mxu0 %v7273_v42 }
 0x3b3   :  { %7460 = vmatpush1.msra.mxu0 %v7272_v40  ;;  %7554 = vmatprep.subr.mxu1 %v7553_v18 }
 0x3b4   :  { %7687 = vmatprep.subr.mxu0 %v7686_v58 }
 0x409   :  { %v9077_v2 = vpop.f32.mrf.mxu1 }
 0x40b   :  { %v9133_v27 = vpop.f32.mrf.mxu0  ;;  %v6136_v45 = vpop.f32.mrf.mxu1 }
 0x40d   :  { %v9080_v48 = vpop.f32.mrf.mxu1  ;;  %v6410_v55 = vpop.f32.mrf.mxu0 }
 0x40f   :  { %v9136_v31 = vpop.f32.mrf.mxu0  ;;  %v6146_v22 = vpop.f32.mrf.mxu1 }
 0x411   :  { %v6420_v59 = vpop.f32.mrf.mxu0 }
 0x433   :  { %v9083_v12 = vpop.f32.mrf.mxu1 }
 0x435   :  { %v9139_v49 = vpop.f32.mrf.mxu0  ;;  %v6156_v46 = vpop.f32.mrf.mxu1 }
 0x437   :  { %v6430_v17 = vpop.f32.mrf.mxu0 }
 0x43c   :  { %v9086_v50 = vpop.f32.mrf.mxu1 }
 0x43d   :  { %v9142_v13 = vpop.f32.mrf.mxu0 }
 0x43e   :  { %v6166_v8 = vpop.f32.mrf.mxu1 }
 0x43f   :  { %v6440_v28 = vpop.f32.mrf.mxu0 }
 0x440   :  { %v9105_v44 = vpop.f32.mrf.mxu1 }
 0x441   :  { %v6271_v15 = vadd.f32 %v9105_v44, %v9077_v2 }
 0x442   :  { %v6265_v36 = vpop.f32.mrf.mxu1  ;;  %v9189_v35 = vpop.f32.mrf.mxu0 }
 0x443   :  { %v6266_v29 = vadd.f32 %v6265_v36, %v6136_v45  ;;  %v6450_v34 = vadd.f32 %v9133_v27, %v6271_v15 }
 0x444   :  { %v9108_v56 = vpop.f32.mrf.mxu1  ;;  %v6716_v61 = vpop.f32.mrf.mxu0 }
 0x445   :  { %v6281_v16 = vadd.f32 %v9108_v56, %v9080_v48  ;;  %v6449_v51 = vadd.f32 %v6410_v55, %v6266_v29 }
 0x446   :  { %v6275_v63 = vpop.f32.mrf.mxu1  ;;  %v9192_v23 = vpop.f32.mrf.mxu0 }
 0x447   :  { %v6276_v43 = vadd.f32 %v6275_v63, %v6146_v22  ;;  %v6452_v26 = vadd.f32 %v9136_v31, %v6281_v16 }
 0x448   :  { %v9111_v54 = vpop.f32.mrf.mxu1  ;;  %v6726_v10 = vpop.f32.mrf.mxu0 }
 0x449   :  { %v6291_v1 = vadd.f32 %v9111_v54, %v9083_v12  ;;  %v6451_v4 = vadd.f32 %v6420_v59, %v6276_v43 }
 0x44a   :  { %v6285_v33 = vpop.f32.mrf.mxu1  ;;  %v9195_v11 = vpop.f32.mrf.mxu0 }
 0x44b   :  { %v6286_v3 = vadd.f32 %v6285_v33, %v6156_v46  ;;  %v6454_v6 = vadd.f32 %v9139_v49, %v6291_v1 }
 0x44c   :  { %v9114_v60 = vpop.f32.mrf.mxu1  ;;  %v6736_v55 = vpop.f32.mrf.mxu0 }
 0x44d   :  { %v6301_v20 = vadd.f32 %v9114_v60, %v9086_v50  ;;  %v6453_v42 = vadd.f32 %v6430_v17, %v6286_v3 }
 0x44e   :  { %v6295_v9 = vpop.f32.mrf.mxu1  ;;  %v9198_v44 = vpop.f32.mrf.mxu0 }
 0x44f   :  { %v6296_v27 = vadd.f32 %v6295_v9, %v6166_v8  ;;  %v6456_v48 = vadd.f32 %v9142_v13, %v6301_v20 }
 0x450   :  { %v9161_v39 = vpop.f32.mrf.mxu1  ;;  %v6746_v54 = vpop.f32.mrf.mxu0 }
 0x451   :  { %v6603_v7 = vadd.f32 %v9161_v39, %v6450_v34  ;;  %v6455_v50 = vadd.f32 %v6440_v28, %v6296_v27 }
 0x452   :  { %v6563_v62 = vpop.f32.mrf.mxu1 }
 0x453   :  { %v6756_v37 = vadd.f32 %v9189_v35, %v6603_v7  ;;  %v6602_v32 = vadd.f32 %v6563_v62, %v6449_v51 }
 0x454   :  { %v9164_v21 = vpop.f32.mrf.mxu1 }
 0x455   :  { %v6771_v52 = vadd.f32 %v8302_v57, %v6756_v37  ;;  %v6755_v38 = vadd.f32 %v6716_v61, %v6602_v32  ;;  %v6605_v19 = vadd.f32 %v9164_v21, %v6452_v26 }
 0x456   :  { %v6573_v14 = vpop.f32.mrf.mxu1 }
 0x457   :  { %9299 = vtanh.f32 %v6771_v52  ;;  %v6770_v47 = vadd.f32 %v8302_v57, %v6755_v38  ;;  %v6758_v30 = vadd.f32 %v9192_v23, %v6605_v19  ;;  %v6604_v0 = vadd.f32 %v6573_v14, %v6451_v4 }
 0x458   :  { %v9167_v53 = vpop.f32.mrf.mxu1 }
 0x459   :  { %9301 = vtanh.f32 %v6770_v47  ;;  %v6773_v40 = vadd.f32 %v8302_v57, %v6758_v30  ;;  %v6757_v18 = vadd.f32 %v6726_v10, %v6604_v0  ;;  %v6607_v58 = vadd.f32 %v9167_v53, %v6454_v6 }
 0x45a   :  { %v6583_v2 = vpop.f32.mrf.mxu1 }
 0x45b   :  { %9303 = vtanh.f32 %v6773_v40  ;;  %v6606_v45 = vadd.f32 %v6583_v2, %v6453_v42  ;;  %v6772_v31 = vadd.f32 %v8302_v57, %v6757_v18  ;;  %v6760_v22 = vadd.f32 %v9195_v11, %v6607_v58 }
 0x45c   :  { %v9170_v12 = vpop.f32.mrf.mxu1 }
 0x45d   :  { %v6609_v59 = vadd.f32 %v9170_v12, %v6456_v48  ;;  %v6759_v46 = vadd.f32 %v6736_v55, %v6606_v45  ;;  %9305 = vtanh.f32 %v6772_v31  ;;  %v6775_v17 = vadd.f32 %v8302_v57, %v6760_v22 }
 0x45e   :  { %v6593_v49 = vpop.f32.mrf.mxu1 }
 0x45f   :  { %v6762_v36 = vadd.f32 %v9198_v44, %v6609_v59  ;;  %v6608_v56 = vadd.f32 %v6593_v49, %v6455_v50  ;;  %v6774_v63 = vadd.f32 %v8302_v57, %v6759_v46  ;;  %9307 = vtanh.f32 %v6775_v17 }
 0x461   :  { %v6777_v8 = vadd.f32 %v8302_v57, %v6762_v36  ;;  %v6761_v33 = vadd.f32 %v6746_v54, %v6608_v56  ;;  %9309 = vtanh.f32 %v6774_v63 }
 0x463   :  { %9311 = vtanh.f32 %v6777_v8  ;;  %v6776_v9 = vadd.f32 %v8302_v57, %v6761_v33 }
 0x464   :  { %v9300_v35 = vpop.eup %9299 }
 0x465   :  { %v6811_v15 = vcombine.high %v9300_v35, %v9300_v35  ;;  %v6818_v61 = vrot.slane %v9300_v35, %v10375_v41  ;;  %9313 = vtanh.f32 %v6776_v9 }
 0x466   :  { %v9302_v13 = vpop.eup %9301 }
 0x467   :  { %v6794_v29 = vcombine.high %v9302_v13, %v9302_v13  ;;  %v6801_v28 = vrot.slane %v9302_v13, %v10375_v41  ;;  %v12820_v16 = vrot.slane %v6811_v15, %v10375_v41  ;;  %v6826_v34 = vcombine.high %v6818_v61, %v6818_v61 }
 0x468   :  { %v9304_v60 = vpop.eup %9303  ;;  %v6951_v43 = vrot.slane %v6818_v61, %v10380_v24  ;;  %v7119_v10 = vrot.slane %v6818_v61, %v10383_v5 }
 0x469   :  { %v6808_v23 = vrot.slane %v6794_v29, %v10375_v41  ;;  %v6809_v39 = vcombine.high %v6801_v28, %v6801_v28  ;;  %v6935_v7 = vrot.slane %v6801_v28, %v10380_v24  ;;  %v7103_v51 = vrot.slane %v6801_v28, %v10383_v5 }
 0x46a   :  { %v6845_v1 = vcombine.high %v9304_v60, %v9304_v60  ;;  %v9306_v26 = vpop.eup %9305  ;;  %v12832_v21 = vrot.slane %v9304_v60, %v10375_v41  ;;  %v12843_v14 = vcombine.high %v12820_v16, %v12820_v16  ;;  %v7123_v0 = vrot.slane %v6826_v34, %v10383_v5 }
 0x46b   :  { %v6810_v62 = vcombine.high %v6808_v23, %v6808_v23  ;;  %v6939_v37 = vrot.slane %v6809_v39, %v10380_v24  ;;  %v6943_v32 = vrot.slane %v6808_v23, %v10380_v24  ;;  %v7107_v57 = vrot.slane %v6809_v39, %v10383_v5 }
 0x46c   :  { %v7111_v3 = vrot.slane %v6808_v23, %v10383_v5  ;;  %v12835_v52 = vrot.slane %v6845_v1, %v10375_v41  ;;  %v6828_v42 = vcombine.high %v9306_v26, %v9306_v26  ;;  %v9308_v40 = vpop.eup %9307  ;;  %v7127_v18 = vrot.slane %v12820_v16, %v10383_v5 }
 0x46d   :  { %v6947_v38 = vrot.slane %v6810_v62, %v10380_v24  ;;  %v7060_v19 = vsel %vm3088_vm3, %v6939_v37, %v6935_v7  ;;  %v7115_v4 = vrot.slane %v6810_v62, %v10383_v5  ;;  %v7228_v20 = vsel %vm3090_vm4, %v7107_v57, %v7103_v51  ;;  %v7552_v57 = vld [vmem:[%s13390_s8 + $0x2f0] sm:$0xff] }
 0x46e   :  { %v7061_v6 = vsel %vm3090_vm4, %v6943_v32, %v7060_v19  ;;  %v7229_v47 = vsel %vm3092_vm5, %v7111_v3, %v7228_v20  ;;  %v12849_v30 = vcombine.high %v12835_v52, %v12835_v52  ;;  %v12859_v2 = vcombine.high %v12832_v21, %v12832_v21  ;;  %v9310_v49 = vpop.eup %9309  ;;  %v7551_v19 = vld [vmem:[%s13390_s8 + $0x2e8] sm:$0xff] }
 0x46f   :  { %v7062_v11 = vsel %vm3092_vm5, %v6947_v38, %v7061_v6  ;;  %v7230_v53 = vsel %vm3094_vm6, %v7115_v4, %v7229_v47  ;;  %v6955_v27 = vrot.slane %v6826_v34, %v10380_v24  ;;  %v6959_v45 = vrot.slane %v12820_v16, %v10380_v24 }
 0x470   :  { %v7231_v58 = vsel %vm3096_vm7, %v7119_v10, %v7230_v53  ;;  %v7063_v48 = vsel %vm3094_vm6, %v6951_v43, %v7062_v11  ;;  %v6963_v31 = vrot.slane %v12843_v14, %v10380_v24  ;;  %v7131_v22 = vrot.slane %v12843_v14, %v10383_v5  ;;  %v9312_v54 = vpop.eup %9311 }
 0x471   :  { %v7232_v55 = vsel %vm3098_vm8, %v7123_v0, %v7231_v58  ;;  %v7163_v59 = vrot.slane %v12849_v30, %v10383_v5  ;;  %v6983_v46 = vrot.slane %v12832_v21, %v10380_v24  ;;  %v6835_v50 = vrot.slane %v9306_v26, %v10375_v41  ;;  %v7550_v0 = vld [vmem:[%s13390_s8 + $0x2e0] sm:$0xff] }
 0x472   :  { %v7233_v12 = vsel %vm3100_vm9, %v7127_v18, %v7232_v55  ;;  %v6842_v44 = vrot.slane %v6828_v42, %v10375_v41  ;;  %v6879_v17 = vcombine.high %v9308_v40, %v9308_v40  ;;  %v7064_v36 = vsel %vm3096_vm7, %v6955_v27, %v7063_v48  ;;  %v12938_v18 = vpop.eup %9313  ;;  %v7549_v55 = vld [vmem:[%s13390_s8 + $0x2d8] sm:$0xff] }
 0x473   :  { %7260 = vst [vmem:[#allocation7] sm:$0xfe] %v7233_v12  ;;  %v6987_v56 = vrot.slane %v12859_v2, %v10380_v24  ;;  %v6991_v63 = vrot.slane %v12835_v52, %v10380_v24  ;;  %v6995_v35 = vrot.slane %v12849_v30, %v10380_v24  ;;  %7262 = vst [vmem:[#allocation7 + $0x10] sm:$0x1] %v7163_v59  ;;  %v7538_v30 = vld [vmem:[%s13390_s8 + $0x280] sm:$0xff] }
 0x474   :  { %v7151_v8 = vrot.slane %v12832_v21, %v10383_v5  ;;  %v6843_v33 = vcombine.high %v6835_v50, %v6835_v50  ;;  %v6844_v13 = vcombine.high %v6842_v44, %v6842_v44  ;;  %v12887_v15 = vrot.slane %v9308_v40, %v10375_v41 }
 0x475   :  { %v6975_v61 = vrot.slane %v6842_v44, %v10380_v24  ;;  %v7135_v60 = vrot.slane %v6835_v50, %v10383_v5  ;;  %v7143_v29 = vrot.slane %v6842_v44, %v10383_v5  ;;  %v6862_v28 = vcombine.high %v9310_v49, %v9310_v49 }
 0x476   :  { %v6967_v9 = vrot.slane %v6835_v50, %v10380_v24  ;;  %v6971_v16 = vrot.slane %v6843_v33, %v10380_v24  ;;  %v7139_v34 = vrot.slane %v6843_v33, %v10383_v5  ;;  %v12896_v23 = vrot.slane %v6879_v17, %v10375_v41  ;;  %v7548_v50 = vld [vmem:[%s13390_s8 + $0x2d0] sm:$0xff]  ;;  %v7547_v33 = vld [vmem:[%s13390_s8 + $0x2c8] sm:$0xff] }
 0x477   :  { %v6979_v39 = vrot.slane %v6844_v13, %v10380_v24  ;;  %v7147_v43 = vrot.slane %v6844_v13, %v10383_v5  ;;  %v7234_v7 = vsel %vm3088_vm3, %v7135_v60, %v7131_v22  ;;  %v6869_v51 = vrot.slane %v9310_v49, %v10375_v41 }
 0x478   :  { %v7155_v1 = vrot.slane %v12859_v2, %v10383_v5  ;;  %v7067_v62 = vsel %vm3088_vm3, %v6971_v16, %v6967_v9  ;;  %v7235_v37 = vsel %vm3090_vm4, %v7139_v34, %v7234_v7  ;;  %v12908_v32 = vcombine.high %v12887_v15, %v12887_v15  ;;  %v7545_v34 = vld [vmem:[%s13390_s8 + $0x2b8] sm:$0xff] }
 0x479   :  { %v12914_v26 = vsel %vm3098_vm8, %v6959_v45, %v7064_v36  ;;  %v7159_v10 = vrot.slane %v12835_v52, %v10383_v5  ;;  %v7068_v3 = vsel %vm3090_vm4, %v6975_v61, %v7067_v62  ;;  %v7236_v21 = vsel %vm3092_vm5, %v7143_v29, %v7235_v37  ;;  %v7540_v52 = vld [vmem:[%s13390_s8 + $0x290] sm:$0xff] }
 0x47a   :  { %v7304_v38 = vld [vmem:[#allocation7] sm:$0xff]  ;;  %v12925_v4 = vcombine.high %v12896_v23, %v12896_v23  ;;  %v7015_v20 = vrot.slane %v12887_v15, %v10380_v24  ;;  %v6913_v6 = vcombine.high %v9312_v54, %v9312_v54  ;;  %v12930_v47 = vrot.slane %v9312_v54, %v10375_v41 }
 0x47b   :  { %7405 = vmatmul.mubr.f32.vlgmr.msra.gmra.mxu1 %v7304_v38  ;;  %v7069_v11 = vsel %vm3092_vm5, %v6979_v39, %v7068_v3  ;;  %v7237_v53 = vsel %vm3094_vm6, %v7147_v43, %v7236_v21  ;;  %v6876_v42 = vrot.slane %v6862_v28, %v10375_v41  ;;  %v6877_v40 = vcombine.high %v6869_v51, %v6869_v51 }
 0x47c   :  { %7555 = vmatpush1.msra.mxu1 %v7552_v57  ;;  %v7019_v58 = vrot.slane %v12908_v32, %v10380_v24  ;;  %v7023_v27 = vrot.slane %v12896_v23, %v10380_v24  ;;  %v6999_v45 = vrot.slane %v6869_v51, %v10380_v24  ;;  %v7167_v48 = vrot.slane %v6869_v51, %v10383_v5  ;;  %v7544_v51 = vld [vmem:[%s13390_s8 + $0x2b0] sm:$0xff]  ;;  %v7543_v57 = vld [vmem:[%s13390_s8 + $0x2a8] sm:$0xff] }
 0x47d   :  { %7556 = vmatprep.subr.mxu1 %v7551_v19  ;;  %v6878_v22 = vcombine.high %v6876_v42, %v6876_v42  ;;  %v7003_v12 = vrot.slane %v6877_v40, %v10380_v24  ;;  %v7007_v59 = vrot.slane %v6876_v42, %v10380_v24  ;;  %v7171_v49 = vrot.slane %v6877_v40, %v10383_v5 }
 0x47e   :  { %7557 = vmatpush1.msra.mxu1 %v7550_v0  ;;  %v7070_v44 = vsel %vm3094_vm6, %v6983_v46, %v7069_v11  ;;  %v7238_v17 = vsel %vm3096_vm7, %v7151_v8, %v7237_v53  ;;  %v7175_v36 = vrot.slane %v6876_v42, %v10383_v5  ;;  %v12959_v54 = vrot.slane %v6913_v6, %v10375_v41  ;;  %v7546_v8 = vld [vmem:[%s13390_s8 + $0x2c0] sm:$0xff] }
 0x47f   :  { %7410 = vmatprep.mubr.f32.mxu1 %v13501_v25  ;;  %v7011_v13 = vrot.slane %v6878_v22, %v10380_v24  ;;  %v7074_v61 = vsel %vm3088_vm3, %v7003_v12, %v6999_v45  ;;  %v7179_v60 = vrot.slane %v6878_v22, %v10383_v5  ;;  %v7241_v46 = vsel %vm3090_vm4, %v7171_v49, %v7167_v48  ;;  %v7542_v6 = vld [vmem:[%s13390_s8 + $0x2a0] sm:$0xff]  ;;  %v7537_v12 = vld [vmem:[%s13390_s8 + $0x278] sm:$0xff] }
 0x480   :  { %7558 = vmatprep.subr.mxu1 %v7549_v55  ;;  %v7183_v29 = vrot.slane %v12887_v15, %v10383_v5  ;;  %v7075_v28 = vsel %vm3090_vm4, %v7007_v59, %v7074_v61  ;;  %v7242_v9 = vsel %vm3092_vm5, %v7175_v36, %v7241_v46  ;;  %v12978_v16 = vcombine.high %v12959_v54, %v12959_v54 }
 0x481   :  { %7559 = vmatpush1.msra.mxu1 %v7548_v50  ;;  %v7239_v39 = vsel %vm3098_vm8, %v7155_v1, %v7238_v17  ;;  %v7187_v43 = vrot.slane %v12908_v32, %v10383_v5  ;;  %v7076_v15 = vsel %vm3092_vm5, %v7011_v13, %v7075_v28  ;;  %v7243_v7 = vsel %vm3094_vm6, %v7179_v60, %v7242_v9  ;;  %v7536_v17 = vld [vmem:[%s13390_s8 + $0x270] sm:$0xff] }
 0x482   :  { %7560 = vmatprep.subr.mxu1 %v7547_v33  ;;  %v7071_v62 = vsel %vm3096_vm7, %v6987_v56, %v7070_v44  ;;  %v7027_v1 = vrot.slane %v12925_v4, %v10380_v24  ;;  %v7077_v37 = vsel %vm3094_vm6, %v7015_v20, %v7076_v15  ;;  %v7244_v32 = vsel %vm3096_vm7, %v7183_v29, %v7243_v7  ;;  %v7685_v60 = vld [vmem:[%s13390_s8 + $0x3f0] sm:$0xff]  ;;  %v7683_v15 = vld [vmem:[%s13390_s8 + $0x3e0] sm:$0xff] }
 0x483   :  { %7561 = vmatpush1.msra.mxu1 %v7546_v8  ;;  %v7191_v3 = vrot.slane %v12896_v23, %v10383_v5  ;;  %v7078_v21 = vsel %vm3096_vm7, %v7019_v58, %v7077_v37  ;;  %v7245_v2 = vsel %vm3098_vm8, %v7187_v43, %v7244_v32  ;;  %v7227_v56 = vrot.slane %v12978_v16, %v10383_v5  ;;  %v7681_v32 = vld [vmem:[%s13390_s8 + $0x3d0] sm:$0xff] }
 0x484   :  { %7562 = vmatprep.subr.mxu1 %v7545_v34  ;;  %v6896_v38 = vcombine.high %v12938_v18, %v12938_v18  ;;  %v6903_v19 = vrot.slane %v12938_v18, %v10375_v41  ;;  %v13017_v23 = vsel %vm3100_vm9, %v6963_v31, %v12914_v26  ;;  %v7240_v20 = vsel %vm3100_vm9, %v7159_v10, %v7239_v39  ;;  %v7541_v10 = vld [vmem:[%s13390_s8 + $0x298] sm:$0xff]  ;;  %v7539_v18 = vld [vmem:[%s13390_s8 + $0x288] sm:$0xff] }
 0x485   :  { %7563 = vmatpush1.msra.mxu1 %v7544_v51  ;;  %7265 = vst [vmem:[#allocation7 + $0x28] sm:$0x1] %v7227_v56  ;;  %7092 = vst [vmem:[#allocation6 + $0x1] sm:$0xff] %v13017_v23  ;;  %v7072_v14 = vsel %vm3098_vm8, %v6991_v63, %v7071_v62  ;;  %v7246_v31 = vsel %vm3100_vm9, %v7191_v3, %v7245_v2  ;;  %v7079_v26 = vsel %vm3098_vm8, %v7023_v27, %v7078_v21  ;;  %v7680_v3 = vld [vmem:[%s13390_s8 + $0x3c8] sm:$0xff]  ;;  %v7679_v2 = vld [vmem:[%s13390_s8 + $0x3c0] sm:$0xff] }
 0x486   :  { %7261 = vst [vmem:[#allocation7 + $0x8] sm:$0xff] %v7240_v20  ;;  %7411 = vmatmul.mubr.f32.gmra.mxu1 %v7240_v20  ;;  %7564 = vmatprep.subr.mxu1 %v7543_v57  ;;  %v7195_v0 = vrot.slane %v12925_v4, %v10383_v5  ;;  %v6910_v11 = vrot.slane %v6896_v38, %v10375_v41  ;;  %7263 = vst [vmem:[#allocation7 + $0x18] sm:$0xfe] %v7246_v31  ;;  %v7535_v56 = vld [vmem:[%s13390_s8 + $0x268] sm:$0xff]  ;;  %v7678_v38 = vld [vmem:[%s13390_s8 + $0x3b8] sm:$0xff] }
 0x487   :  { %v6911_v53 = vcombine.high %v6903_v19, %v6903_v19  ;;  %v7199_v42 = vrot.slane %v6903_v19, %v10383_v5  ;;  %7416 = vmatprep.mubr.f32.mxu1 %v13501_v25  ;;  %v6928_v63 = vcombine.high %v12930_v47, %v12930_v47  ;;  %v7031_v40 = vrot.slane %v6903_v19, %v10380_v24  ;;  %v7677_v20 = vld [vmem:[%s13390_s8 + $0x3b0] sm:$0xff]  ;;  %v7675_v31 = vld [vmem:[%s13390_s8 + $0x3a0] sm:$0xff] }
 0x488   :  { %v13051_v41 = vsel %vm3100_vm9, %v6995_v35, %v7072_v14  ;;  %v13054_v4 = vsel %vm3100_vm9, %v7027_v1, %v7079_v26  ;;  %7565 = vmatpush1.msra.mxu1 %v7542_v6  ;;  %v6912_v58 = vcombine.high %v6910_v11, %v6910_v11  ;;  %v7039_v45 = vrot.slane %v6910_v11, %v10380_v24  ;;  %v7676_v6 = vld [vmem:[%s13390_s8 + $0x3a8] sm:$0xff]  ;;  %v7534_v14 = vld [vmem:[%s13390_s8 + $0x260] sm:$0xff]  ;;  %v7533_v26 = vld [vmem:[%s13390_s8 + $0x258] sm:$0xff] }
 0x489   :  { %v7035_v27 = vrot.slane %v6911_v53, %v10380_v24  ;;  %v7203_v48 = vrot.slane %v6911_v53, %v10383_v5  ;;  %7093 = vst [vmem:[#allocation6 + $0x9] sm:$0xff] %v13051_v41  ;;  %7094 = vst [vmem:[#allocation6 + $0x19] sm:$0xff] %v13054_v4  ;;  %7566 = vmatprep.subr.mxu1 %v7541_v10  ;;  %v7047_v35 = vrot.slane %v12930_v47, %v10380_v24  ;;  %v7674_v10 = vld [vmem:[%s13390_s8 + $0x398] sm:$0xff] }
 0x48a   :  { %v7207_v55 = vrot.slane %v6910_v11, %v10383_v5  ;;  %v7247_v22 = vsel %vm3088_vm3, %v7199_v42, %v7195_v0  ;;  %7567 = vmatpush1.msra.mxu1 %v7540_v52  ;;  %v7043_v59 = vrot.slane %v6912_v58, %v10380_v24  ;;  %v7211_v50 = vrot.slane %v6912_v58, %v10383_v5  ;;  %v7673_v0 = vld [vmem:[%s13390_s8 + $0x390] sm:$0xff]  ;;  %v7672_v42 = vld [vmem:[%s13390_s8 + $0x388] sm:$0xff]  ;;  %v7529_v58 = vld [vmem:[%s13390_s8 + $0x238] sm:$0xff] }
 0x48b   :  { %v7081_v49 = vsel %vm3088_vm3, %v7035_v27, %v7031_v40  ;;  %v7248_v44 = vsel %vm3090_vm4, %v7203_v48, %v7247_v22  ;;  %7568 = vmatprep.subr.mxu1 %v7539_v18  ;;  %v7051_v36 = vrot.slane %v6928_v63, %v10380_v24  ;;  %v7215_v33 = vrot.slane %v12930_v47, %v10383_v5  ;;  %v7684_v47 = vld [vmem:[%s13390_s8 + $0x3e8] sm:$0xff]  ;;  %v7532_v11 = vld [vmem:[%s13390_s8 + $0x250] sm:$0xff]  ;;  %v7530_v40 = vld [vmem:[%s13390_s8 + $0x240] sm:$0xff] }
 0x48c   :  { %v7082_v13 = vsel %vm3090_vm4, %v7039_v45, %v7081_v49  ;;  %v7249_v61 = vsel %vm3092_vm5, %v7207_v55, %v7248_v44  ;;  %7569 = vmatpush1.msra.mxu1 %v7538_v30  ;;  %v7055_v46 = vrot.slane %v12959_v54, %v10380_v24  ;;  %v7219_v8 = vrot.slane %v6928_v63, %v10383_v5  ;;  %v7268_v9 = vld [vmem:[#allocation6] sm:$0xff]  ;;  %v7531_v52 = vld [vmem:[%s13390_s8 + $0x248] sm:$0xff]  ;;  %v7670_v18 = vld [vmem:[%s13390_s8 + $0x378] sm:$0xff] }
 0x48d   :  { %v7083_v29 = vsel %vm3092_vm5, %v7043_v59, %v7082_v13  ;;  %v7250_v28 = vsel %vm3094_vm6, %v7211_v50, %v7249_v61  ;;  %7570 = vmatprep.subr.mxu1 %v7537_v12  ;;  %v7223_v34 = vrot.slane %v12959_v54, %v10383_v5  ;;  %7494 = vmatmul.mubr.f32.vlgmr.msra.gmra.mxu0 %v7268_v9  ;;  %v7306_v7 = vld [vmem:[#allocation7 + $0x18] sm:$0xff]  ;;  %v7682_v54 = vld [vmem:[%s13390_s8 + $0x3d8] sm:$0xff]  ;;  %v7671_v63 = vld [vmem:[%s13390_s8 + $0x380] sm:$0xff] }
 0x48e   :  { %v7084_v39 = vsel %vm3094_vm6, %v7047_v35, %v7083_v29  ;;  %v7251_v43 = vsel %vm3096_vm7, %v7215_v33, %v7250_v28  ;;  %7571 = vmatpush1.msra.mxu1 %v7536_v17  ;;  %v7059_v51 = vrot.slane %v12978_v16, %v10380_v24  ;;  %7688 = vmatpush1.msra.mxu0 %v7685_v60  ;;  %v7669_v27 = vld [vmem:[%s13390_s8 + $0x370] sm:$0xff]  ;;  %v7668_v48 = vld [vmem:[%s13390_s8 + $0x368] sm:$0xff]  ;;  %v7667_v35 = vld [vmem:[%s13390_s8 + $0x360] sm:$0xff] }
 0x48f   :  { %v7085_v62 = vsel %vm3096_vm7, %v7051_v36, %v7084_v39  ;;  %v7252_v1 = vsel %vm3098_vm8, %v7219_v8, %v7251_v43  ;;  %7499 = vmatprep.mubr.f32.mxu0 %v13501_v25  ;;  %7689 = vmatprep.subr.mxu0 %v7684_v47  ;;  %v7528_v45 = vld [vmem:[%s13390_s8 + $0x230] sm:$0xff]  ;;  %v7527_v30 = vld [vmem:[%s13390_s8 + $0x228] sm:$0xff]  ;;  %v7526_v55 = vld [vmem:[%s13390_s8 + $0x220] sm:$0xff] }
 0x490   :  { %v7269_v37 = vld [vmem:[#allocation6 + $0x8] sm:$0xff]  ;;  %7417 = vmatmul.mubr.f32.gmra.mxu1 %v7306_v7  ;;  %v7253_v16 = vsel %vm3100_vm9, %v7223_v34, %v7252_v1  ;;  %v7086_v57 = vsel %vm3098_vm8, %v7055_v46, %v7085_v62  ;;  %7690 = vmatpush1.msra.mxu0 %v7683_v15  ;;  %v7270_v19 = vld [vmem:[#allocation6 + $0x18] sm:$0xff]  ;;  %v7665_v59 = vld [vmem:[%s13390_s8 + $0x350] sm:$0xff] }
 0x491   :  { %7422 = vmatprep.mubr.f32.mxu1 %v13501_v25  ;;  %7264 = vst [vmem:[#allocation7 + $0x20] sm:$0xff] %v7253_v16  ;;  %v13122_v21 = vsel %vm3100_vm9, %v7059_v51, %v7086_v57  ;;  %7691 = vmatprep.subr.mxu0 %v7682_v54  ;;  %v7666_v22 = vld [vmem:[%s13390_s8 + $0x358] sm:$0xff]  ;;  %v7524_v49 = vld [vmem:[%s13390_s8 + $0x210] sm:$0xff]  ;;  %v7664_v50 = vld [vmem:[%s13390_s8 + $0x348] sm:$0xff] }
 0x492   :  { %7500 = vmatmul.mubr.f32.gmra.mxu0 %v7269_v37  ;;  %7095 = vst [vmem:[#allocation6 + $0x21] sm:$0xff] %v13122_v21  ;;  %7572 = vmatprep.subr.mxu1 %v7535_v56  ;;  %v7525_v12 = vld [vmem:[%s13390_s8 + $0x218] sm:$0xff]  ;;  %v7523_v44 = vld [vmem:[%s13390_s8 + $0x208] sm:$0xff]  ;;  %v7663_v17 = vld [vmem:[%s13390_s8 + $0x340] sm:$0xff] }
 0x493   :  { %7692 = vmatpush1.msra.mxu0 %v7681_v32  ;;  %7505 = vmatprep.mubr.f32.mxu0 %v13501_v25  ;;  %v7522_v36 = vld [vmem:[%s13390_s8 + $0x200] sm:$0xff]  ;;  %v7662_v33 = vld [vmem:[%s13390_s8 + $0x338] sm:$0xff]  ;;  %v7661_v13 = vld [vmem:[%s13390_s8 + $0x330] sm:$0xff] }
 0x494   :  { %7693 = vmatprep.subr.mxu0 %v7680_v3  ;;  %7423 = vmatmul.mubr.f32.gmra.mxu1 %v7253_v16  ;;  %v7660_v61 = vld [vmem:[%s13390_s8 + $0x328] sm:$0xff]  ;;  %v7659_v60 = vld [vmem:[%s13390_s8 + $0x320] sm:$0xff]  ;;  %v7819_v46 = vld [vmem:[%s13390_s8 + $0x4f8] sm:$0xff] }
 0x495   :  { %7694 = vmatpush1.msra.mxu0 %v7679_v2  ;;  %7573 = vmatpush1.msra.mxu1 %v7534_v14  ;;  %v7658_v8 = vld [vmem:[%s13390_s8 + $0x318] sm:$0xff]  ;;  %v7818_v29 = vld [vmem:[%s13390_s8 + $0x4f0] sm:$0xff]  ;;  %v7817_v9 = vld [vmem:[%s13390_s8 + $0x4e8] sm:$0xff] }
 0x496   :  { %7695 = vmatprep.subr.mxu0 %v7678_v38  ;;  %7506 = vmatmul.mubr.f32.gmra.mxu0 %v7270_v19  ;;  %v7657_v28 = vld [vmem:[%s13390_s8 + $0x310] sm:$0xff]  ;;  %v7655_v47 = vld [vmem:[%s13390_s8 + $0x300] sm:$0xff]  ;;  %v7815_v39 = vld [vmem:[%s13390_s8 + $0x4d8] sm:$0xff] }
 0x497   :  { %7696 = vmatpush1.msra.mxu0 %v7677_v20  ;;  %7511 = vmatprep.mubr.f32.mxu0 %v13501_v25  ;;  %v7816_v34 = vld [vmem:[%s13390_s8 + $0x4e0] sm:$0xff]  ;;  %v7651_v43 = vld [vmem:[#allocation7 + $0x1] sm:$0xff]  ;;  %v7813_v7 = vld [vmem:[%s13390_s8 + $0x4c8] sm:$0xff] }
 0x498   :  { %7697 = vmatprep.subr.mxu0 %v7676_v6  ;;  %7574 = vmatprep.subr.mxu1 %v7533_v26  ;;  %v7814_v15 = vld [vmem:[%s13390_s8 + $0x4d0] sm:$0xff]  ;;  %v7812_v51 = vld [vmem:[%s13390_s8 + $0x4c0] sm:$0xff]  ;;  %v7809_v54 = vld [vmem:[%s13390_s8 + $0x4a8] sm:$0xff] }
 0x499   :  { %7698 = vmatpush1.msra.mxu0 %v7675_v31  ;;  %v7271_v53 = vld [vmem:[#allocation6 + $0x20] sm:$0xff]  ;;  %7575 = vmatpush1.msra.mxu1 %v7532_v11  ;;  %v7810_v1 = vld [vmem:[%s13390_s8 + $0x4b0] sm:$0xff]  ;;  %v7807_v16 = vld [vmem:[%s13390_s8 + $0x498] sm:$0xff] }
 0x49a   :  { %7699 = vmatprep.subr.mxu0 %v7674_v10  ;;  %7512 = vmatmul.mubr.f32.gmra.mxu0 %v7271_v53  ;;  %v7652_v62 = vld [vmem:[#allocation7 + $0x9] sm:$0xff]  ;;  %v7653_v32 = vld [vmem:[#allocation7 + $0x19] sm:$0xff]  ;;  %v7654_v2 = vld [vmem:[#allocation7 + $0x21] sm:$0xff] }
 0x49b   :  { %7700 = vmatpush1.msra.mxu0 %v7673_v0  ;;  %7576 = vmatprep.subr.mxu1 %v7531_v52  ;;  %v7808_v37 = vld [vmem:[%s13390_s8 + $0x4a0] sm:$0xff]  ;;  %v7805_v57 = vld [vmem:[%s13390_s8 + $0x488] sm:$0xff]  ;;  %v7803_v56 = vld [vmem:[%s13390_s8 + $0x478] sm:$0xff] }
 0x49c   :  { %7701 = vmatprep.subr.mxu0 %v7672_v42  ;;  %7577 = vmatpush1.msra.mxu1 %v7530_v40  ;;  %v7804_v3 = vld [vmem:[%s13390_s8 + $0x480] sm:$0xff]  ;;  %v7802_v38 = vld [vmem:[%s13390_s8 + $0x470] sm:$0xff]  ;;  %v7799_v20 = vld [vmem:[%s13390_s8 + $0x458] sm:$0xff] }
 0x49d   :  { %7702 = vmatpush1.msra.mxu0 %v7671_v63  ;;  %7578 = vmatprep.subr.mxu1 %v7529_v58  ;;  %v7800_v19 = vld [vmem:[%s13390_s8 + $0x460] sm:$0xff]  ;;  %v7798_v6 = vld [vmem:[%s13390_s8 + $0x450] sm:$0xff]  ;;  %v7797_v14 = vld [vmem:[%s13390_s8 + $0x448] sm:$0xff] }
 0x49e   :  { %7703 = vmatprep.subr.mxu0 %v7670_v18  ;;  %7579 = vmatpush1.msra.mxu1 %v7528_v45  ;;  %v7796_v31 = vld [vmem:[%s13390_s8 + $0x440] sm:$0xff]  ;;  %v7795_v26 = vld [vmem:[%s13390_s8 + $0x438] sm:$0xff]  ;;  %v7794_v10 = vld [vmem:[%s13390_s8 + $0x430] sm:$0xff] }
 0x49f   :  { %7704 = vmatpush1.msra.mxu0 %v7669_v27  ;;  %7580 = vmatprep.subr.mxu1 %v7527_v30  ;;  %v7793_v0 = vld [vmem:[%s13390_s8 + $0x428] sm:$0xff]  ;;  %v7792_v11 = vld [vmem:[%s13390_s8 + $0x420] sm:$0xff]  ;;  %v7791_v53 = vld [vmem:[%s13390_s8 + $0x418] sm:$0xff] }
 0x4a0   :  { %7705 = vmatprep.subr.mxu0 %v7668_v48  ;;  %7581 = vmatpush1.msra.mxu1 %v7526_v55  ;;  %v7790_v42 = vld [vmem:[%s13390_s8 + $0x410] sm:$0xff]  ;;  %v7789_v52 = vld [vmem:[%s13390_s8 + $0x408] sm:$0xff]  ;;  %v7788_v63 = vld [vmem:[%s13390_s8 + $0x400] sm:$0xff] }
 0x4a1   :  { %7706 = vmatpush1.msra.mxu0 %v7667_v35  ;;  %7582 = vmatprep.subr.mxu1 %v7525_v12  ;;  %v7784_v40 = vld [vmem:[#allocation6 + $0x2] sm:$0xff]  ;;  %v7785_v18 = vld [vmem:[#allocation6 + $0xa] sm:$0xff]  ;;  %v7786_v58 = vld [vmem:[#allocation6 + $0x1a] sm:$0xff] }
 0x4a2   :  { %7707 = vmatprep.subr.mxu0 %v7666_v22  ;;  %7583 = vmatpush1.msra.mxu1 %v7524_v49  ;;  %v7787_v27 = vld [vmem:[#allocation6 + $0x22] sm:$0xff] }
 0x4a3   :  { %7708 = vmatpush1.msra.mxu0 %v7665_v59  ;;  %7584 = vmatprep.subr.mxu1 %v7523_v44 }
 0x4a4   :  { %7709 = vmatprep.subr.mxu0 %v7664_v50  ;;  %7585 = vmatpush1.msra.mxu1 %v7522_v36 }
 0x4a5   :  { %7710 = vmatpush1.msra.mxu0 %v7663_v17  ;;  %7618 = vmatprep.mubr.f32.mxu1 %v13501_v25 }
 0x4a6   :  { %7711 = vmatprep.subr.mxu0 %v7662_v33  ;;  %7619 = vmatmul.mubr.f32.vlgmr.msra.gmra.mxu1 %v13017_v23  ;;  %v7656_v23 = vld [vmem:[%s13390_s8 + $0x308] sm:$0xff] }
 0x4a7   :  { %7712 = vmatpush1.msra.mxu0 %v7661_v13  ;;  %7751 = vmatprep.mubr.f32.mxu0 %v13501_v25 }
 0x4a8   :  { %7713 = vmatprep.subr.mxu0 %v7660_v61  ;;  %7820 = vmatprep.subr.mxu1 %v7819_v46 }
 0x4a9   :  { %7714 = vmatpush1.msra.mxu0 %v7659_v60  ;;  %7821 = vmatpush1.msra.mxu1 %v7818_v29 }
 0x4aa   :  { %7715 = vmatprep.subr.mxu0 %v7658_v8  ;;  %7822 = vmatprep.subr.mxu1 %v7817_v9 }
 0x4ab   :  { %7716 = vmatpush1.msra.mxu0 %v7657_v28  ;;  %7624 = vmatprep.mubr.f32.mxu1 %v13501_v25 }
 0x4ac   :  { %7717 = vmatprep.subr.mxu0 %v7656_v23  ;;  %7823 = vmatpush1.msra.mxu1 %v7816_v34 }
 0x4ad   :  { %7718 = vmatpush1.msra.mxu0 %v7655_v47  ;;  %7625 = vmatmul.mubr.f32.gmra.mxu1 %v13051_v41  ;;  %v7811_v41 = vld [vmem:[%s13390_s8 + $0x4b8] sm:$0xff] }
 0x4ae   :  { %7752 = vmatmul.mubr.f32.vlgmr.msra.gmra.mxu0 %v7651_v43  ;;  %7824 = vmatprep.subr.mxu1 %v7815_v39 }
 0x4af   :  { %7757 = vmatprep.mubr.f32.mxu0 %v13501_v25  ;;  %7825 = vmatpush1.msra.mxu1 %v7814_v15 }
 0x4b0   :  { %7630 = vmatprep.mubr.f32.mxu1 %v13501_v25  ;;  %7826 = vmatprep.subr.mxu1 %v7813_v7 }
 0x4b1   :  { %7827 = vmatpush1.msra.mxu1 %v7812_v51  ;;  %v7917_v51 = vld [vmem:[%s13392_s9] sm:$0x3] }
 0x4b2   :  { %7758 = vmatmul.mubr.f32.gmra.mxu0 %v7652_v62  ;;  %7631 = vmatmul.mubr.f32.gmra.mxu1 %v13054_v4  ;;  %v7806_v4 = vld [vmem:[%s13390_s8 + $0x490] sm:$0xff] }
 0x4b3   :  { %7763 = vmatprep.mubr.f32.mxu0 %v13501_v25  ;;  %7828 = vmatprep.subr.mxu1 %v7811_v41 }
 0x4b4   :  { %7636 = vmatprep.mubr.f32.mxu1 %v13501_v25  ;;  %7829 = vmatpush1.msra.mxu1 %v7810_v1 }
 0x4b5   :  { %7830 = vmatprep.subr.mxu1 %v7809_v54 }
 0x4b6   :  { %7764 = vmatmul.mubr.f32.gmra.mxu0 %v7653_v32  ;;  %7831 = vmatpush1.msra.mxu1 %v7808_v37 }
 0x4b7   :  { %7769 = vmatprep.mubr.f32.mxu0 %v13501_v25  ;;  %7637 = vmatmul.mubr.f32.gmra.mxu1 %v13122_v21  ;;  %v7801_v21 = vld [vmem:[%s13390_s8 + $0x468] sm:$0xff] }
 0x4b8   :  { %7832 = vmatprep.subr.mxu1 %v7807_v16  ;;  %7884 = vmatprep.mubr.f32.mxu1 %v13501_v25 }
 0x4b9   :  { %7833 = vmatpush1.msra.mxu1 %v7806_v4  ;;  %v7922_v4 = vrot.slane %v7917_v51, %v10380_v24 }
 0x4ba   :  { %7770 = vmatmul.mubr.f32.gmra.mxu0 %v7654_v2  ;;  %7834 = vmatprep.subr.mxu1 %v7805_v57 }
 0x4bb   :  { %7835 = vmatpush1.msra.mxu1 %v7804_v3 }
 0x4bc   :  { %7836 = vmatprep.subr.mxu1 %v7803_v56 }
 0x4bd   :  { %7837 = vmatpush1.msra.mxu1 %v7802_v38 }
 0x4be   :  { %7838 = vmatprep.subr.mxu1 %v7801_v21  ;;  %v7926_v21 = vrot.slane %v7917_v51, %v10383_v5 }
 0x4bf   :  { %7839 = vmatpush1.msra.mxu1 %v7800_v19 }
 0x4c0   :  { %7840 = vmatprep.subr.mxu1 %v7799_v20 }
 0x4c1   :  { %7841 = vmatpush1.msra.mxu1 %v7798_v6 }
 0x4c2   :  { %7842 = vmatprep.subr.mxu1 %v7797_v14 }
 0x4c3   :  { %7843 = vmatpush1.msra.mxu1 %v7796_v31 }
 0x4c4   :  { %7844 = vmatprep.subr.mxu1 %v7795_v26 }
 0x4c5   :  { %7845 = vmatpush1.msra.mxu1 %v7794_v10 }
 0x4c6   :  { %7846 = vmatprep.subr.mxu1 %v7793_v0 }
 0x4c7   :  { %7847 = vmatpush1.msra.mxu1 %v7792_v11 }
 0x4c8   :  { %7848 = vmatprep.subr.mxu1 %v7791_v53 }
 0x4c9   :  { %7849 = vmatpush1.msra.mxu1 %v7790_v42 }
 0x4ca   :  { %7850 = vmatprep.subr.mxu1 %v7789_v52 }
 0x4cb   :  { %7851 = vmatpush1.msra.mxu1 %v7788_v63 }
 0x4cc   :  { %7885 = vmatmul.mubr.f32.vlgmr.msra.gmra.mxu1 %v7784_v40 }
 0x4cd   :  { %7890 = vmatprep.mubr.f32.mxu1 %v13501_v25 }
 0x4d0   :  { %7891 = vmatmul.mubr.f32.gmra.mxu1 %v7785_v18 }
 0x4d1   :  { %7896 = vmatprep.mubr.f32.mxu1 %v13501_v25 }
 0x4d4   :  { %7897 = vmatmul.mubr.f32.gmra.mxu1 %v7786_v58 }
 0x4d5   :  { %7902 = vmatprep.mubr.f32.mxu1 %v13501_v25 }
 0x4d8   :  { %7903 = vmatmul.mubr.f32.gmra.mxu1 %v7787_v27 }
 0x53b   :  { %v7406_v45 = vpop.f32.mrf.mxu1 }
 0x53d   :  { %v7408_v48 = vpop.f32.mrf.mxu1 }
 0x546   :  { %v7412_v30 = vpop.f32.mrf.mxu1 }
 0x548   :  { %v7414_v55 = vpop.f32.mrf.mxu1 }
 0x54d   :  { %v7495_v35 = vpop.f32.mrf.mxu0 }
 0x54e   :  { %v7496_v34 = vadd.f32 %v7495_v35, %v7406_v45 }
 0x54f   :  { %v7497_v22 = vpop.f32.mrf.mxu0 }
 0x550   :  { %v7418_v12 = vpop.f32.mrf.mxu1  ;;  %v7498_v15 = vadd.f32 %v7497_v22, %v7408_v48 }
 0x552   :  { %v7501_v59 = vpop.f32.mrf.mxu0  ;;  %v7420_v49 = vpop.f32.mrf.mxu1 }
 0x553   :  { %v7502_v62 = vadd.f32 %v7501_v59, %v7412_v30 }
 0x554   :  { %v7503_v50 = vpop.f32.mrf.mxu0  ;;  %v7424_v44 = vpop.f32.mrf.mxu1 }
 0x555   :  { %v7504_v37 = vadd.f32 %v7503_v50, %v7414_v55 }
 0x556   :  { %v7507_v17 = vpop.f32.mrf.mxu0  ;;  %v7426_v36 = vpop.f32.mrf.mxu1 }
 0x557   :  { %v7508_v57 = vadd.f32 %v7507_v17, %v7418_v12 }
 0x558   :  { %v7509_v13 = vpop.f32.mrf.mxu0 }
 0x559   :  { %v7510_v19 = vadd.f32 %v7509_v13, %v7420_v49 }
 0x55a   :  { %v7513_v60 = vpop.f32.mrf.mxu0 }
 0x55b   :  { %v7514_v0 = vadd.f32 %v7513_v60, %v7424_v44 }
 0x55c   :  { %v7515_v46 = vpop.f32.mrf.mxu0 }
 0x55d   :  { %v7516_v63 = vadd.f32 %v7515_v46, %v7426_v36 }
 0x566   :  { %v7620_v33 = vpop.f32.mrf.mxu1 }
 0x567   :  { %v7643_v7 = vadd.f32 %v7620_v33, %v7496_v34 }
 0x568   :  { %v7622_v61 = vpop.f32.mrf.mxu1 }
 0x569   :  { %v7644_v41 = vadd.f32 %v7622_v61, %v7498_v15 }
 0x56d   :  { %v7626_v25 = vpop.f32.mrf.mxu1 }
 0x56e   :  { %v7753_v8 = vpop.f32.mrf.mxu0  ;;  %v7645_v16 = vadd.f32 %v7626_v25, %v7502_v62 }
 0x56f   :  { %v7628_v29 = vpop.f32.mrf.mxu1  ;;  %v7776_v32 = vadd.f32 %v7753_v8, %v7643_v7 }
 0x570   :  { %v7755_v28 = vpop.f32.mrf.mxu0  ;;  %v7646_v56 = vadd.f32 %v7628_v29, %v7504_v37  ;;  %v7945_v29 = vld [vmem:[%s13393_s10] sm:$0xff] }
 0x571   :  { %v7777_v2 = vadd.f32 %v7755_v28, %v7644_v41  ;;  %v7946_v28 = vld [vmem:[%s13393_s10 + $0x8] sm:$0xff] }
 0x572   :  { %v7632_v9 = vpop.f32.mrf.mxu1  ;;  %v7759_v23 = vpop.f32.mrf.mxu0 }
 0x573   :  { %v7647_v20 = vadd.f32 %v7632_v9, %v7508_v57  ;;  %v7778_v31 = vadd.f32 %v7759_v23, %v7645_v16 }
 0x574   :  { %v7634_v47 = vpop.f32.mrf.mxu1  ;;  %v7761_v39 = vpop.f32.mrf.mxu0 }
 0x575   :  { %v7648_v11 = vadd.f32 %v7634_v47, %v7510_v19  ;;  %v7779_v42 = vadd.f32 %v7761_v39, %v7646_v56  ;;  %v7947_v39 = vld [vmem:[%s13393_s10 + $0x10] sm:$0xff] }
 0x576   :  { %v7765_v1 = vpop.f32.mrf.mxu0 }
 0x577   :  { %v7638_v43 = vpop.f32.mrf.mxu1  ;;  %v7780_v40 = vadd.f32 %v7765_v1, %v7647_v20 }
 0x578   :  { %v7767_v6 = vpop.f32.mrf.mxu0  ;;  %v7649_v27 = vadd.f32 %v7638_v43, %v7514_v0  ;;  %v7948_v43 = vld [vmem:[%s13393_s10 + $0x18] sm:$0xff] }
 0x579   :  { %v7640_v54 = vpop.f32.mrf.mxu1  ;;  %v7781_v48 = vadd.f32 %v7767_v6, %v7648_v11 }
 0x57a   :  { %v7771_v18 = vpop.f32.mrf.mxu0  ;;  %v7650_v35 = vadd.f32 %v7640_v54, %v7516_v63 }
 0x57b   :  { %v7782_v49 = vadd.f32 %v7771_v18, %v7649_v27 }
 0x57c   :  { %v7773_v12 = vpop.f32.mrf.mxu0 }
 0x57d   :  { %v7783_v36 = vadd.f32 %v7773_v12, %v7650_v35 }
 0x58c   :  { %v7886_v3 = vpop.f32.mrf.mxu1 }
 0x58d   :  { %v7909_v38 = vadd.f32 %v7886_v3, %v7776_v32 }
 0x58e   :  { %v7888_v14 = vpop.f32.mrf.mxu1 }
 0x58f   :  { %v7929_v26 = vadd.f32 %v7922_v4, %v7909_v38  ;;  %v7910_v10 = vadd.f32 %v7888_v14, %v7777_v2  ;;  %v17_v38 = vstv %s13394_s11  ;;  %v13503_v14 = vld [vmem:[#allocation44_spill] sm:$0xff] }
 0x590   :  { %v7892_v53 = vpop.f32.mrf.mxu1  ;;  %18 = vst [vmem:[#allocation8] sm:$0x1] %v17_v38 }
 0x591   :  { %9315 = vtanh.f32 %v7929_v26  ;;  %v7930_v24 = vadd.f32 %v7926_v21, %v7910_v10  ;;  %v7911_v52 = vadd.f32 %v7892_v53, %v7778_v31 }
 0x592   :  { %v7894_v58 = vpop.f32.mrf.mxu1 }
 0x593   :  { %9317 = vtanh.f32 %v7930_v24  ;;  %v7931_v5 = vadd.f32 %v7922_v4, %v7911_v52  ;;  %v7912_v45 = vadd.f32 %v7894_v58, %v7779_v42 }
 0x594   :  { %v7898_v30 = vpop.f32.mrf.mxu1 }
 0x595   :  { %9319 = vtanh.f32 %v7931_v5  ;;  %v7932_v55 = vadd.f32 %v7926_v21, %v7912_v45  ;;  %v7913_v22 = vadd.f32 %v7898_v30, %v7780_v40 }
 0x596   :  { %v7900_v59 = vpop.f32.mrf.mxu1 }
 0x597   :  { %9321 = vtanh.f32 %v7932_v55  ;;  %v7933_v50 = vadd.f32 %v7922_v4, %v7913_v22  ;;  %v7914_v44 = vadd.f32 %v7900_v59, %v7781_v48  ;;  %v8303_v27 = vld [vmem:[#allocation8] ss:$0 sm:$0xff] }
 0x598   :  { %v7904_v17 = vpop.f32.mrf.mxu1 }
 0x599   :  { %9323 = vtanh.f32 %v7933_v50  ;;  %v7934_v33 = vadd.f32 %v7926_v21, %v7914_v44  ;;  %v7915_v13 = vadd.f32 %v7904_v17, %v7782_v49 }
 0x59a   :  { %v7906_v61 = vpop.f32.mrf.mxu1 }
 0x59b   :  { %9325 = vtanh.f32 %v7934_v33  ;;  %v7935_v60 = vadd.f32 %v7922_v4, %v7915_v13  ;;  %v7916_v25 = vadd.f32 %v7906_v61, %v7783_v36 }
 0x59d   :  { %9327 = vtanh.f32 %v7935_v60  ;;  %v7936_v46 = vadd.f32 %v7926_v21, %v7916_v25  ;;  %v13502_v21 = vlaneseq }
 0x59e   :  { %v9316_v8 = vpop.eup %9315 }
 0x59f   :  { %9329 = vtanh.f32 %v7936_v46  ;;  %v7949_v23 = vmul.f32 %v9316_v8, %v7945_v29  ;;  %v7974_v19 = vand.u32 127, %v13502_v21 }
 0x5a0   :  { %v9318_v9 = vpop.eup %9317 }
 0x5a1   :  { %v7950_v47 = vmul.f32 %v9318_v9, %v7946_v28  ;;  %v7979_v6 = vadd.s32 4294967288, %v7974_v19  ;;  %v7977_v0 = vsub.s32 %v7974_v19, %v13503_v14 }
 0x5a2   :  { %v9320_v34 = vpop.eup %9319 }
 0x5a3   :  { %v7957_v15 = vadd.f32 %v7950_v47, %v7949_v23  ;;  %v7951_v51 = vmul.f32 %v9320_v34, %v7947_v39  ;;  %v7982_v31 = vsub.s32 %v7979_v6, %v13503_v14 }
 0x5a4   :  { %v9322_v7 = vpop.eup %9321 }
 0x5a5   :  { %7958 = vadd.xlane.f32.xlu0 %v7957_v15  ;;  %v7952_v62 = vmul.f32 %v9322_v7, %v7948_v43 }
 0x5a6   :  { %v9324_v41 = vpop.eup %9323 }
 0x5a7   :  { %v7960_v1 = vadd.f32 %v7952_v62, %v7951_v51  ;;  %v7953_v37 = vmul.f32 %v9324_v41, %v7945_v29 }
 0x5a8   :  { %v9326_v54 = vpop.eup %9325 }
 0x5a9   :  { %7961 = vadd.xlane.f32.xlu0 %v7960_v1  ;;  %v7954_v32 = vmul.f32 %v9326_v54, %v7946_v28 }
 0x5aa   :  { %v9328_v16 = vpop.eup %9327 }
 0x5ab   :  { %v7963_v4 = vadd.f32 %v7954_v32, %v7953_v37  ;;  %v7955_v3 = vmul.f32 %v9328_v16, %v7947_v39 }
 0x5ac   :  { %v9330_v57 = vpop.eup %9329 }
 0x5ad   :  { %7964 = vadd.xlane.f32.xlu1 %v7963_v4  ;;  %v7956_v2 = vmul.f32 %v9330_v57, %v7948_v43 }
 0x5af   :  { %v7966_v56 = vadd.f32 %v7956_v2, %v7955_v3 }
 0x5b1   :  { %7967 = vadd.xlane.f32.xlu1 %v7966_v56 }
 0x62e   :  { %v7959_v20 = vpop.xlane.xlu0 %7958 }
 0x62f   :  { %v7978_v42 = vrot.slane %v7959_v20, %v7977_v0 }
 0x632   :  { %v7962_v26 = vpop.xlane.xlu0 %7961 }
 0x633   :  { %v7983_v11 = vrot.slane %v7962_v26, %v7982_v31 }
 0x635   :  { %v7985_v63 = vsel %vm7984_vm15, %v7983_v11, %v7978_v42 }
 0x636   :  { %v7965_v10 = vpop.xlane.xlu1 %7964 }
 0x637   :  { %v7989_v24 = vrot.slane %v7965_v10, %v7977_v0 }
 0x63a   :  { %v7968_v53 = vpop.xlane.xlu1 %7967 }
 0x63b   :  { %v7993_v52 = vrot.slane %v7968_v53, %v7982_v31 }
 0x63d   :  { %v7994_v40 = vsel %vm7984_vm15, %v7993_v52, %v7989_v24 }
 0x63e   :  { %v7995_v18 = vsel %vm3088_vm3, %v7994_v40, %v7985_v63 }
 0x63f   :  { %v7998_v58 = vsel %vm7997_vm0, %v7995_v18, 0.0 }
 0x640   :  { %7999 = vadd.xlane.f32.xlu0 %v7998_v58 }
 0x6c9   :  { %v8000_v5 = vpop.xlane.xlu0 %7999 }
 0x6ca   :  { %v8008_v45 = vadd.f32 %v8303_v27, %v8000_v5 }
 0x6cc   :  { %8010 = vst.msk [vmem:[%s13395_s12] sm:$0x3] %vm8009_vm1, %v8008_v45 }

</bundles_post_ra>
